<compile_context>
chip_gen: v5e
topology: v5e:2x2
jax: 0.10.0
libtpu: 0.0.40
codegen_flags: <defaults>
</compile_context>

<pallas_src>
import functools

import jax
import jax.numpy as jnp
from jax.experimental import pallas as pl
from jax.experimental.pallas import tpu as pltpu

LANE = 128  # pad hidden / gate / embedding widths to the vreg lane width


def _round_up(x, m):
    return (x + m - 1) // m * m


# ----------------------------------------------------------------------------
# Fused BiRNN kernel (single invocation, no grid)
#
# PyTorch nn.GRU cell (gate order r | z | n):
#   r  = sigmoid(x Wir + b_ir + h Whr + b_hr)
#   z  = sigmoid(x Wiz + b_iz + h Whz + b_hz)
#   n  = tanh   (x Win + b_in + r * (h Whn + b_hn))
#   h' = (1 - z) * n + z * h
# b_hr / b_hz are folded into the input bias at pack time; b_hn stays separate.
# ----------------------------------------------------------------------------
def _birnn_fused_kernel(emb_ref, imgf_ref,
                        fwi_ref, fwh_ref, fbi_ref, fbhn_ref,          # fwd GRU
                        wim_ref, whd_ref, bfc_ref,                    # image fc
                        bwe_ref, bwq_ref, bwh_ref, bbi_ref, bbhn_ref,  # bwd GRU
                        out_ref,
                        xp_sc, h_sc, xb_sc):
    T, Bp, Ewp = emb_ref.shape
    Hp = fwh_ref.shape[0]          # padded forward hidden width (128)
    Ep = bwh_ref.shape[0]          # padded backward hidden width (128)
    f32 = jnp.float32
    bf16 = jnp.bfloat16

    def gru_cell(xp, h, wh, bhn, w):
        # xp = x @ Wi + bi (precomputed, batched); only h @ Wh is on the chain.
        hp = jnp.dot(h.astype(wh.dtype), wh, preferred_element_type=f32)
        r = jax.nn.sigmoid(xp[:, :w] + hp[:, :w])
        z = jax.nn.sigmoid(xp[:, w:2 * w] + hp[:, w:2 * w])
        n = jnp.tanh(xp[:, 2 * w:] + r * (hp[:, 2 * w:] + bhn))
        return (1.0 - z) * n + z * h

    # ---------------- batched prologue (off the recurrence chain) -----------
    qx_all = jnp.tanh(emb_ref[...])                       # (T, Bp, Ewp) qst_vec
    qx2 = qx_all.reshape(T * Bp, Ewp)

    # Forward-GRU input projection for every timestep in one GEMM.
    xp_all = (jnp.dot(qx2.astype(bf16), fwi_ref[...],
                      preferred_element_type=f32) + fbi_ref[...])     # (T*Bp, 3Hp)
    xp_sc[...] = xp_all.reshape(T, Bp, 3 * Hp)

    # qst half of the backward-GRU input projection: tanh([enc ; qx]) splits
    # elementwise, so the qx part is tanh(qx) @ W and can be done now.
    xb_qst = (jnp.dot(jnp.tanh(qx2).astype(bf16), bwq_ref[...],
                      preferred_element_type=f32) + bbi_ref[...])     # (T*Bp, 3Ep)
    xb_sc[...] = xb_qst.reshape(T, Bp, 3 * Ep)

    # ---------------- forward GRU recurrence ---------------------------------
    fwh_v = fwh_ref[...]                                   # hoisted (bf16)
    fbhn_b = jnp.broadcast_to(fbhn_ref[...], (Bp, Hp))     # hoisted broadcast
    h = jnp.zeros((Bp, Hp), f32)
    for t in range(T):
        h = gru_cell(xp_sc[t], h, fwh_v, fbhn_b, Hp)
        h_sc[t] = h                                        # off the chain

    # ---------------- batched epilogue of the forward sweep ------------------
    # image_encoder.fc: encoding_t = [img_feat ; h_t] @ W_fc + b.
    img_part = (jnp.dot(imgf_ref[...].astype(bf16), wim_ref[...],
                        preferred_element_type=f32) + bfc_ref[...])   # (Bp, Hp)
    H2 = h_sc[...].reshape(T * Bp, Hp)
    enc = (jnp.dot(H2.astype(bf16), whd_ref[...],
                   preferred_element_type=f32).reshape(T, Bp, Hp)
           + img_part[None, :, :])                                    # (T, Bp, Hp)

    # enc half of the backward-GRU input projection, batched over T*Bp.
    xb_enc = jnp.dot(jnp.tanh(enc).reshape(T * Bp, Hp).astype(bf16),
                     bwe_ref[...], preferred_element_type=f32)        # (T*Bp, 3Ep)
    xb_sc[...] = xb_sc[...] + xb_enc.reshape(T, Bp, 3 * Ep)

    # ---------------- backward GRU recurrence --------------------------------
    # torch.flip is just reversed indexing of the scratch; only the final
    # hidden state (the module's return value) is emitted.
    bwh_v = bwh_ref[...]
    bbhn_b = jnp.broadcast_to(bbhn_ref[...], (Bp, Ep))
    hb = jnp.zeros((Bp, Ep), f32)
    for s in range(T):
        hb = gru_cell(xb_sc[T - 1 - s], hb, bwh_v, bbhn_b, Ep)

    out_ref[...] = hb.astype(out_ref.dtype)


def birnn_fused_pallas(emb_tm, img_feat, packed):
    """emb_tm: (T, Bp, Ewp) raw word embeddings (time-major, padded).
    Returns the padded final backward hidden state, shape (Bp, Ep)."""
    T, Bp, _ = emb_tm.shape
    Hp = packed["fwd_wh"].shape[0]
    Ep = packed["bwd_wh"].shape[0]
    vmem = pl.BlockSpec(memory_space=pltpu.MemorySpace.VMEM)
    return pl.pallas_call(
        _birnn_fused_kernel,
        out_shape=jax.ShapeDtypeStruct((Bp, Ep), jnp.float32),
        in_specs=[vmem] * 14,
        out_specs=vmem,
        scratch_shapes=[
            pltpu.VMEM((T, Bp, 3 * Hp), jnp.float32),   # xp_sc: fwd input proj
            pltpu.VMEM((T, Bp, Hp), jnp.float32),       # h_sc : fwd hidden seq
            pltpu.VMEM((T, Bp, 3 * Ep), jnp.float32),   # xb_sc: bwd input proj
        ],
    )(emb_tm, img_feat,
      packed["fwd_wi"], packed["fwd_wh"], packed["fwd_bi"], packed["fwd_bhn"],
      packed["fc_w_img"], packed["fc_w_hid"], packed["fc_b"],
      packed["bwd_wi_enc"], packed["bwd_wi_qst"], packed["bwd_wh"],
      packed["bwd_bi"], packed["bwd_bhn"])


# ----------------------------------------------------------------------------
# Parameters: logical (PyTorch-like) shapes + packing/padding for the kernel
# ----------------------------------------------------------------------------
def make_params(key, *, vocab, word_embed, embed, hidden, img_channels, feat):
    ks = jax.random.split(key, 12)
    rnd = lambda k, shape: 0.1 * jax.random.normal(k, shape, jnp.float32)
    return {
        "word2vec": rnd(ks[0], (vocab, word_embed)),
        # forward GRU (word_embed -> hidden), fused gate order [r|z|n]
        "fwd_wi": rnd(ks[1], (word_embed, 3 * hidden)),
        "fwd_wh": rnd(ks[2], (hidden, 3 * hidden)),
        "fwd_bi": rnd(ks[3], (1, 3 * hidden)),
        "fwd_bh": rnd(ks[4], (1, 3 * hidden)),
        # backward GRU (hidden + word_embed -> embed)
        "bwd_wi": rnd(ks[5], (hidden + word_embed, 3 * embed)),
        "bwd_wh": rnd(ks[6], (embed, 3 * embed)),
        "bwd_bi": rnd(ks[7], (1, 3 * embed)),
        "bwd_bh": rnd(ks[8], (1, 3 * embed)),
        # image_encoder.fc : Linear(feat + hidden, hidden), input [img ; hid]
        "fc_w": rnd(ks[9], (feat + hidden, hidden)),
        "fc_b": jnp.zeros((1, hidden), jnp.float32),
        # ResNet152 substitute: pooled channels -> feature vector
        "backbone_w": rnd(ks[10], (img_channels, feat)),
        "backbone_b": rnd(ks[11], (1, feat)),
    }


def _pad_cols(x, n):
    return jnp.pad(x, ((0, 0), (0, n - x.shape[1])))


def _pad_rows(x, n):
    return jnp.pad(x, ((0, n - x.shape[0]), (0, 0)))


def _pad_gate_blocks(w, width, padded):
    """(K, 3*width) -> (K, 3*padded): zero-pad each gate block to `padded`."""
    blocks = [w[:, g * width:(g + 1) * width] for g in range(3)]
    return jnp.concatenate([_pad_cols(b, padded) for b in blocks], axis=1)


def _fold_rz_bias(bi, bh, width):
    """Fold the r/z hidden biases into the input bias (n bias kept separate)."""
    return jnp.concatenate(
        [bi[:, :width] + bh[:, :width],
         bi[:, width:2 * width] + bh[:, width:2 * width],
         bi[:, 2 * width:]], axis=1)


def pack_params(p, *, word_embed, embed, hidden, feat):
    """Fuse/pad/quantize parameters once (off the hot path) for the kernel.

    Padding invariant: every padded weight row/col and bias lane is exactly
    zero — this keeps the extra lanes of the recurrent state inert.  All
    padding is produced here from unpadded params, so it holds by construction.
    Weights -> bf16 (MXU native); biases stay f32 (added to f32 accumulators).
    """
    Hp = _round_up(hidden, LANE)
    Ep = _round_up(embed, LANE)
    Ewp = _round_up(word_embed, LANE)
    Fp = _round_up(feat, LANE)
    bf16 = jnp.bfloat16
    return {
        "word2vec": p["word2vec"],
        "backbone_w": p["backbone_w"], "backbone_b": p["backbone_b"],
        # forward GRU
        "fwd_wi": _pad_rows(_pad_gate_blocks(p["fwd_wi"], hidden, Hp), Ewp).astype(bf16),
        "fwd_wh": _pad_rows(_pad_gate_blocks(p["fwd_wh"], hidden, Hp), Hp).astype(bf16),
        "fwd_bi": _pad_gate_blocks(
            _fold_rz_bias(p["fwd_bi"], p["fwd_bh"], hidden), hidden, Hp),
        "fwd_bhn": _pad_cols(p["fwd_bh"][:, 2 * hidden:], Hp),
        # image_encoder.fc split into the image half and the hidden half
        "fc_w_img": _pad_rows(_pad_cols(p["fc_w"][:feat], Hp), Fp).astype(bf16),
        "fc_w_hid": _pad_rows(_pad_cols(p["fc_w"][feat:], Hp), Hp).astype(bf16),
        "fc_b": _pad_cols(p["fc_b"], Hp),
        # backward GRU, input = tanh([encoding ; qst_vec])
        "bwd_wi_enc": _pad_rows(
            _pad_gate_blocks(p["bwd_wi"][:hidden], embed, Ep), Hp).astype(bf16),
        "bwd_wi_qst": _pad_rows(
            _pad_gate_blocks(p["bwd_wi"][hidden:], embed, Ep), Ewp).astype(bf16),
        "bwd_wh": _pad_rows(_pad_gate_blocks(p["bwd_wh"], embed, Ep), Ep).astype(bf16),
        "bwd_bi": _pad_gate_blocks(
            _fold_rz_bias(p["bwd_bi"], p["bwd_bh"], embed), embed, Ep),
        "bwd_bhn": _pad_cols(p["bwd_bh"][:, 2 * embed:], Ep),
    }


# ----------------------------------------------------------------------------
# Full BiRnnEncoder forward
# ----------------------------------------------------------------------------
@functools.partial(jax.jit, static_argnames=("embed_size",))
def birnn_encoder_forward(packed, img, qst, *, embed_size):
    # qst: (B, T) int32, img: (B, C, H, W) float32 (NCHW)
    emb = packed["word2vec"][qst]                   # (B, T, Ew)  (tanh in kernel)
    emb_tm = jnp.transpose(emb, (1, 0, 2))          # (T, B, Ew)  time-major
    T, B, Ew = emb_tm.shape
    Bp = _round_up(max(B, 8), 8)                    # full-sublane stores
    Ewp = packed["fwd_wi"].shape[0]
    Fp = packed["fc_w_img"].shape[0]

    emb_p = jnp.pad(emb_tm, ((0, 0), (0, Bp - B), (0, Ewp - Ew)))

    # TODO(synk): ResNet152 backbone substitute (global avg-pool + linear).
    pooled = jnp.mean(img, axis=(2, 3))                                # (B, C)
    img_feat = pooled @ packed["backbone_w"] + packed["backbone_b"]    # (B, F)
    img_p = jnp.pad(img_feat, ((0, Bp - B), (0, Fp - img_feat.shape[1])))

    h_pad = birnn_fused_pallas(emb_p, img_p, packed)                   # (Bp, Ep)
    return h_pad[:B, :embed_size]


# ----------------------------------------------------------------------------
# Pure-JAX reference (same math, un-padded / un-fused / f32) for sanity check
# ----------------------------------------------------------------------------
def _gru_ref(x_seq, wi, wh, bi, bh, width):
    def step(h, x_t):
        xp = x_t @ wi + bi
        hp = h @ wh + bh
        r = jax.nn.sigmoid(xp[:, :width] + hp[:, :width])
        z = jax.nn.sigmoid(xp[:, width:2 * width] + hp[:, width:2 * width])
        n = jnp.tanh(xp[:, 2 * width:] + r * hp[:, 2 * width:])
        h_new = (1.0 - z) * n + z * h
        return h_new, h_new
    h0 = jnp.zeros((x_seq.shape[1], width), jnp.float32)
    h_fin, out = jax.lax.scan(step, h0, x_seq)
    return out, h_fin


def birnn_reference(params, img, qst, *, hidden, embed):
    qst_vec = jnp.tanh(params["word2vec"][qst])
    qst_vec = jnp.transpose(qst_vec, (1, 0, 2))                         # (T,B,Ew)
    out_f, _ = _gru_ref(qst_vec, params["fwd_wi"], params["fwd_wh"],
                        params["fwd_bi"], params["fwd_bh"], hidden)
    pooled = jnp.mean(img, axis=(2, 3))
    img_feat = pooled @ params["backbone_w"] + params["backbone_b"]     # (B,F)
    img_rep = jnp.broadcast_to(img_feat, (out_f.shape[0],) + img_feat.shape)
    enc = jnp.concatenate([img_rep, out_f], axis=2) @ params["fc_w"] + params["fc_b"]
    concat = jnp.tanh(jnp.concatenate(
        [jnp.flip(enc, 0), jnp.flip(qst_vec, 0)], axis=2))
    _, h_fin = _gru_ref(concat, params["bwd_wi"], params["bwd_wh"],
                        params["bwd_bi"], params["bwd_bh"], embed)
    return h_fin


# ----------------------------------------------------------------------------
if __name__ == "__main__":
    QST_VOCAB = 50
    WORD_EMBED = 32
    EMBED = 32
    HIDDEN = 32
    FEAT = 64          # stand-in for resnet152 fc.in_features
    B, T = 2, 8
    C, HH, WW = 4, 16, 16

    key = jax.random.PRNGKey(0)
    k_params, k_img, k_qst = jax.random.split(key, 3)

    params = make_params(k_params, vocab=QST_VOCAB, word_embed=WORD_EMBED,
                         embed=EMBED, hidden=HIDDEN, img_channels=C, feat=FEAT)
    packed = pack_params(params, word_embed=WORD_EMBED, embed=EMBED,
                         hidden=HIDDEN, feat=FEAT)

    img = jax.random.normal(k_img, (B, C, HH, WW), jnp.float32)
    qst = jax.random.randint(k_qst, (B, T), 0, QST_VOCAB, jnp.int32)

    out = birnn_encoder_forward(packed, img, qst, embed_size=EMBED)
    out = jax.block_until_ready(out)

    assert out.shape == (B, EMBED), out.shape
    assert bool(jnp.all(jnp.isfinite(out)))

    # f32 reference; tolerance covers bf16 weight/activation quantization only.
    ref = birnn_reference(params, img, qst, hidden=HIDDEN, embed=EMBED)
    max_err = float(jnp.max(jnp.abs(out - ref)))
    assert max_err < 1e-2, f"mismatch vs reference: {max_err}"

    print("KERNEL_OK")
</pallas_src>

<mosaic_0001>
module attributes {stable_mosaic.version = 11 : i64} {
  func.func @_birnn_fused_kernel(%arg0: memref<8x8x128xf32, #tpu.memory_space<vmem>>, %arg1: memref<8x128xf32, #tpu.memory_space<vmem>>, %arg2: memref<128x384xbf16, #tpu.memory_space<vmem>>, %arg3: memref<128x384xbf16, #tpu.memory_space<vmem>>, %arg4: memref<1x384xf32, #tpu.memory_space<vmem>>, %arg5: memref<1x128xf32, #tpu.memory_space<vmem>>, %arg6: memref<128x128xbf16, #tpu.memory_space<vmem>>, %arg7: memref<128x128xbf16, #tpu.memory_space<vmem>>, %arg8: memref<1x128xf32, #tpu.memory_space<vmem>>, %arg9: memref<128x384xbf16, #tpu.memory_space<vmem>>, %arg10: memref<128x384xbf16, #tpu.memory_space<vmem>>, %arg11: memref<128x384xbf16, #tpu.memory_space<vmem>>, %arg12: memref<1x384xf32, #tpu.memory_space<vmem>>, %arg13: memref<1x128xf32, #tpu.memory_space<vmem>>, %arg14: memref<8x128xf32, #tpu.memory_space<vmem>>, %arg15: memref<8x8x384xf32, #tpu.memory_space<vmem>>, %arg16: memref<8x8x128xf32, #tpu.memory_space<vmem>>, %arg17: memref<8x8x384xf32, #tpu.memory_space<vmem>>) attributes {dimension_semantics = [], scalar_prefetch = 0 : i64, scratch_operands = 3 : i64, tpu.core_type = #tpu.core_type<tc>} {
    %c0 = arith.constant 0 : index
    %c0_0 = arith.constant 0 : index
    %c0_1 = arith.constant 0 : index
    %0 = vector.load %arg0[%c0, %c0_0, %c0_1] : memref<8x8x128xf32, #tpu.memory_space<vmem>>, vector<8x8x128xf32>
    %1 = math.tanh %0 : vector<8x8x128xf32>
    %2 = vector.shape_cast %1 : vector<8x8x128xf32> to vector<64x128xf32>
    %3 = arith.truncf %2 : vector<64x128xf32> to vector<64x128xbf16>
    %c0_2 = arith.constant 0 : index
    %c0_3 = arith.constant 0 : index
    %4 = vector.load %arg2[%c0_2, %c0_3] : memref<128x384xbf16, #tpu.memory_space<vmem>>, vector<128x384xbf16>
    %cst = arith.constant dense<0.000000e+00> : vector<64x384xf32>
    %5 = tpu.matmul %3, %4, %cst {dimension_numbers = #tpu.dot_dimension_numbers<[1], [0], [0], [1], [0, 0, 1, 1], [], []>} : vector<64x128xbf16>, vector<128x384xbf16>, vector<64x384xf32> -> vector<64x384xf32>
    %c0_4 = arith.constant 0 : index
    %c0_5 = arith.constant 0 : index
    %6 = vector.load %arg4[%c0_4, %c0_5] : memref<1x384xf32, #tpu.memory_space<vmem>>, vector<1x384xf32>
    %7 = vector.broadcast %6 : vector<1x384xf32> to vector<64x384xf32>
    %8 = arith.addf %5, %7 : vector<64x384xf32>
    %9 = vector.shape_cast %8 : vector<64x384xf32> to vector<8x8x384xf32>
    %c0_6 = arith.constant 0 : index
    %c0_7 = arith.constant 0 : index
    %c0_8 = arith.constant 0 : index
    %10 = vector.load %arg15[%c0_6, %c0_7, %c0_8] : memref<8x8x384xf32, #tpu.memory_space<vmem>>, vector<8x8x384xf32>
    tpu.vector_store %arg15[%c0_6, %c0_7, %c0_8], %9 {strides = array<i32>} : memref<8x8x384xf32, #tpu.memory_space<vmem>>, vector<8x8x384xf32>,
    %11 = math.tanh %2 : vector<64x128xf32>
    %12 = arith.truncf %11 : vector<64x128xf32> to vector<64x128xbf16>
    %c0_9 = arith.constant 0 : index
    %c0_10 = arith.constant 0 : index
    %13 = vector.load %arg10[%c0_9, %c0_10] : memref<128x384xbf16, #tpu.memory_space<vmem>>, vector<128x384xbf16>
    %cst_11 = arith.constant dense<0.000000e+00> : vector<64x384xf32>
    %14 = tpu.matmul %12, %13, %cst_11 {dimension_numbers = #tpu.dot_dimension_numbers<[1], [0], [0], [1], [0, 0, 1, 1], [], []>} : vector<64x128xbf16>, vector<128x384xbf16>, vector<64x384xf32> -> vector<64x384xf32>
    %c0_12 = arith.constant 0 : index
    %c0_13 = arith.constant 0 : index
    %15 = vector.load %arg12[%c0_12, %c0_13] : memref<1x384xf32, #tpu.memory_space<vmem>>, vector<1x384xf32>
    %16 = vector.broadcast %15 : vector<1x384xf32> to vector<64x384xf32>
    %17 = arith.addf %14, %16 : vector<64x384xf32>
    %18 = vector.shape_cast %17 : vector<64x384xf32> to vector<8x8x384xf32>
    %c0_14 = arith.constant 0 : index
    %c0_15 = arith.constant 0 : index
    %c0_16 = arith.constant 0 : index
    %19 = vector.load %arg17[%c0_14, %c0_15, %c0_16] : memref<8x8x384xf32, #tpu.memory_space<vmem>>, vector<8x8x384xf32>
    tpu.vector_store %arg17[%c0_14, %c0_15, %c0_16], %18 {strides = array<i32>} : memref<8x8x384xf32, #tpu.memory_space<vmem>>, vector<8x8x384xf32>,
    %c0_17 = arith.constant 0 : index
    %c0_18 = arith.constant 0 : index
    %20 = vector.load %arg3[%c0_17, %c0_18] : memref<128x384xbf16, #tpu.memory_space<vmem>>, vector<128x384xbf16>
    %c0_19 = arith.constant 0 : index
    %c0_20 = arith.constant 0 : index
    %21 = vector.load %arg5[%c0_19, %c0_20] : memref<1x128xf32, #tpu.memory_space<vmem>>, vector<1x128xf32>
    %22 = vector.shape_cast %21 : vector<1x128xf32> to vector<1x128xf32>
    %23 = vector.broadcast %22 : vector<1x128xf32> to vector<8x128xf32>
    %cst_21 = arith.constant 0.000000e+00 : f32
    %24 = vector.broadcast %cst_21 : f32 to vector<8x128xf32>
    %c0_22 = arith.constant 0 : index
    %c0_23 = arith.constant 0 : index
    %c0_24 = arith.constant 0 : index
    %25 = vector.load %arg15[%c0_22, %c0_23, %c0_24] : memref<8x8x384xf32, #tpu.memory_space<vmem>>, vector<1x8x384xf32>
    %26 = vector.shape_cast %25 : vector<1x8x384xf32> to vector<8x384xf32>
    %27 = arith.truncf %24 : vector<8x128xf32> to vector<8x128xbf16>
    %cst_25 = arith.constant dense<0.000000e+00> : vector<8x384xf32>
    %28 = tpu.matmul %27, %20, %cst_25 {dimension_numbers = #tpu.dot_dimension_numbers<[1], [0], [0], [1], [0, 0, 1, 1], [], []>} : vector<8x128xbf16>, vector<128x384xbf16>, vector<8x384xf32> -> vector<8x384xf32>
    %29 = vector.extract_strided_slice %26 {offsets = [0, 0], sizes = [8, 128], strides = [1, 1]} : vector<8x384xf32> to vector<8x128xf32>
    %30 = vector.extract_strided_slice %28 {offsets = [0, 0], sizes = [8, 128], strides = [1, 1]} : vector<8x384xf32> to vector<8x128xf32>
    %31 = arith.addf %29, %30 : vector<8x128xf32>
    %32 = arith.negf %31 : vector<8x128xf32>
    %33 = math.exp %32 : vector<8x128xf32>
    %cst_26 = arith.constant 1.000000e+00 : f32
    %34 = vector.broadcast %cst_26 : f32 to vector<8x128xf32>
    %35 = arith.addf %34, %33 : vector<8x128xf32>
    %36 = arith.divf %34, %35 : vector<8x128xf32>
    %37 = vector.extract_strided_slice %26 {offsets = [0, 128], sizes = [8, 128], strides = [1, 1]} : vector<8x384xf32> to vector<8x128xf32>
    %38 = vector.extract_strided_slice %28 {offsets = [0, 128], sizes = [8, 128], strides = [1, 1]} : vector<8x384xf32> to vector<8x128xf32>
    %39 = arith.addf %37, %38 : vector<8x128xf32>
    %40 = arith.negf %39 : vector<8x128xf32>
    %41 = math.exp %40 : vector<8x128xf32>
    %cst_27 = arith.constant 1.000000e+00 : f32
    %42 = vector.broadcast %cst_27 : f32 to vector<8x128xf32>
    %43 = arith.addf %42, %41 : vector<8x128xf32>
    %44 = arith.divf %42, %43 : vector<8x128xf32>
    %45 = vector.extract_strided_slice %26 {offsets = [0, 256], sizes = [8, 128], strides = [1, 1]} : vector<8x384xf32> to vector<8x128xf32>
    %46 = vector.extract_strided_slice %28 {offsets = [0, 256], sizes = [8, 128], strides = [1, 1]} : vector<8x384xf32> to vector<8x128xf32>
    %47 = arith.addf %46, %23 : vector<8x128xf32>
    %48 = arith.mulf %36, %47 : vector<8x128xf32>
    %49 = arith.addf %45, %48 : vector<8x128xf32>
    %50 = math.tanh %49 : vector<8x128xf32>
    %cst_28 = arith.constant 1.000000e+00 : f32
    %51 = vector.broadcast %cst_28 : f32 to vector<8x128xf32>
    %52 = arith.subf %51, %44 : vector<8x128xf32>
    %53 = arith.mulf %52, %50 : vector<8x128xf32>
    %54 = arith.mulf %44, %24 : vector<8x128xf32>
    %55 = arith.addf %53, %54 : vector<8x128xf32>
    %c0_29 = arith.constant 0 : index
    %c0_30 = arith.constant 0 : index
    %c0_31 = arith.constant 0 : index
    %56 = vector.load %arg16[%c0_29, %c0_30, %c0_31] : memref<8x8x128xf32, #tpu.memory_space<vmem>>, vector<1x8x128xf32>
    %57 = vector.shape_cast %56 : vector<1x8x128xf32> to vector<8x128xf32>
    %58 = vector.shape_cast %55 : vector<8x128xf32> to vector<1x8x128xf32>
    tpu.vector_store %arg16[%c0_29, %c0_30, %c0_31], %58 {strides = array<i32>} : memref<8x8x128xf32, #tpu.memory_space<vmem>>, vector<1x8x128xf32>,
    %c1 = arith.constant 1 : index
    %c0_32 = arith.constant 0 : index
    %c0_33 = arith.constant 0 : index
    %59 = vector.load %arg15[%c1, %c0_32, %c0_33] : memref<8x8x384xf32, #tpu.memory_space<vmem>>, vector<1x8x384xf32>
    %60 = vector.shape_cast %59 : vector<1x8x384xf32> to vector<8x384xf32>
    %61 = arith.truncf %55 : vector<8x128xf32> to vector<8x128xbf16>
    %cst_34 = arith.constant dense<0.000000e+00> : vector<8x384xf32>
    %62 = tpu.matmul %61, %20, %cst_34 {dimension_numbers = #tpu.dot_dimension_numbers<[1], [0], [0], [1], [0, 0, 1, 1], [], []>} : vector<8x128xbf16>, vector<128x384xbf16>, vector<8x384xf32> -> vector<8x384xf32>
    %63 = vector.extract_strided_slice %60 {offsets = [0, 0], sizes = [8, 128], strides = [1, 1]} : vector<8x384xf32> to vector<8x128xf32>
    %64 = vector.extract_strided_slice %62 {offsets = [0, 0], sizes = [8, 128], strides = [1, 1]} : vector<8x384xf32> to vector<8x128xf32>
    %65 = arith.addf %63, %64 : vector<8x128xf32>
    %66 = arith.negf %65 : vector<8x128xf32>
    %67 = math.exp %66 : vector<8x128xf32>
    %cst_35 = arith.constant 1.000000e+00 : f32
    %68 = vector.broadcast %cst_35 : f32 to vector<8x128xf32>
    %69 = arith.addf %68, %67 : vector<8x128xf32>
    %70 = arith.divf %68, %69 : vector<8x128xf32>
    %71 = vector.extract_strided_slice %60 {offsets = [0, 128], sizes = [8, 128], strides = [1, 1]} : vector<8x384xf32> to vector<8x128xf32>
    %72 = vector.extract_strided_slice %62 {offsets = [0, 128], sizes = [8, 128], strides = [1, 1]} : vector<8x384xf32> to vector<8x128xf32>
    %73 = arith.addf %71, %72 : vector<8x128xf32>
    %74 = arith.negf %73 : vector<8x128xf32>
    %75 = math.exp %74 : vector<8x128xf32>
    %cst_36 = arith.constant 1.000000e+00 : f32
    %76 = vector.broadcast %cst_36 : f32 to vector<8x128xf32>
    %77 = arith.addf %76, %75 : vector<8x128xf32>
    %78 = arith.divf %76, %77 : vector<8x128xf32>
    %79 = vector.extract_strided_slice %60 {offsets = [0, 256], sizes = [8, 128], strides = [1, 1]} : vector<8x384xf32> to vector<8x128xf32>
    %80 = vector.extract_strided_slice %62 {offsets = [0, 256], sizes = [8, 128], strides = [1, 1]} : vector<8x384xf32> to vector<8x128xf32>
    %81 = arith.addf %80, %23 : vector<8x128xf32>
    %82 = arith.mulf %70, %81 : vector<8x128xf32>
    %83 = arith.addf %79, %82 : vector<8x128xf32>
    %84 = math.tanh %83 : vector<8x128xf32>
    %cst_37 = arith.constant 1.000000e+00 : f32
    %85 = vector.broadcast %cst_37 : f32 to vector<8x128xf32>
    %86 = arith.subf %85, %78 : vector<8x128xf32>
    %87 = arith.mulf %86, %84 : vector<8x128xf32>
    %88 = arith.mulf %78, %55 : vector<8x128xf32>
    %89 = arith.addf %87, %88 : vector<8x128xf32>
    %c1_38 = arith.constant 1 : index
    %c0_39 = arith.constant 0 : index
    %c0_40 = arith.constant 0 : index
    %90 = vector.load %arg16[%c1_38, %c0_39, %c0_40] : memref<8x8x128xf32, #tpu.memory_space<vmem>>, vector<1x8x128xf32>
    %91 = vector.shape_cast %90 : vector<1x8x128xf32> to vector<8x128xf32>
    %92 = vector.shape_cast %89 : vector<8x128xf32> to vector<1x8x128xf32>
    tpu.vector_store %arg16[%c1_38, %c0_39, %c0_40], %92 {strides = array<i32>} : memref<8x8x128xf32, #tpu.memory_space<vmem>>, vector<1x8x128xf32>,
    %c2 = arith.constant 2 : index
    %c0_41 = arith.constant 0 : index
    %c0_42 = arith.constant 0 : index
    %93 = vector.load %arg15[%c2, %c0_41, %c0_42] : memref<8x8x384xf32, #tpu.memory_space<vmem>>, vector<1x8x384xf32>
    %94 = vector.shape_cast %93 : vector<1x8x384xf32> to vector<8x384xf32>
    %95 = arith.truncf %89 : vector<8x128xf32> to vector<8x128xbf16>
    %cst_43 = arith.constant dense<0.000000e+00> : vector<8x384xf32>
    %96 = tpu.matmul %95, %20, %cst_43 {dimension_numbers = #tpu.dot_dimension_numbers<[1], [0], [0], [1], [0, 0, 1, 1], [], []>} : vector<8x128xbf16>, vector<128x384xbf16>, vector<8x384xf32> -> vector<8x384xf32>
    %97 = vector.extract_strided_slice %94 {offsets = [0, 0], sizes = [8, 128], strides = [1, 1]} : vector<8x384xf32> to vector<8x128xf32>
    %98 = vector.extract_strided_slice %96 {offsets = [0, 0], sizes = [8, 128], strides = [1, 1]} : vector<8x384xf32> to vector<8x128xf32>
    %99 = arith.addf %97, %98 : vector<8x128xf32>
    %100 = arith.negf %99 : vector<8x128xf32>
    %101 = math.exp %100 : vector<8x128xf32>
    %cst_44 = arith.constant 1.000000e+00 : f32
    %102 = vector.broadcast %cst_44 : f32 to vector<8x128xf32>
    %103 = arith.addf %102, %101 : vector<8x128xf32>
    %104 = arith.divf %102, %103 : vector<8x128xf32>
    %105 = vector.extract_strided_slice %94 {offsets = [0, 128], sizes = [8, 128], strides = [1, 1]} : vector<8x384xf32> to vector<8x128xf32>
    %106 = vector.extract_strided_slice %96 {offsets = [0, 128], sizes = [8, 128], strides = [1, 1]} : vector<8x384xf32> to vector<8x128xf32>
    %107 = arith.addf %105, %106 : vector<8x128xf32>
    %108 = arith.negf %107 : vector<8x128xf32>
    %109 = math.exp %108 : vector<8x128xf32>
    %cst_45 = arith.constant 1.000000e+00 : f32
    %110 = vector.broadcast %cst_45 : f32 to vector<8x128xf32>
    %111 = arith.addf %110, %109 : vector<8x128xf32>
    %112 = arith.divf %110, %111 : vector<8x128xf32>
    %113 = vector.extract_strided_slice %94 {offsets = [0, 256], sizes = [8, 128], strides = [1, 1]} : vector<8x384xf32> to vector<8x128xf32>
    %114 = vector.extract_strided_slice %96 {offsets = [0, 256], sizes = [8, 128], strides = [1, 1]} : vector<8x384xf32> to vector<8x128xf32>
    %115 = arith.addf %114, %23 : vector<8x128xf32>
    %116 = arith.mulf %104, %115 : vector<8x128xf32>
    %117 = arith.addf %113, %116 : vector<8x128xf32>
    %118 = math.tanh %117 : vector<8x128xf32>
    %cst_46 = arith.constant 1.000000e+00 : f32
    %119 = vector.broadcast %cst_46 : f32 to vector<8x128xf32>
    %120 = arith.subf %119, %112 : vector<8x128xf32>
    %121 = arith.mulf %120, %118 : vector<8x128xf32>
    %122 = arith.mulf %112, %89 : vector<8x128xf32>
    %123 = arith.addf %121, %122 : vector<8x128xf32>
    %c2_47 = arith.constant 2 : index
    %c0_48 = arith.constant 0 : index
    %c0_49 = arith.constant 0 : index
    %124 = vector.load %arg16[%c2_47, %c0_48, %c0_49] : memref<8x8x128xf32, #tpu.memory_space<vmem>>, vector<1x8x128xf32>
    %125 = vector.shape_cast %124 : vector<1x8x128xf32> to vector<8x128xf32>
    %126 = vector.shape_cast %123 : vector<8x128xf32> to vector<1x8x128xf32>
    tpu.vector_store %arg16[%c2_47, %c0_48, %c0_49], %126 {strides = array<i32>} : memref<8x8x128xf32, #tpu.memory_space<vmem>>, vector<1x8x128xf32>,
    %c3 = arith.constant 3 : index
    %c0_50 = arith.constant 0 : index
    %c0_51 = arith.constant 0 : index
    %127 = vector.load %arg15[%c3, %c0_50, %c0_51] : memref<8x8x384xf32, #tpu.memory_space<vmem>>, vector<1x8x384xf32>
    %128 = vector.shape_cast %127 : vector<1x8x384xf32> to vector<8x384xf32>
    %129 = arith.truncf %123 : vector<8x128xf32> to vector<8x128xbf16>
    %cst_52 = arith.constant dense<0.000000e+00> : vector<8x384xf32>
    %130 = tpu.matmul %129, %20, %cst_52 {dimension_numbers = #tpu.dot_dimension_numbers<[1], [0], [0], [1], [0, 0, 1, 1], [], []>} : vector<8x128xbf16>, vector<128x384xbf16>, vector<8x384xf32> -> vector<8x384xf32>
    %131 = vector.extract_strided_slice %128 {offsets = [0, 0], sizes = [8, 128], strides = [1, 1]} : vector<8x384xf32> to vector<8x128xf32>
    %132 = vector.extract_strided_slice %130 {offsets = [0, 0], sizes = [8, 128], strides = [1, 1]} : vector<8x384xf32> to vector<8x128xf32>
    %133 = arith.addf %131, %132 : vector<8x128xf32>
    %134 = arith.negf %133 : vector<8x128xf32>
    %135 = math.exp %134 : vector<8x128xf32>
    %cst_53 = arith.constant 1.000000e+00 : f32
    %136 = vector.broadcast %cst_53 : f32 to vector<8x128xf32>
    %137 = arith.addf %136, %135 : vector<8x128xf32>
    %138 = arith.divf %136, %137 : vector<8x128xf32>
    %139 = vector.extract_strided_slice %128 {offsets = [0, 128], sizes = [8, 128], strides = [1, 1]} : vector<8x384xf32> to vector<8x128xf32>
    %140 = vector.extract_strided_slice %130 {offsets = [0, 128], sizes = [8, 128], strides = [1, 1]} : vector<8x384xf32> to vector<8x128xf32>
    %141 = arith.addf %139, %140 : vector<8x128xf32>
    %142 = arith.negf %141 : vector<8x128xf32>
    %143 = math.exp %142 : vector<8x128xf32>
    %cst_54 = arith.constant 1.000000e+00 : f32
    %144 = vector.broadcast %cst_54 : f32 to vector<8x128xf32>
    %145 = arith.addf %144, %143 : vector<8x128xf32>
    %146 = arith.divf %144, %145 : vector<8x128xf32>
    %147 = vector.extract_strided_slice %128 {offsets = [0, 256], sizes = [8, 128], strides = [1, 1]} : vector<8x384xf32> to vector<8x128xf32>
    %148 = vector.extract_strided_slice %130 {offsets = [0, 256], sizes = [8, 128], strides = [1, 1]} : vector<8x384xf32> to vector<8x128xf32>
    %149 = arith.addf %148, %23 : vector<8x128xf32>
    %150 = arith.mulf %138, %149 : vector<8x128xf32>
    %151 = arith.addf %147, %150 : vector<8x128xf32>
    %152 = math.tanh %151 : vector<8x128xf32>
    %cst_55 = arith.constant 1.000000e+00 : f32
    %153 = vector.broadcast %cst_55 : f32 to vector<8x128xf32>
    %154 = arith.subf %153, %146 : vector<8x128xf32>
    %155 = arith.mulf %154, %152 : vector<8x128xf32>
    %156 = arith.mulf %146, %123 : vector<8x128xf32>
    %157 = arith.addf %155, %156 : vector<8x128xf32>
    %c3_56 = arith.constant 3 : index
    %c0_57 = arith.constant 0 : index
    %c0_58 = arith.constant 0 : index
    %158 = vector.load %arg16[%c3_56, %c0_57, %c0_58] : memref<8x8x128xf32, #tpu.memory_space<vmem>>, vector<1x8x128xf32>
    %159 = vector.shape_cast %158 : vector<1x8x128xf32> to vector<8x128xf32>
    %160 = vector.shape_cast %157 : vector<8x128xf32> to vector<1x8x128xf32>
    tpu.vector_store %arg16[%c3_56, %c0_57, %c0_58], %160 {strides = array<i32>} : memref<8x8x128xf32, #tpu.memory_space<vmem>>, vector<1x8x128xf32>,
    %c4 = arith.constant 4 : index
    %c0_59 = arith.constant 0 : index
    %c0_60 = arith.constant 0 : index
    %161 = vector.load %arg15[%c4, %c0_59, %c0_60] : memref<8x8x384xf32, #tpu.memory_space<vmem>>, vector<1x8x384xf32>
    %162 = vector.shape_cast %161 : vector<1x8x384xf32> to vector<8x384xf32>
    %163 = arith.truncf %157 : vector<8x128xf32> to vector<8x128xbf16>
    %cst_61 = arith.constant dense<0.000000e+00> : vector<8x384xf32>
    %164 = tpu.matmul %163, %20, %cst_61 {dimension_numbers = #tpu.dot_dimension_numbers<[1], [0], [0], [1], [0, 0, 1, 1], [], []>} : vector<8x128xbf16>, vector<128x384xbf16>, vector<8x384xf32> -> vector<8x384xf32>
    %165 = vector.extract_strided_slice %162 {offsets = [0, 0], sizes = [8, 128], strides = [1, 1]} : vector<8x384xf32> to vector<8x128xf32>
    %166 = vector.extract_strided_slice %164 {offsets = [0, 0], sizes = [8, 128], strides = [1, 1]} : vector<8x384xf32> to vector<8x128xf32>
    %167 = arith.addf %165, %166 : vector<8x128xf32>
    %168 = arith.negf %167 : vector<8x128xf32>
    %169 = math.exp %168 : vector<8x128xf32>
    %cst_62 = arith.constant 1.000000e+00 : f32
    %170 = vector.broadcast %cst_62 : f32 to vector<8x128xf32>
    %171 = arith.addf %170, %169 : vector<8x128xf32>
    %172 = arith.divf %170, %171 : vector<8x128xf32>
    %173 = vector.extract_strided_slice %162 {offsets = [0, 128], sizes = [8, 128], strides = [1, 1]} : vector<8x384xf32> to vector<8x128xf32>
    %174 = vector.extract_strided_slice %164 {offsets = [0, 128], sizes = [8, 128], strides = [1, 1]} : vector<8x384xf32> to vector<8x128xf32>
    %175 = arith.addf %173, %174 : vector<8x128xf32>
    %176 = arith.negf %175 : vector<8x128xf32>
    %177 = math.exp %176 : vector<8x128xf32>
    %cst_63 = arith.constant 1.000000e+00 : f32
    %178 = vector.broadcast %cst_63 : f32 to vector<8x128xf32>
    %179 = arith.addf %178, %177 : vector<8x128xf32>
    %180 = arith.divf %178, %179 : vector<8x128xf32>
    %181 = vector.extract_strided_slice %162 {offsets = [0, 256], sizes = [8, 128], strides = [1, 1]} : vector<8x384xf32> to vector<8x128xf32>
    %182 = vector.extract_strided_slice %164 {offsets = [0, 256], sizes = [8, 128], strides = [1, 1]} : vector<8x384xf32> to vector<8x128xf32>
    %183 = arith.addf %182, %23 : vector<8x128xf32>
    %184 = arith.mulf %172, %183 : vector<8x128xf32>
    %185 = arith.addf %181, %184 : vector<8x128xf32>
    %186 = math.tanh %185 : vector<8x128xf32>
    %cst_64 = arith.constant 1.000000e+00 : f32
    %187 = vector.broadcast %cst_64 : f32 to vector<8x128xf32>
    %188 = arith.subf %187, %180 : vector<8x128xf32>
    %189 = arith.mulf %188, %186 : vector<8x128xf32>
    %190 = arith.mulf %180, %157 : vector<8x128xf32>
    %191 = arith.addf %189, %190 : vector<8x128xf32>
    %c4_65 = arith.constant 4 : index
    %c0_66 = arith.constant 0 : index
    %c0_67 = arith.constant 0 : index
    %192 = vector.load %arg16[%c4_65, %c0_66, %c0_67] : memref<8x8x128xf32, #tpu.memory_space<vmem>>, vector<1x8x128xf32>
    %193 = vector.shape_cast %192 : vector<1x8x128xf32> to vector<8x128xf32>
    %194 = vector.shape_cast %191 : vector<8x128xf32> to vector<1x8x128xf32>
    tpu.vector_store %arg16[%c4_65, %c0_66, %c0_67], %194 {strides = array<i32>} : memref<8x8x128xf32, #tpu.memory_space<vmem>>, vector<1x8x128xf32>,
    %c5 = arith.constant 5 : index
    %c0_68 = arith.constant 0 : index
    %c0_69 = arith.constant 0 : index
    %195 = vector.load %arg15[%c5, %c0_68, %c0_69] : memref<8x8x384xf32, #tpu.memory_space<vmem>>, vector<1x8x384xf32>
    %196 = vector.shape_cast %195 : vector<1x8x384xf32> to vector<8x384xf32>
    %197 = arith.truncf %191 : vector<8x128xf32> to vector<8x128xbf16>
    %cst_70 = arith.constant dense<0.000000e+00> : vector<8x384xf32>
    %198 = tpu.matmul %197, %20, %cst_70 {dimension_numbers = #tpu.dot_dimension_numbers<[1], [0], [0], [1], [0, 0, 1, 1], [], []>} : vector<8x128xbf16>, vector<128x384xbf16>, vector<8x384xf32> -> vector<8x384xf32>
    %199 = vector.extract_strided_slice %196 {offsets = [0, 0], sizes = [8, 128], strides = [1, 1]} : vector<8x384xf32> to vector<8x128xf32>
    %200 = vector.extract_strided_slice %198 {offsets = [0, 0], sizes = [8, 128], strides = [1, 1]} : vector<8x384xf32> to vector<8x128xf32>
    %201 = arith.addf %199, %200 : vector<8x128xf32>
    %202 = arith.negf %201 : vector<8x128xf32>
    %203 = math.exp %202 : vector<8x128xf32>
    %cst_71 = arith.constant 1.000000e+00 : f32
    %204 = vector.broadcast %cst_71 : f32 to vector<8x128xf32>
    %205 = arith.addf %204, %203 : vector<8x128xf32>
    %206 = arith.divf %204, %205 : vector<8x128xf32>
    %207 = vector.extract_strided_slice %196 {offsets = [0, 128], sizes = [8, 128], strides = [1, 1]} : vector<8x384xf32> to vector<8x128xf32>
    %208 = vector.extract_strided_slice %198 {offsets = [0, 128], sizes = [8, 128], strides = [1, 1]} : vector<8x384xf32> to vector<8x128xf32>
    %209 = arith.addf %207, %208 : vector<8x128xf32>
    %210 = arith.negf %209 : vector<8x128xf32>
    %211 = math.exp %210 : vector<8x128xf32>
    %cst_72 = arith.constant 1.000000e+00 : f32
    %212 = vector.broadcast %cst_72 : f32 to vector<8x128xf32>
    %213 = arith.addf %212, %211 : vector<8x128xf32>
    %214 = arith.divf %212, %213 : vector<8x128xf32>
    %215 = vector.extract_strided_slice %196 {offsets = [0, 256], sizes = [8, 128], strides = [1, 1]} : vector<8x384xf32> to vector<8x128xf32>
    %216 = vector.extract_strided_slice %198 {offsets = [0, 256], sizes = [8, 128], strides = [1, 1]} : vector<8x384xf32> to vector<8x128xf32>
    %217 = arith.addf %216, %23 : vector<8x128xf32>
    %218 = arith.mulf %206, %217 : vector<8x128xf32>
    %219 = arith.addf %215, %218 : vector<8x128xf32>
    %220 = math.tanh %219 : vector<8x128xf32>
    %cst_73 = arith.constant 1.000000e+00 : f32
    %221 = vector.broadcast %cst_73 : f32 to vector<8x128xf32>
    %222 = arith.subf %221, %214 : vector<8x128xf32>
    %223 = arith.mulf %222, %220 : vector<8x128xf32>
    %224 = arith.mulf %214, %191 : vector<8x128xf32>
    %225 = arith.addf %223, %224 : vector<8x128xf32>
    %c5_74 = arith.constant 5 : index
    %c0_75 = arith.constant 0 : index
    %c0_76 = arith.constant 0 : index
    %226 = vector.load %arg16[%c5_74, %c0_75, %c0_76] : memref<8x8x128xf32, #tpu.memory_space<vmem>>, vector<1x8x128xf32>
    %227 = vector.shape_cast %226 : vector<1x8x128xf32> to vector<8x128xf32>
    %228 = vector.shape_cast %225 : vector<8x128xf32> to vector<1x8x128xf32>
    tpu.vector_store %arg16[%c5_74, %c0_75, %c0_76], %228 {strides = array<i32>} : memref<8x8x128xf32, #tpu.memory_space<vmem>>, vector<1x8x128xf32>,
    %c6 = arith.constant 6 : index
    %c0_77 = arith.constant 0 : index
    %c0_78 = arith.constant 0 : index
    %229 = vector.load %arg15[%c6, %c0_77, %c0_78] : memref<8x8x384xf32, #tpu.memory_space<vmem>>, vector<1x8x384xf32>
    %230 = vector.shape_cast %229 : vector<1x8x384xf32> to vector<8x384xf32>
    %231 = arith.truncf %225 : vector<8x128xf32> to vector<8x128xbf16>
    %cst_79 = arith.constant dense<0.000000e+00> : vector<8x384xf32>
    %232 = tpu.matmul %231, %20, %cst_79 {dimension_numbers = #tpu.dot_dimension_numbers<[1], [0], [0], [1], [0, 0, 1, 1], [], []>} : vector<8x128xbf16>, vector<128x384xbf16>, vector<8x384xf32> -> vector<8x384xf32>
    %233 = vector.extract_strided_slice %230 {offsets = [0, 0], sizes = [8, 128], strides = [1, 1]} : vector<8x384xf32> to vector<8x128xf32>
    %234 = vector.extract_strided_slice %232 {offsets = [0, 0], sizes = [8, 128], strides = [1, 1]} : vector<8x384xf32> to vector<8x128xf32>
    %235 = arith.addf %233, %234 : vector<8x128xf32>
    %236 = arith.negf %235 : vector<8x128xf32>
    %237 = math.exp %236 : vector<8x128xf32>
    %cst_80 = arith.constant 1.000000e+00 : f32
    %238 = vector.broadcast %cst_80 : f32 to vector<8x128xf32>
    %239 = arith.addf %238, %237 : vector<8x128xf32>
    %240 = arith.divf %238, %239 : vector<8x128xf32>
    %241 = vector.extract_strided_slice %230 {offsets = [0, 128], sizes = [8, 128], strides = [1, 1]} : vector<8x384xf32> to vector<8x128xf32>
    %242 = vector.extract_strided_slice %232 {offsets = [0, 128], sizes = [8, 128], strides = [1, 1]} : vector<8x384xf32> to vector<8x128xf32>
    %243 = arith.addf %241, %242 : vector<8x128xf32>
    %244 = arith.negf %243 : vector<8x128xf32>
    %245 = math.exp %244 : vector<8x128xf32>
    %cst_81 = arith.constant 1.000000e+00 : f32
    %246 = vector.broadcast %cst_81 : f32 to vector<8x128xf32>
    %247 = arith.addf %246, %245 : vector<8x128xf32>
    %248 = arith.divf %246, %247 : vector<8x128xf32>
    %249 = vector.extract_strided_slice %230 {offsets = [0, 256], sizes = [8, 128], strides = [1, 1]} : vector<8x384xf32> to vector<8x128xf32>
    %250 = vector.extract_strided_slice %232 {offsets = [0, 256], sizes = [8, 128], strides = [1, 1]} : vector<8x384xf32> to vector<8x128xf32>
    %251 = arith.addf %250, %23 : vector<8x128xf32>
    %252 = arith.mulf %240, %251 : vector<8x128xf32>
    %253 = arith.addf %249, %252 : vector<8x128xf32>
    %254 = math.tanh %253 : vector<8x128xf32>
    %cst_82 = arith.constant 1.000000e+00 : f32
    %255 = vector.broadcast %cst_82 : f32 to vector<8x128xf32>
    %256 = arith.subf %255, %248 : vector<8x128xf32>
    %257 = arith.mulf %256, %254 : vector<8x128xf32>
    %258 = arith.mulf %248, %225 : vector<8x128xf32>
    %259 = arith.addf %257, %258 : vector<8x128xf32>
    %c6_83 = arith.constant 6 : index
    %c0_84 = arith.constant 0 : index
    %c0_85 = arith.constant 0 : index
    %260 = vector.load %arg16[%c6_83, %c0_84, %c0_85] : memref<8x8x128xf32, #tpu.memory_space<vmem>>, vector<1x8x128xf32>
    %261 = vector.shape_cast %260 : vector<1x8x128xf32> to vector<8x128xf32>
    %262 = vector.shape_cast %259 : vector<8x128xf32> to vector<1x8x128xf32>
    tpu.vector_store %arg16[%c6_83, %c0_84, %c0_85], %262 {strides = array<i32>} : memref<8x8x128xf32, #tpu.memory_space<vmem>>, vector<1x8x128xf32>,
    %c7 = arith.constant 7 : index
    %c0_86 = arith.constant 0 : index
    %c0_87 = arith.constant 0 : index
    %263 = vector.load %arg15[%c7, %c0_86, %c0_87] : memref<8x8x384xf32, #tpu.memory_space<vmem>>, vector<1x8x384xf32>
    %264 = vector.shape_cast %263 : vector<1x8x384xf32> to vector<8x384xf32>
    %265 = arith.truncf %259 : vector<8x128xf32> to vector<8x128xbf16>
    %cst_88 = arith.constant dense<0.000000e+00> : vector<8x384xf32>
    %266 = tpu.matmul %265, %20, %cst_88 {dimension_numbers = #tpu.dot_dimension_numbers<[1], [0], [0], [1], [0, 0, 1, 1], [], []>} : vector<8x128xbf16>, vector<128x384xbf16>, vector<8x384xf32> -> vector<8x384xf32>
    %267 = vector.extract_strided_slice %264 {offsets = [0, 0], sizes = [8, 128], strides = [1, 1]} : vector<8x384xf32> to vector<8x128xf32>
    %268 = vector.extract_strided_slice %266 {offsets = [0, 0], sizes = [8, 128], strides = [1, 1]} : vector<8x384xf32> to vector<8x128xf32>
    %269 = arith.addf %267, %268 : vector<8x128xf32>
    %270 = arith.negf %269 : vector<8x128xf32>
    %271 = math.exp %270 : vector<8x128xf32>
    %cst_89 = arith.constant 1.000000e+00 : f32
    %272 = vector.broadcast %cst_89 : f32 to vector<8x128xf32>
    %273 = arith.addf %272, %271 : vector<8x128xf32>
    %274 = arith.divf %272, %273 : vector<8x128xf32>
    %275 = vector.extract_strided_slice %264 {offsets = [0, 128], sizes = [8, 128], strides = [1, 1]} : vector<8x384xf32> to vector<8x128xf32>
    %276 = vector.extract_strided_slice %266 {offsets = [0, 128], sizes = [8, 128], strides = [1, 1]} : vector<8x384xf32> to vector<8x128xf32>
    %277 = arith.addf %275, %276 : vector<8x128xf32>
    %278 = arith.negf %277 : vector<8x128xf32>
    %279 = math.exp %278 : vector<8x128xf32>
    %cst_90 = arith.constant 1.000000e+00 : f32
    %280 = vector.broadcast %cst_90 : f32 to vector<8x128xf32>
    %281 = arith.addf %280, %279 : vector<8x128xf32>
    %282 = arith.divf %280, %281 : vector<8x128xf32>
    %283 = vector.extract_strided_slice %264 {offsets = [0, 256], sizes = [8, 128], strides = [1, 1]} : vector<8x384xf32> to vector<8x128xf32>
    %284 = vector.extract_strided_slice %266 {offsets = [0, 256], sizes = [8, 128], strides = [1, 1]} : vector<8x384xf32> to vector<8x128xf32>
    %285 = arith.addf %284, %23 : vector<8x128xf32>
    %286 = arith.mulf %274, %285 : vector<8x128xf32>
    %287 = arith.addf %283, %286 : vector<8x128xf32>
    %288 = math.tanh %287 : vector<8x128xf32>
    %cst_91 = arith.constant 1.000000e+00 : f32
    %289 = vector.broadcast %cst_91 : f32 to vector<8x128xf32>
    %290 = arith.subf %289, %282 : vector<8x128xf32>
    %291 = arith.mulf %290, %288 : vector<8x128xf32>
    %292 = arith.mulf %282, %259 : vector<8x128xf32>
    %293 = arith.addf %291, %292 : vector<8x128xf32>
    %c7_92 = arith.constant 7 : index
    %c0_93 = arith.constant 0 : index
    %c0_94 = arith.constant 0 : index
    %294 = vector.load %arg16[%c7_92, %c0_93, %c0_94] : memref<8x8x128xf32, #tpu.memory_space<vmem>>, vector<1x8x128xf32>
    %295 = vector.shape_cast %294 : vector<1x8x128xf32> to vector<8x128xf32>
    %296 = vector.shape_cast %293 : vector<8x128xf32> to vector<1x8x128xf32>
    tpu.vector_store %arg16[%c7_92, %c0_93, %c0_94], %296 {strides = array<i32>} : memref<8x8x128xf32, #tpu.memory_space<vmem>>, vector<1x8x128xf32>,
    %c0_95 = arith.constant 0 : index
    %c0_96 = arith.constant 0 : index
    %297 = vector.load %arg1[%c0_95, %c0_96] : memref<8x128xf32, #tpu.memory_space<vmem>>, vector<8x128xf32>
    %298 = arith.truncf %297 : vector<8x128xf32> to vector<8x128xbf16>
    %c0_97 = arith.constant 0 : index
    %c0_98 = arith.constant 0 : index
    %299 = vector.load %arg6[%c0_97, %c0_98] : memref<128x128xbf16, #tpu.memory_space<vmem>>, vector<128x128xbf16>
    %cst_99 = arith.constant dense<0.000000e+00> : vector<8x128xf32>
    %300 = tpu.matmul %298, %299, %cst_99 {dimension_numbers = #tpu.dot_dimension_numbers<[1], [0], [0], [1], [0, 0, 1, 1], [], []>} : vector<8x128xbf16>, vector<128x128xbf16>, vector<8x128xf32> -> vector<8x128xf32>
    %c0_100 = arith.constant 0 : index
    %c0_101 = arith.constant 0 : index
    %301 = vector.load %arg8[%c0_100, %c0_101] : memref<1x128xf32, #tpu.memory_space<vmem>>, vector<1x128xf32>
    %302 = vector.broadcast %301 : vector<1x128xf32> to vector<8x128xf32>
    %303 = arith.addf %300, %302 : vector<8x128xf32>
    %c0_102 = arith.constant 0 : index
    %c0_103 = arith.constant 0 : index
    %c0_104 = arith.constant 0 : index
    %304 = vector.load %arg16[%c0_102, %c0_103, %c0_104] : memref<8x8x128xf32, #tpu.memory_space<vmem>>, vector<8x8x128xf32>
    %305 = vector.shape_cast %304 : vector<8x8x128xf32> to vector<64x128xf32>
    %306 = arith.truncf %305 : vector<64x128xf32> to vector<64x128xbf16>
    %c0_105 = arith.constant 0 : index
    %c0_106 = arith.constant 0 : index
    %307 = vector.load %arg7[%c0_105, %c0_106] : memref<128x128xbf16, #tpu.memory_space<vmem>>, vector<128x128xbf16>
    %cst_107 = arith.constant dense<0.000000e+00> : vector<64x128xf32>
    %308 = tpu.matmul %306, %307, %cst_107 {dimension_numbers = #tpu.dot_dimension_numbers<[1], [0], [0], [1], [0, 0, 1, 1], [], []>} : vector<64x128xbf16>, vector<128x128xbf16>, vector<64x128xf32> -> vector<64x128xf32>
    %309 = vector.shape_cast %308 : vector<64x128xf32> to vector<8x8x128xf32>
    %310 = vector.shape_cast %303 : vector<8x128xf32> to vector<1x8x128xf32>
    %311 = vector.broadcast %310 : vector<1x8x128xf32> to vector<8x8x128xf32>
    %312 = arith.addf %309, %311 : vector<8x8x128xf32>
    %313 = math.tanh %312 : vector<8x8x128xf32>
    %314 = vector.shape_cast %313 : vector<8x8x128xf32> to vector<64x128xf32>
    %315 = arith.truncf %314 : vector<64x128xf32> to vector<64x128xbf16>
    %c0_108 = arith.constant 0 : index
    %c0_109 = arith.constant 0 : index
    %316 = vector.load %arg9[%c0_108, %c0_109] : memref<128x384xbf16, #tpu.memory_space<vmem>>, vector<128x384xbf16>
    %cst_110 = arith.constant dense<0.000000e+00> : vector<64x384xf32>
    %317 = tpu.matmul %315, %316, %cst_110 {dimension_numbers = #tpu.dot_dimension_numbers<[1], [0], [0], [1], [0, 0, 1, 1], [], []>} : vector<64x128xbf16>, vector<128x384xbf16>, vector<64x384xf32> -> vector<64x384xf32>
    %c0_111 = arith.constant 0 : index
    %c0_112 = arith.constant 0 : index
    %c0_113 = arith.constant 0 : index
    %318 = vector.load %arg17[%c0_111, %c0_112, %c0_113] : memref<8x8x384xf32, #tpu.memory_space<vmem>>, vector<8x8x384xf32>
    %319 = vector.shape_cast %317 : vector<64x384xf32> to vector<8x8x384xf32>
    %320 = arith.addf %318, %319 : vector<8x8x384xf32>
    %c0_114 = arith.constant 0 : index
    %c0_115 = arith.constant 0 : index
    %c0_116 = arith.constant 0 : index
    %321 = vector.load %arg17[%c0_114, %c0_115, %c0_116] : memref<8x8x384xf32, #tpu.memory_space<vmem>>, vector<8x8x384xf32>
    tpu.vector_store %arg17[%c0_114, %c0_115, %c0_116], %320 {strides = array<i32>} : memref<8x8x384xf32, #tpu.memory_space<vmem>>, vector<8x8x384xf32>,
    %c0_117 = arith.constant 0 : index
    %c0_118 = arith.constant 0 : index
    %322 = vector.load %arg11[%c0_117, %c0_118] : memref<128x384xbf16, #tpu.memory_space<vmem>>, vector<128x384xbf16>
    %c0_119 = arith.constant 0 : index
    %c0_120 = arith.constant 0 : index
    %323 = vector.load %arg13[%c0_119, %c0_120] : memref<1x128xf32, #tpu.memory_space<vmem>>, vector<1x128xf32>
    %324 = vector.shape_cast %323 : vector<1x128xf32> to vector<1x128xf32>
    %325 = vector.broadcast %324 : vector<1x128xf32> to vector<8x128xf32>
    %cst_121 = arith.constant 0.000000e+00 : f32
    %326 = vector.broadcast %cst_121 : f32 to vector<8x128xf32>
    %c7_122 = arith.constant 7 : index
    %c0_123 = arith.constant 0 : index
    %c0_124 = arith.constant 0 : index
    %327 = vector.load %arg17[%c7_122, %c0_123, %c0_124] : memref<8x8x384xf32, #tpu.memory_space<vmem>>, vector<1x8x384xf32>
    %328 = vector.shape_cast %327 : vector<1x8x384xf32> to vector<8x384xf32>
    %329 = arith.truncf %326 : vector<8x128xf32> to vector<8x128xbf16>
    %cst_125 = arith.constant dense<0.000000e+00> : vector<8x384xf32>
    %330 = tpu.matmul %329, %322, %cst_125 {dimension_numbers = #tpu.dot_dimension_numbers<[1], [0], [0], [1], [0, 0, 1, 1], [], []>} : vector<8x128xbf16>, vector<128x384xbf16>, vector<8x384xf32> -> vector<8x384xf32>
    %331 = vector.extract_strided_slice %328 {offsets = [0, 0], sizes = [8, 128], strides = [1, 1]} : vector<8x384xf32> to vector<8x128xf32>
    %332 = vector.extract_strided_slice %330 {offsets = [0, 0], sizes = [8, 128], strides = [1, 1]} : vector<8x384xf32> to vector<8x128xf32>
    %333 = arith.addf %331, %332 : vector<8x128xf32>
    %334 = arith.negf %333 : vector<8x128xf32>
    %335 = math.exp %334 : vector<8x128xf32>
    %cst_126 = arith.constant 1.000000e+00 : f32
    %336 = vector.broadcast %cst_126 : f32 to vector<8x128xf32>
    %337 = arith.addf %336, %335 : vector<8x128xf32>
    %338 = arith.divf %336, %337 : vector<8x128xf32>
    %339 = vector.extract_strided_slice %328 {offsets = [0, 128], sizes = [8, 128], strides = [1, 1]} : vector<8x384xf32> to vector<8x128xf32>
    %340 = vector.extract_strided_slice %330 {offsets = [0, 128], sizes = [8, 128], strides = [1, 1]} : vector<8x384xf32> to vector<8x128xf32>
    %341 = arith.addf %339, %340 : vector<8x128xf32>
    %342 = arith.negf %341 : vector<8x128xf32>
    %343 = math.exp %342 : vector<8x128xf32>
    %cst_127 = arith.constant 1.000000e+00 : f32
    %344 = vector.broadcast %cst_127 : f32 to vector<8x128xf32>
    %345 = arith.addf %344, %343 : vector<8x128xf32>
    %346 = arith.divf %344, %345 : vector<8x128xf32>
    %347 = vector.extract_strided_slice %328 {offsets = [0, 256], sizes = [8, 128], strides = [1, 1]} : vector<8x384xf32> to vector<8x128xf32>
    %348 = vector.extract_strided_slice %330 {offsets = [0, 256], sizes = [8, 128], strides = [1, 1]} : vector<8x384xf32> to vector<8x128xf32>
    %349 = arith.addf %348, %325 : vector<8x128xf32>
    %350 = arith.mulf %338, %349 : vector<8x128xf32>
    %351 = arith.addf %347, %350 : vector<8x128xf32>
    %352 = math.tanh %351 : vector<8x128xf32>
    %cst_128 = arith.constant 1.000000e+00 : f32
    %353 = vector.broadcast %cst_128 : f32 to vector<8x128xf32>
    %354 = arith.subf %353, %346 : vector<8x128xf32>
    %355 = arith.mulf %354, %352 : vector<8x128xf32>
    %356 = arith.mulf %346, %326 : vector<8x128xf32>
    %357 = arith.addf %355, %356 : vector<8x128xf32>
    %c6_129 = arith.constant 6 : index
    %c0_130 = arith.constant 0 : index
    %c0_131 = arith.constant 0 : index
    %358 = vector.load %arg17[%c6_129, %c0_130, %c0_131] : memref<8x8x384xf32, #tpu.memory_space<vmem>>, vector<1x8x384xf32>
    %359 = vector.shape_cast %358 : vector<1x8x384xf32> to vector<8x384xf32>
    %360 = arith.truncf %357 : vector<8x128xf32> to vector<8x128xbf16>
    %cst_132 = arith.constant dense<0.000000e+00> : vector<8x384xf32>
    %361 = tpu.matmul %360, %322, %cst_132 {dimension_numbers = #tpu.dot_dimension_numbers<[1], [0], [0], [1], [0, 0, 1, 1], [], []>} : vector<8x128xbf16>, vector<128x384xbf16>, vector<8x384xf32> -> vector<8x384xf32>
    %362 = vector.extract_strided_slice %359 {offsets = [0, 0], sizes = [8, 128], strides = [1, 1]} : vector<8x384xf32> to vector<8x128xf32>
    %363 = vector.extract_strided_slice %361 {offsets = [0, 0], sizes = [8, 128], strides = [1, 1]} : vector<8x384xf32> to vector<8x128xf32>
    %364 = arith.addf %362, %363 : vector<8x128xf32>
    %365 = arith.negf %364 : vector<8x128xf32>
    %366 = math.exp %365 : vector<8x128xf32>
    %cst_133 = arith.constant 1.000000e+00 : f32
    %367 = vector.broadcast %cst_133 : f32 to vector<8x128xf32>
    %368 = arith.addf %367, %366 : vector<8x128xf32>
    %369 = arith.divf %367, %368 : vector<8x128xf32>
    %370 = vector.extract_strided_slice %359 {offsets = [0, 128], sizes = [8, 128], strides = [1, 1]} : vector<8x384xf32> to vector<8x128xf32>
    %371 = vector.extract_strided_slice %361 {offsets = [0, 128], sizes = [8, 128], strides = [1, 1]} : vector<8x384xf32> to vector<8x128xf32>
    %372 = arith.addf %370, %371 : vector<8x128xf32>
    %373 = arith.negf %372 : vector<8x128xf32>
    %374 = math.exp %373 : vector<8x128xf32>
    %cst_134 = arith.constant 1.000000e+00 : f32
    %375 = vector.broadcast %cst_134 : f32 to vector<8x128xf32>
    %376 = arith.addf %375, %374 : vector<8x128xf32>
    %377 = arith.divf %375, %376 : vector<8x128xf32>
    %378 = vector.extract_strided_slice %359 {offsets = [0, 256], sizes = [8, 128], strides = [1, 1]} : vector<8x384xf32> to vector<8x128xf32>
    %379 = vector.extract_strided_slice %361 {offsets = [0, 256], sizes = [8, 128], strides = [1, 1]} : vector<8x384xf32> to vector<8x128xf32>
    %380 = arith.addf %379, %325 : vector<8x128xf32>
    %381 = arith.mulf %369, %380 : vector<8x128xf32>
    %382 = arith.addf %378, %381 : vector<8x128xf32>
    %383 = math.tanh %382 : vector<8x128xf32>
    %cst_135 = arith.constant 1.000000e+00 : f32
    %384 = vector.broadcast %cst_135 : f32 to vector<8x128xf32>
    %385 = arith.subf %384, %377 : vector<8x128xf32>
    %386 = arith.mulf %385, %383 : vector<8x128xf32>
    %387 = arith.mulf %377, %357 : vector<8x128xf32>
    %388 = arith.addf %386, %387 : vector<8x128xf32>
    %c5_136 = arith.constant 5 : index
    %c0_137 = arith.constant 0 : index
    %c0_138 = arith.constant 0 : index
    %389 = vector.load %arg17[%c5_136, %c0_137, %c0_138] : memref<8x8x384xf32, #tpu.memory_space<vmem>>, vector<1x8x384xf32>
    %390 = vector.shape_cast %389 : vector<1x8x384xf32> to vector<8x384xf32>
    %391 = arith.truncf %388 : vector<8x128xf32> to vector<8x128xbf16>
    %cst_139 = arith.constant dense<0.000000e+00> : vector<8x384xf32>
    %392 = tpu.matmul %391, %322, %cst_139 {dimension_numbers = #tpu.dot_dimension_numbers<[1], [0], [0], [1], [0, 0, 1, 1], [], []>} : vector<8x128xbf16>, vector<128x384xbf16>, vector<8x384xf32> -> vector<8x384xf32>
    %393 = vector.extract_strided_slice %390 {offsets = [0, 0], sizes = [8, 128], strides = [1, 1]} : vector<8x384xf32> to vector<8x128xf32>
    %394 = vector.extract_strided_slice %392 {offsets = [0, 0], sizes = [8, 128], strides = [1, 1]} : vector<8x384xf32> to vector<8x128xf32>
    %395 = arith.addf %393, %394 : vector<8x128xf32>
    %396 = arith.negf %395 : vector<8x128xf32>
    %397 = math.exp %396 : vector<8x128xf32>
    %cst_140 = arith.constant 1.000000e+00 : f32
    %398 = vector.broadcast %cst_140 : f32 to vector<8x128xf32>
    %399 = arith.addf %398, %397 : vector<8x128xf32>
    %400 = arith.divf %398, %399 : vector<8x128xf32>
    %401 = vector.extract_strided_slice %390 {offsets = [0, 128], sizes = [8, 128], strides = [1, 1]} : vector<8x384xf32> to vector<8x128xf32>
    %402 = vector.extract_strided_slice %392 {offsets = [0, 128], sizes = [8, 128], strides = [1, 1]} : vector<8x384xf32> to vector<8x128xf32>
    %403 = arith.addf %401, %402 : vector<8x128xf32>
    %404 = arith.negf %403 : vector<8x128xf32>
    %405 = math.exp %404 : vector<8x128xf32>
    %cst_141 = arith.constant 1.000000e+00 : f32
    %406 = vector.broadcast %cst_141 : f32 to vector<8x128xf32>
    %407 = arith.addf %406, %405 : vector<8x128xf32>
    %408 = arith.divf %406, %407 : vector<8x128xf32>
    %409 = vector.extract_strided_slice %390 {offsets = [0, 256], sizes = [8, 128], strides = [1, 1]} : vector<8x384xf32> to vector<8x128xf32>
    %410 = vector.extract_strided_slice %392 {offsets = [0, 256], sizes = [8, 128], strides = [1, 1]} : vector<8x384xf32> to vector<8x128xf32>
    %411 = arith.addf %410, %325 : vector<8x128xf32>
    %412 = arith.mulf %400, %411 : vector<8x128xf32>
    %413 = arith.addf %409, %412 : vector<8x128xf32>
    %414 = math.tanh %413 : vector<8x128xf32>
    %cst_142 = arith.constant 1.000000e+00 : f32
    %415 = vector.broadcast %cst_142 : f32 to vector<8x128xf32>
    %416 = arith.subf %415, %408 : vector<8x128xf32>
    %417 = arith.mulf %416, %414 : vector<8x128xf32>
    %418 = arith.mulf %408, %388 : vector<8x128xf32>
    %419 = arith.addf %417, %418 : vector<8x128xf32>
    %c4_143 = arith.constant 4 : index
    %c0_144 = arith.constant 0 : index
    %c0_145 = arith.constant 0 : index
    %420 = vector.load %arg17[%c4_143, %c0_144, %c0_145] : memref<8x8x384xf32, #tpu.memory_space<vmem>>, vector<1x8x384xf32>
    %421 = vector.shape_cast %420 : vector<1x8x384xf32> to vector<8x384xf32>
    %422 = arith.truncf %419 : vector<8x128xf32> to vector<8x128xbf16>
    %cst_146 = arith.constant dense<0.000000e+00> : vector<8x384xf32>
    %423 = tpu.matmul %422, %322, %cst_146 {dimension_numbers = #tpu.dot_dimension_numbers<[1], [0], [0], [1], [0, 0, 1, 1], [], []>} : vector<8x128xbf16>, vector<128x384xbf16>, vector<8x384xf32> -> vector<8x384xf32>
    %424 = vector.extract_strided_slice %421 {offsets = [0, 0], sizes = [8, 128], strides = [1, 1]} : vector<8x384xf32> to vector<8x128xf32>
    %425 = vector.extract_strided_slice %423 {offsets = [0, 0], sizes = [8, 128], strides = [1, 1]} : vector<8x384xf32> to vector<8x128xf32>
    %426 = arith.addf %424, %425 : vector<8x128xf32>
    %427 = arith.negf %426 : vector<8x128xf32>
    %428 = math.exp %427 : vector<8x128xf32>
    %cst_147 = arith.constant 1.000000e+00 : f32
    %429 = vector.broadcast %cst_147 : f32 to vector<8x128xf32>
    %430 = arith.addf %429, %428 : vector<8x128xf32>
    %431 = arith.divf %429, %430 : vector<8x128xf32>
    %432 = vector.extract_strided_slice %421 {offsets = [0, 128], sizes = [8, 128], strides = [1, 1]} : vector<8x384xf32> to vector<8x128xf32>
    %433 = vector.extract_strided_slice %423 {offsets = [0, 128], sizes = [8, 128], strides = [1, 1]} : vector<8x384xf32> to vector<8x128xf32>
    %434 = arith.addf %432, %433 : vector<8x128xf32>
    %435 = arith.negf %434 : vector<8x128xf32>
    %436 = math.exp %435 : vector<8x128xf32>
    %cst_148 = arith.constant 1.000000e+00 : f32
    %437 = vector.broadcast %cst_148 : f32 to vector<8x128xf32>
    %438 = arith.addf %437, %436 : vector<8x128xf32>
    %439 = arith.divf %437, %438 : vector<8x128xf32>
    %440 = vector.extract_strided_slice %421 {offsets = [0, 256], sizes = [8, 128], strides = [1, 1]} : vector<8x384xf32> to vector<8x128xf32>
    %441 = vector.extract_strided_slice %423 {offsets = [0, 256], sizes = [8, 128], strides = [1, 1]} : vector<8x384xf32> to vector<8x128xf32>
    %442 = arith.addf %441, %325 : vector<8x128xf32>
    %443 = arith.mulf %431, %442 : vector<8x128xf32>
    %444 = arith.addf %440, %443 : vector<8x128xf32>
    %445 = math.tanh %444 : vector<8x128xf32>
    %cst_149 = arith.constant 1.000000e+00 : f32
    %446 = vector.broadcast %cst_149 : f32 to vector<8x128xf32>
    %447 = arith.subf %446, %439 : vector<8x128xf32>
    %448 = arith.mulf %447, %445 : vector<8x128xf32>
    %449 = arith.mulf %439, %419 : vector<8x128xf32>
    %450 = arith.addf %448, %449 : vector<8x128xf32>
    %c3_150 = arith.constant 3 : index
    %c0_151 = arith.constant 0 : index
    %c0_152 = arith.constant 0 : index
    %451 = vector.load %arg17[%c3_150, %c0_151, %c0_152] : memref<8x8x384xf32, #tpu.memory_space<vmem>>, vector<1x8x384xf32>
    %452 = vector.shape_cast %451 : vector<1x8x384xf32> to vector<8x384xf32>
    %453 = arith.truncf %450 : vector<8x128xf32> to vector<8x128xbf16>
    %cst_153 = arith.constant dense<0.000000e+00> : vector<8x384xf32>
    %454 = tpu.matmul %453, %322, %cst_153 {dimension_numbers = #tpu.dot_dimension_numbers<[1], [0], [0], [1], [0, 0, 1, 1], [], []>} : vector<8x128xbf16>, vector<128x384xbf16>, vector<8x384xf32> -> vector<8x384xf32>
    %455 = vector.extract_strided_slice %452 {offsets = [0, 0], sizes = [8, 128], strides = [1, 1]} : vector<8x384xf32> to vector<8x128xf32>
    %456 = vector.extract_strided_slice %454 {offsets = [0, 0], sizes = [8, 128], strides = [1, 1]} : vector<8x384xf32> to vector<8x128xf32>
    %457 = arith.addf %455, %456 : vector<8x128xf32>
    %458 = arith.negf %457 : vector<8x128xf32>
    %459 = math.exp %458 : vector<8x128xf32>
    %cst_154 = arith.constant 1.000000e+00 : f32
    %460 = vector.broadcast %cst_154 : f32 to vector<8x128xf32>
    %461 = arith.addf %460, %459 : vector<8x128xf32>
    %462 = arith.divf %460, %461 : vector<8x128xf32>
    %463 = vector.extract_strided_slice %452 {offsets = [0, 128], sizes = [8, 128], strides = [1, 1]} : vector<8x384xf32> to vector<8x128xf32>
    %464 = vector.extract_strided_slice %454 {offsets = [0, 128], sizes = [8, 128], strides = [1, 1]} : vector<8x384xf32> to vector<8x128xf32>
    %465 = arith.addf %463, %464 : vector<8x128xf32>
    %466 = arith.negf %465 : vector<8x128xf32>
    %467 = math.exp %466 : vector<8x128xf32>
    %cst_155 = arith.constant 1.000000e+00 : f32
    %468 = vector.broadcast %cst_155 : f32 to vector<8x128xf32>
    %469 = arith.addf %468, %467 : vector<8x128xf32>
    %470 = arith.divf %468, %469 : vector<8x128xf32>
    %471 = vector.extract_strided_slice %452 {offsets = [0, 256], sizes = [8, 128], strides = [1, 1]} : vector<8x384xf32> to vector<8x128xf32>
    %472 = vector.extract_strided_slice %454 {offsets = [0, 256], sizes = [8, 128], strides = [1, 1]} : vector<8x384xf32> to vector<8x128xf32>
    %473 = arith.addf %472, %325 : vector<8x128xf32>
    %474 = arith.mulf %462, %473 : vector<8x128xf32>
    %475 = arith.addf %471, %474 : vector<8x128xf32>
    %476 = math.tanh %475 : vector<8x128xf32>
    %cst_156 = arith.constant 1.000000e+00 : f32
    %477 = vector.broadcast %cst_156 : f32 to vector<8x128xf32>
    %478 = arith.subf %477, %470 : vector<8x128xf32>
    %479 = arith.mulf %478, %476 : vector<8x128xf32>
    %480 = arith.mulf %470, %450 : vector<8x128xf32>
    %481 = arith.addf %479, %480 : vector<8x128xf32>
    %c2_157 = arith.constant 2 : index
    %c0_158 = arith.constant 0 : index
    %c0_159 = arith.constant 0 : index
    %482 = vector.load %arg17[%c2_157, %c0_158, %c0_159] : memref<8x8x384xf32, #tpu.memory_space<vmem>>, vector<1x8x384xf32>
    %483 = vector.shape_cast %482 : vector<1x8x384xf32> to vector<8x384xf32>
    %484 = arith.truncf %481 : vector<8x128xf32> to vector<8x128xbf16>
    %cst_160 = arith.constant dense<0.000000e+00> : vector<8x384xf32>
    %485 = tpu.matmul %484, %322, %cst_160 {dimension_numbers = #tpu.dot_dimension_numbers<[1], [0], [0], [1], [0, 0, 1, 1], [], []>} : vector<8x128xbf16>, vector<128x384xbf16>, vector<8x384xf32> -> vector<8x384xf32>
    %486 = vector.extract_strided_slice %483 {offsets = [0, 0], sizes = [8, 128], strides = [1, 1]} : vector<8x384xf32> to vector<8x128xf32>
    %487 = vector.extract_strided_slice %485 {offsets = [0, 0], sizes = [8, 128], strides = [1, 1]} : vector<8x384xf32> to vector<8x128xf32>
    %488 = arith.addf %486, %487 : vector<8x128xf32>
    %489 = arith.negf %488 : vector<8x128xf32>
    %490 = math.exp %489 : vector<8x128xf32>
    %cst_161 = arith.constant 1.000000e+00 : f32
    %491 = vector.broadcast %cst_161 : f32 to vector<8x128xf32>
    %492 = arith.addf %491, %490 : vector<8x128xf32>
    %493 = arith.divf %491, %492 : vector<8x128xf32>
    %494 = vector.extract_strided_slice %483 {offsets = [0, 128], sizes = [8, 128], strides = [1, 1]} : vector<8x384xf32> to vector<8x128xf32>
    %495 = vector.extract_strided_slice %485 {offsets = [0, 128], sizes = [8, 128], strides = [1, 1]} : vector<8x384xf32> to vector<8x128xf32>
    %496 = arith.addf %494, %495 : vector<8x128xf32>
    %497 = arith.negf %496 : vector<8x128xf32>
    %498 = math.exp %497 : vector<8x128xf32>
    %cst_162 = arith.constant 1.000000e+00 : f32
    %499 = vector.broadcast %cst_162 : f32 to vector<8x128xf32>
    %500 = arith.addf %499, %498 : vector<8x128xf32>
    %501 = arith.divf %499, %500 : vector<8x128xf32>
    %502 = vector.extract_strided_slice %483 {offsets = [0, 256], sizes = [8, 128], strides = [1, 1]} : vector<8x384xf32> to vector<8x128xf32>
    %503 = vector.extract_strided_slice %485 {offsets = [0, 256], sizes = [8, 128], strides = [1, 1]} : vector<8x384xf32> to vector<8x128xf32>
    %504 = arith.addf %503, %325 : vector<8x128xf32>
    %505 = arith.mulf %493, %504 : vector<8x128xf32>
    %506 = arith.addf %502, %505 : vector<8x128xf32>
    %507 = math.tanh %506 : vector<8x128xf32>
    %cst_163 = arith.constant 1.000000e+00 : f32
    %508 = vector.broadcast %cst_163 : f32 to vector<8x128xf32>
    %509 = arith.subf %508, %501 : vector<8x128xf32>
    %510 = arith.mulf %509, %507 : vector<8x128xf32>
    %511 = arith.mulf %501, %481 : vector<8x128xf32>
    %512 = arith.addf %510, %511 : vector<8x128xf32>
    %c1_164 = arith.constant 1 : index
    %c0_165 = arith.constant 0 : index
    %c0_166 = arith.constant 0 : index
    %513 = vector.load %arg17[%c1_164, %c0_165, %c0_166] : memref<8x8x384xf32, #tpu.memory_space<vmem>>, vector<1x8x384xf32>
    %514 = vector.shape_cast %513 : vector<1x8x384xf32> to vector<8x384xf32>
    %515 = arith.truncf %512 : vector<8x128xf32> to vector<8x128xbf16>
    %cst_167 = arith.constant dense<0.000000e+00> : vector<8x384xf32>
    %516 = tpu.matmul %515, %322, %cst_167 {dimension_numbers = #tpu.dot_dimension_numbers<[1], [0], [0], [1], [0, 0, 1, 1], [], []>} : vector<8x128xbf16>, vector<128x384xbf16>, vector<8x384xf32> -> vector<8x384xf32>
    %517 = vector.extract_strided_slice %514 {offsets = [0, 0], sizes = [8, 128], strides = [1, 1]} : vector<8x384xf32> to vector<8x128xf32>
    %518 = vector.extract_strided_slice %516 {offsets = [0, 0], sizes = [8, 128], strides = [1, 1]} : vector<8x384xf32> to vector<8x128xf32>
    %519 = arith.addf %517, %518 : vector<8x128xf32>
    %520 = arith.negf %519 : vector<8x128xf32>
    %521 = math.exp %520 : vector<8x128xf32>
    %cst_168 = arith.constant 1.000000e+00 : f32
    %522 = vector.broadcast %cst_168 : f32 to vector<8x128xf32>
    %523 = arith.addf %522, %521 : vector<8x128xf32>
    %524 = arith.divf %522, %523 : vector<8x128xf32>
    %525 = vector.extract_strided_slice %514 {offsets = [0, 128], sizes = [8, 128], strides = [1, 1]} : vector<8x384xf32> to vector<8x128xf32>
    %526 = vector.extract_strided_slice %516 {offsets = [0, 128], sizes = [8, 128], strides = [1, 1]} : vector<8x384xf32> to vector<8x128xf32>
    %527 = arith.addf %525, %526 : vector<8x128xf32>
    %528 = arith.negf %527 : vector<8x128xf32>
    %529 = math.exp %528 : vector<8x128xf32>
    %cst_169 = arith.constant 1.000000e+00 : f32
    %530 = vector.broadcast %cst_169 : f32 to vector<8x128xf32>
    %531 = arith.addf %530, %529 : vector<8x128xf32>
    %532 = arith.divf %530, %531 : vector<8x128xf32>
    %533 = vector.extract_strided_slice %514 {offsets = [0, 256], sizes = [8, 128], strides = [1, 1]} : vector<8x384xf32> to vector<8x128xf32>
    %534 = vector.extract_strided_slice %516 {offsets = [0, 256], sizes = [8, 128], strides = [1, 1]} : vector<8x384xf32> to vector<8x128xf32>
    %535 = arith.addf %534, %325 : vector<8x128xf32>
    %536 = arith.mulf %524, %535 : vector<8x128xf32>
    %537 = arith.addf %533, %536 : vector<8x128xf32>
    %538 = math.tanh %537 : vector<8x128xf32>
    %cst_170 = arith.constant 1.000000e+00 : f32
    %539 = vector.broadcast %cst_170 : f32 to vector<8x128xf32>
    %540 = arith.subf %539, %532 : vector<8x128xf32>
    %541 = arith.mulf %540, %538 : vector<8x128xf32>
    %542 = arith.mulf %532, %512 : vector<8x128xf32>
    %543 = arith.addf %541, %542 : vector<8x128xf32>
    %c0_171 = arith.constant 0 : index
    %c0_172 = arith.constant 0 : index
    %c0_173 = arith.constant 0 : index
    %544 = vector.load %arg17[%c0_171, %c0_172, %c0_173] : memref<8x8x384xf32, #tpu.memory_space<vmem>>, vector<1x8x384xf32>
    %545 = vector.shape_cast %544 : vector<1x8x384xf32> to vector<8x384xf32>
    %546 = arith.truncf %543 : vector<8x128xf32> to vector<8x128xbf16>
    %cst_174 = arith.constant dense<0.000000e+00> : vector<8x384xf32>
    %547 = tpu.matmul %546, %322, %cst_174 {dimension_numbers = #tpu.dot_dimension_numbers<[1], [0], [0], [1], [0, 0, 1, 1], [], []>} : vector<8x128xbf16>, vector<128x384xbf16>, vector<8x384xf32> -> vector<8x384xf32>
    %548 = vector.extract_strided_slice %545 {offsets = [0, 0], sizes = [8, 128], strides = [1, 1]} : vector<8x384xf32> to vector<8x128xf32>
    %549 = vector.extract_strided_slice %547 {offsets = [0, 0], sizes = [8, 128], strides = [1, 1]} : vector<8x384xf32> to vector<8x128xf32>
    %550 = arith.addf %548, %549 : vector<8x128xf32>
    %551 = arith.negf %550 : vector<8x128xf32>
    %552 = math.exp %551 : vector<8x128xf32>
    %cst_175 = arith.constant 1.000000e+00 : f32
    %553 = vector.broadcast %cst_175 : f32 to vector<8x128xf32>
    %554 = arith.addf %553, %552 : vector<8x128xf32>
    %555 = arith.divf %553, %554 : vector<8x128xf32>
    %556 = vector.extract_strided_slice %545 {offsets = [0, 128], sizes = [8, 128], strides = [1, 1]} : vector<8x384xf32> to vector<8x128xf32>
    %557 = vector.extract_strided_slice %547 {offsets = [0, 128], sizes = [8, 128], strides = [1, 1]} : vector<8x384xf32> to vector<8x128xf32>
    %558 = arith.addf %556, %557 : vector<8x128xf32>
    %559 = arith.negf %558 : vector<8x128xf32>
    %560 = math.exp %559 : vector<8x128xf32>
    %cst_176 = arith.constant 1.000000e+00 : f32
    %561 = vector.broadcast %cst_176 : f32 to vector<8x128xf32>
    %562 = arith.addf %561, %560 : vector<8x128xf32>
    %563 = arith.divf %561, %562 : vector<8x128xf32>
    %564 = vector.extract_strided_slice %545 {offsets = [0, 256], sizes = [8, 128], strides = [1, 1]} : vector<8x384xf32> to vector<8x128xf32>
    %565 = vector.extract_strided_slice %547 {offsets = [0, 256], sizes = [8, 128], strides = [1, 1]} : vector<8x384xf32> to vector<8x128xf32>
    %566 = arith.addf %565, %325 : vector<8x128xf32>
    %567 = arith.mulf %555, %566 : vector<8x128xf32>
    %568 = arith.addf %564, %567 : vector<8x128xf32>
    %569 = math.tanh %568 : vector<8x128xf32>
    %cst_177 = arith.constant 1.000000e+00 : f32
    %570 = vector.broadcast %cst_177 : f32 to vector<8x128xf32>
    %571 = arith.subf %570, %563 : vector<8x128xf32>
    %572 = arith.mulf %571, %569 : vector<8x128xf32>
    %573 = arith.mulf %563, %543 : vector<8x128xf32>
    %574 = arith.addf %572, %573 : vector<8x128xf32>
    %c0_178 = arith.constant 0 : index
    %c0_179 = arith.constant 0 : index
    %575 = vector.load %arg14[%c0_178, %c0_179] : memref<8x128xf32, #tpu.memory_space<vmem>>, vector<8x128xf32>
    tpu.vector_store %arg14[%c0_178, %c0_179], %574 {strides = array<i32>} : memref<8x128xf32, #tpu.memory_space<vmem>>, vector<8x128xf32>,
    return
  }
}

</mosaic_0001>

<bundles_post_ra>
// kernel: birnn_encoder_forward.1
= control target key start
LH: loop header
LB: loop body
LE: loop exit
PB: predicated region body
PF: predicated region fallthrough
CT: control target
= control target key end

     0   :  { %19 = vsyncpa [#allocation6], 0  ;;  %s5309_s0 = inlined_call_operand.vmem [shape: f32[8,8,128], index: 0, kind: input, shape index: {}]   ;;  %s5310_s1 = inlined_call_operand.vmem [shape: f32[8,128], index: 1, kind: input, shape index: {}]   ;;  %s5311_s2 = inlined_call_operand.vmem [shape: bf16[128,384], index: 2, kind: input, shape index: {}]   ;;  %s5312_s3 = inlined_call_operand.hbm [shape: bf16[128,384], index: 3, kind: input, shape index: {}]   ;;  %s5313_s4 = inlined_call_operand.vmem [shape: f32[1,384], index: 4, kind: input, shape index: {}]   ;;  %s5314_s5 = inlined_call_operand.vmem [shape: f32[1,128], index: 5, kind: input, shape index: {}]   ;;  %s5315_s6 = inlined_call_operand.vmem [shape: bf16[128,128], index: 6, kind: input, shape index: {}]   ;;  %s5316_s7 = inlined_call_operand.vmem [shape: bf16[128,128], index: 7, kind: input, shape index: {}]   ;;  %s5317_s8 = inlined_call_operand.vmem [shape: f32[1,128], index: 8, kind: input, shape index: {}]   ;;  %s5318_s9 = inlined_call_operand.hbm [shape: bf16[128,384], index: 9, kind: input, shape index: {}]   ;;  %s5319_s10 = inlined_call_operand.hbm [shape: bf16[128,384], index: 10, kind: input, shape index: {}]   ;;  %s5320_s11 = inlined_call_operand.hbm [shape: bf16[128,384], index: 11, kind: input, shape index: {}]   ;;  %s5321_s12 = inlined_call_operand.vmem [shape: f32[1,384], index: 12, kind: input, shape index: {}]   ;;  %s5322_s13 = inlined_call_operand.vmem [shape: f32[1,128], index: 13, kind: input, shape index: {}]   ;;  %s5323_s14 = inlined_call_operand.vmem [shape: f32[8,128], index: 14, kind: output, shape index: {}]  }
   0x1   :  { %20 = vsyncpa [#allocation8], 0 }
   0x2   :  { %21 = vsyncpa [#allocation11], 0  ;;  %s55_s15 = sshll.u32 %s5318_s9, 4  ;;  %s4081_s16 = smov [#allocation7]   ;;  %s56_s15 = int_to_ptr.hbm [resolvable:$true] %s55_s15 }
   0x3   :  { %s57_s17 = sshll.u32 %s4081_s16, 4  ;;  %s32_s20 = sshll.u32 %s5312_s3, 4  ;;  %s58_s17 = int_to_ptr.vmem [resolvable:$true] %s57_s17  ;;  %s33_s20 = int_to_ptr.hbm [resolvable:$true] %s32_s20 }
   0x4   :  { %s4082_s21 = smov 192   ;;  %s4083_s22 = smov 12  }
   0x5   :  { %63 = dma.hbm_to_vmem [thread:$0]  %s56_s15, 3072, %s58_s17, [#allocation8], %s4082_s21, %s4082_s21, %s4083_s22  }
   0x6   :  { %s4084_s23 = smov [#allocation5]   ;;  %s68_s27 = sshll.u32 %s5319_s10, 4  ;;  %s69_s27 = int_to_ptr.hbm [resolvable:$true] %s68_s27 }
   0x7   :  { %s34_s24 = sshll.u32 %s4084_s23, 4  ;;  %s81_s29 = sshll.u32 %s5320_s11, 4  ;;  %s35_s24 = int_to_ptr.vmem [resolvable:$true] %s34_s24  ;;  %s82_s29 = int_to_ptr.hbm [resolvable:$true] %s81_s29 }
   0x8   :  { %40 = dma.hbm_to_vmem [thread:$0]  %s33_s20, 3072, %s35_s24, [#allocation6], %s4082_s21, %s4082_s21, %s4083_s22  }
   0x9   :  { %s4085_s30 = smov [#allocation9]   ;;  %s4086_s3 = smov [#allocation10]  }
   0xa   :  { %s70_s16 = sshll.u32 %s4085_s30, 4  ;;  %s83_s15 = sshll.u32 %s4086_s3, 4  ;;  %s71_s16 = int_to_ptr.vmem [resolvable:$true] %s70_s16  ;;  %s84_s15 = int_to_ptr.vmem [resolvable:$true] %s83_s15 }
   0xb   :  { %76 = dma.hbm_to_vmem [thread:$0]  %s69_s27, 3072, %s71_s16, [#allocation8], %s4082_s21, %s4082_s21, %s4083_s22  }
   0xc   :  { %89 = dma.hbm_to_vmem [thread:$0]  %s82_s29, 3072, %s84_s15, [#allocation11], %s4082_s21, %s4082_s21, %s4083_s22  }
   0xd   :  { %4075 = dma.done.wait [#allocation6], 3072  }
   0xe   :  { %4076 = vsyncadd [#allocation6], 4294964224 }
   0xf   :  { %4077 = dma.done.wait [#allocation8], 6144  }
  0x10   :  { %4078 = vsyncadd [#allocation8], 4294961152 }
  0x11   :  { %4079 = dma.done.wait [#allocation11], 3072  }
  0x12   :  { %4080 = vsyncadd [#allocation11], 4294964224  ;;  %v3141_v0 = vld [vmem:[%s5311_s2 + $0xb0] sm:$0xf]  ;;  %v3646_v1 = vld [vmem:[%s5311_s2 + $0xb8] sm:$0xf0] }
  0x13   :  { %v3229_v2 = vld [vmem:[#allocation9 + $0xa8] sm:$0xf]  ;;  %v3142_v3 = vor.u32 %v3646_v1, %v3141_v0  ;;  %v3669_v4 = vld [vmem:[#allocation9 + $0xb0] sm:$0xf0]  ;;  %v3129_v5 = vld [vmem:[%s5311_s2 + $0x98] sm:$0xf] }
  0x14   :  { %v3643_v6 = vld [vmem:[%s5311_s2 + $0xa0] sm:$0xf0]  ;;  %v3230_v7 = vor.u32 %v3669_v4, %v3229_v2  ;;  %v3217_v8 = vld [vmem:[#allocation9 + $0x90] sm:$0xf]  ;;  %v3666_v9 = vld [vmem:[#allocation9 + $0x98] sm:$0xf0] }
  0x15   :  { %357 = vmatpush.bf16.msra.mxu2 %v3142_v3  ;;  %v3130_v10 = vor.u32 %v3643_v6, %v3129_v5  ;;  %v3218_v11 = vor.u32 %v3666_v9, %v3217_v8  ;;  %v3117_v12 = vld [vmem:[%s5311_s2 + $0x80] sm:$0xf]  ;;  %v3640_v13 = vld [vmem:[%s5311_s2 + $0x88] sm:$0xf0]  ;;  %v3205_v14 = vld [vmem:[#allocation9 + $0x78] sm:$0xf] }
  0x16   :  { %590 = vmatpush.bf16.msra.mxu3 %v3230_v7  ;;  %v3663_v15 = vld [vmem:[#allocation9 + $0x80] sm:$0xf0]  ;;  %v3118_v16 = vor.u32 %v3640_v13, %v3117_v12  ;;  %v3105_v18 = vld [vmem:[%s5311_s2 + $0x68] sm:$0xf]  ;;  %v3637_v19 = vld [vmem:[%s5311_s2 + $0x70] sm:$0xf0] }
  0x17   :  { %v3206_v17 = vor.u32 %v3663_v15, %v3205_v14  ;;  %v3193_v20 = vld [vmem:[#allocation9 + $0x60] sm:$0xf]  ;;  %v3660_v21 = vld [vmem:[#allocation9 + $0x68] sm:$0xf0]  ;;  %v3106_v23 = vor.u32 %v3637_v19, %v3105_v18  ;;  %v3093_v26 = vld [vmem:[%s5311_s2 + $0x50] sm:$0xf] }
  0x18   :  { %v111_v22 = vld [vmem:[%s5309_s0] sm:$0xff]  ;;  %v112_v24 = vld [vmem:[%s5309_s0 + $0x8] sm:$0xff]  ;;  %v3194_v25 = vor.u32 %v3660_v21, %v3193_v20  ;;  %v3634_v27 = vld [vmem:[%s5311_s2 + $0x58] sm:$0xf0] }
  0x19   :  { %358 = vmatpush.bf16.msra.mxu2 %v3130_v10  ;;  %3769 = vtanh.f32 %v111_v22  ;;  %v3181_v28 = vld [vmem:[#allocation9 + $0x48] sm:$0xf]  ;;  %v3657_v29 = vld [vmem:[#allocation9 + $0x50] sm:$0xf0]  ;;  %v3094_v30 = vor.u32 %v3634_v27, %v3093_v26  ;;  %v3081_v32 = vld [vmem:[%s5311_s2 + $0x38] sm:$0xf] }
  0x1a   :  { %591 = vmatpush.bf16.msra.mxu3 %v3218_v11  ;;  %3771 = vtanh.f32 %v112_v24  ;;  %v3182_v31 = vor.u32 %v3657_v29, %v3181_v28  ;;  %v3631_v33 = vld [vmem:[%s5311_s2 + $0x40] sm:$0xf0]  ;;  %v3169_v34 = vld [vmem:[#allocation9 + $0x30] sm:$0xf]  ;;  %v3654_v35 = vld [vmem:[#allocation9 + $0x38] sm:$0xf0] }
  0x1b   :  { %v3082_v38 = vor.u32 %v3631_v33, %v3081_v32  ;;  %v3170_v39 = vor.u32 %v3654_v35, %v3169_v34  ;;  %v3069_v40 = vld [vmem:[%s5311_s2 + $0x20] sm:$0xf]  ;;  %v3628_v41 = vld [vmem:[%s5311_s2 + $0x28] sm:$0xf0]  ;;  %v3157_v42 = vld [vmem:[#allocation9 + $0x18] sm:$0xf] }
  0x1c   :  { %v3651_v43 = vld [vmem:[#allocation9 + $0x20] sm:$0xf0]  ;;  %v3133_v44 = vld [vmem:[%s5311_s2 + $0xa8] sm:$0xf]  ;;  %v3645_v45 = vld [vmem:[%s5311_s2 + $0xb0] sm:$0xf0]  ;;  %v3070_v46 = vor.u32 %v3628_v41, %v3069_v40 }
  0x1d   :  { %359 = vmatpush.bf16.msra.mxu2 %v3118_v16  ;;  %v3057_v47 = vld [vmem:[%s5311_s2 + $0x8] sm:$0xf]  ;;  %v3134_v48 = vor.u32 %v3645_v45, %v3133_v44  ;;  %v3158_v49 = vor.u32 %v3651_v43, %v3157_v42  ;;  %v3625_v50 = vld [vmem:[%s5311_s2 + $0x10] sm:$0xf0]  ;;  %v3145_v51 = vld [vmem:[#allocation9] sm:$0xf] }
  0x1e   :  { %592 = vmatpush.bf16.msra.mxu3 %v3206_v17  ;;  %v3648_v52 = vld [vmem:[#allocation9 + $0x8] sm:$0xf0]  ;;  %v3325_v53 = vld [vmem:[#allocation5 + $0xa8] sm:$0xf]  ;;  %v3693_v54 = vld [vmem:[#allocation5 + $0xb0] sm:$0xf0]  ;;  %v3058_v60 = vor.u32 %v3625_v50, %v3057_v47 }
  0x1f   :  { %v3770_v36 = vpop.eup %3769  ;;  %v113_v55 = vld [vmem:[%s5309_s0 + $0x10] sm:$0xff]  ;;  %299 = vmatpush.bf16.msra.mxu0 %v3134_v48  ;;  %v3692_v56 = vld [vmem:[#allocation5 + $0xac] sm:$0xf]  ;;  %v3327_v57 = vld [vmem:[#allocation5 + $0xb4] sm:$0xf0]  ;;  %v3146_v62 = vor.u32 %v3648_v52, %v3145_v51  ;;  %v4241_v63 = vor.u32 %v3693_v54, %v3325_v53 }
  0x20   :  { %v3772_v37 = vpop.eup %3771  ;;  %3773 = vtanh.f32 %v3770_v36  ;;  %v114_v58 = vld [vmem:[%s5309_s0 + $0x18] sm:$0xff]  ;;  %v3313_v0 = vld [vmem:[#allocation5 + $0x90] sm:$0xf]  ;;  %v4243_v2 = vor.u32 %v3692_v56, %v3327_v57  ;;  %v3689_v4 = vld [vmem:[#allocation5 + $0x94] sm:$0xf] }
  0x21   :  { %360 = vmatpush.bf16.msra.mxu2 %v3106_v23  ;;  %3775 = vtanh.f32 %v3772_v37  ;;  %v3690_v1 = vld [vmem:[#allocation5 + $0x98] sm:$0xf0]  ;;  %v4245_v3 = vpack.c.bf16 %v3772_v37, %v3770_v36  ;;  %v3315_v5 = vld [vmem:[#allocation5 + $0x9c] sm:$0xf0]  ;;  %v3301_v8 = vld [vmem:[#allocation5 + $0x78] sm:$0xf] }
  0x22   :  { %593 = vmatpush.bf16.msra.mxu3 %v3194_v25  ;;  %3777 = vtanh.f32 %v113_v55  ;;  %v4250_v7 = vor.u32 %v3690_v1, %v3313_v0  ;;  %v3687_v9 = vld [vmem:[#allocation5 + $0x80] sm:$0xf0]  ;;  %v4253_v10 = vor.u32 %v3689_v4, %v3315_v5  ;;  %v3121_v11 = vld [vmem:[%s5311_s2 + $0x90] sm:$0xf]  ;;  %v3642_v12 = vld [vmem:[%s5311_s2 + $0x98] sm:$0xf0] }
  0x23   :  { %3779 = vtanh.f32 %v114_v58  ;;  %v3686_v14 = vld [vmem:[#allocation5 + $0x7c] sm:$0xf]  ;;  %v3303_v15 = vld [vmem:[#allocation5 + $0x84] sm:$0xf0]  ;;  %v3122_v16 = vor.u32 %v3642_v12, %v3121_v11  ;;  %v3289_v18 = vld [vmem:[#allocation5 + $0x60] sm:$0xf]  ;;  %v4264_v19 = vor.u32 %v3687_v9, %v3301_v8 }
  0x24   :  { %v3684_v20 = vld [vmem:[#allocation5 + $0x68] sm:$0xf0]  ;;  %v3109_v21 = vld [vmem:[%s5311_s2 + $0x78] sm:$0xf]  ;;  %v3639_v22 = vld [vmem:[%s5311_s2 + $0x80] sm:$0xf0]  ;;  %v4273_v23 = vor.u32 %v3686_v14, %v3303_v15 }
  0x25   :  { %361 = vmatpush.bf16.msra.mxu2 %v3094_v30  ;;  %300 = vmatpush.bf16.msra.mxu0 %v3122_v16  ;;  %v3683_v24 = vld [vmem:[#allocation5 + $0x64] sm:$0xf]  ;;  %v3110_v25 = vor.u32 %v3639_v22, %v3109_v21  ;;  %v3644_v26 = vld [vmem:[%s5311_s2 + $0xac] sm:$0xf]  ;;  %v3135_v27 = vld [vmem:[%s5311_s2 + $0xb4] sm:$0xf0]  ;;  %v4297_v35 = vor.u32 %v3684_v20, %v3289_v18 }
  0x26   :  { %594 = vmatpush.bf16.msra.mxu3 %v3182_v31  ;;  %v3774_v59 = vpop.eup %3773  ;;  %v3291_v28 = vld [vmem:[#allocation5 + $0x6c] sm:$0xf0]  ;;  %v3138_v29 = vor.u32 %v3644_v26, %v3135_v27  ;;  %v3097_v30 = vld [vmem:[%s5311_s2 + $0x60] sm:$0xf]  ;;  %v3636_v31 = vld [vmem:[%s5311_s2 + $0x68] sm:$0xf0] }
  0x27   :  { %v3776_v61 = vpop.eup %3775  ;;  %v115_v32 = vld [vmem:[%s5309_s0 + $0x20] sm:$0xff]  ;;  %v3641_v33 = vld [vmem:[%s5311_s2 + $0x94] sm:$0xf]  ;;  %v116_v36 = vld [vmem:[%s5309_s0 + $0x28] sm:$0xff]  ;;  %v4303_v40 = vor.u32 %v3683_v24, %v3291_v28 }
  0x28   :  { %v4247_v6 = vpack.c.bf16 %v3776_v61, %v3774_v59  ;;  %v3778_v13 = vpop.eup %3777  ;;  %v3123_v34 = vld [vmem:[%s5311_s2 + $0x9c] sm:$0xf0]  ;;  %v3277_v37 = vld [vmem:[#allocation5 + $0x48] sm:$0xf]  ;;  %328 = vmatpush.bf16.msra.mxu1 %v3138_v29  ;;  %v3680_v42 = vld [vmem:[#allocation5 + $0x4c] sm:$0xf] }
  0x29   :  { %362 = vmatpush.bf16.msra.mxu2 %v3082_v38  ;;  %v3780_v17 = vpop.eup %3779  ;;  %3781 = vtanh.f32 %v3778_v13  ;;  %v3681_v38 = vld [vmem:[#allocation5 + $0x50] sm:$0xf0]  ;;  %301 = vmatpush.bf16.msra.mxu0 %v3110_v25  ;;  %v3126_v41 = vor.u32 %v3641_v33, %v3123_v34  ;;  %v3085_v43 = vld [vmem:[%s5311_s2 + $0x48] sm:$0xf]  ;;  %v3279_v45 = vld [vmem:[#allocation5 + $0x54] sm:$0xf0] }
  0x2a   :  { %595 = vmatpush.bf16.msra.mxu3 %v3170_v39  ;;  %3783 = vtanh.f32 %v3780_v17  ;;  %v3098_v39 = vor.u32 %v3636_v31, %v3097_v30  ;;  %v3633_v44 = vld [vmem:[%s5311_s2 + $0x50] sm:$0xf0]  ;;  %v3111_v47 = vld [vmem:[%s5311_s2 + $0x84] sm:$0xf0]  ;;  %v4318_v50 = vor.u32 %v3681_v38, %v3277_v37  ;;  %v3265_v52 = vld [vmem:[#allocation5 + $0x30] sm:$0xf]  ;;  %v4321_v54 = vor.u32 %v3680_v42, %v3279_v45 }
  0x2b   :  { %3785 = vtanh.f32 %v115_v32  ;;  %v3086_v51 = vor.u32 %v3633_v44, %v3085_v43  ;;  %v3678_v53 = vld [vmem:[#allocation5 + $0x38] sm:$0xf0]  ;;  %v4323_v56 = vpack.c.bf16 %v3780_v17, %v3778_v13  ;;  %v3253_v59 = vld [vmem:[#allocation5 + $0x18] sm:$0xf]  ;;  %v3073_v61 = vld [vmem:[%s5311_s2 + $0x30] sm:$0xf] }
  0x2c   :  { %3787 = vtanh.f32 %v116_v36  ;;  %329 = vmatpush.bf16.msra.mxu1 %v3126_v41  ;;  %v4328_v58 = vor.u32 %v3678_v53, %v3265_v52  ;;  %v3635_v0 = vld [vmem:[%s5311_s2 + $0x64] sm:$0xf]  ;;  %v3099_v5 = vld [vmem:[%s5311_s2 + $0x6c] sm:$0xf0]  ;;  %v3677_v11 = vld [vmem:[#allocation5 + $0x34] sm:$0xf] }
  0x2d   :  { %363 = vmatpush.bf16.msra.mxu2 %v3070_v46  ;;  %v3638_v46 = vld [vmem:[%s5311_s2 + $0x7c] sm:$0xf]  ;;  %302 = vmatpush.bf16.msra.mxu0 %v3098_v39  ;;  %v3102_v9 = vor.u32 %v3635_v0, %v3099_v5  ;;  %v3267_v12 = vld [vmem:[#allocation5 + $0x3c] sm:$0xf0]  ;;  %v3672_v16 = vld [vmem:[#allocation5 + $0x8] sm:$0xf0] }
  0x2e   :  { %596 = vmatpush.bf16.msra.mxu3 %v3158_v49  ;;  %v3114_v55 = vor.u32 %v3638_v46, %v3111_v47  ;;  %v3241_v13 = vld [vmem:[#allocation5] sm:$0xf]  ;;  %v4348_v15 = vor.u32 %v3677_v11, %v3267_v12  ;;  %v3061_v17 = vld [vmem:[%s5311_s2 + $0x18] sm:$0xf]  ;;  %v3627_v18 = vld [vmem:[%s5311_s2 + $0x20] sm:$0xf0] }
  0x2f   :  { %v3782_v48 = vpop.eup %3781  ;;  %v3062_v20 = vor.u32 %v3627_v18, %v3061_v17  ;;  %v3632_v21 = vld [vmem:[%s5311_s2 + $0x4c] sm:$0xf]  ;;  %v3087_v22 = vld [vmem:[%s5311_s2 + $0x54] sm:$0xf0]  ;;  %v3333_v24 = vld [vmem:[#allocation5 + $0xb0] sm:$0xf]  ;;  %v4382_v34 = vor.u32 %v3672_v16, %v3241_v13 }
  0x30   :  { %v3784_v49 = vpop.eup %3783  ;;  %330 = vmatpush.bf16.msra.mxu1 %v3114_v55  ;;  %v3090_v25 = vor.u32 %v3632_v21, %v3087_v22  ;;  %v3694_v26 = vld [vmem:[#allocation5 + $0xb8] sm:$0xf0]  ;;  %v3049_v27 = vld [vmem:[%s5311_s2] sm:$0xf]  ;;  %v3624_v28 = vld [vmem:[%s5311_s2 + $0x8] sm:$0xf0] }
  0x31   :  { %364 = vmatpush.bf16.msra.mxu2 %v3058_v60  ;;  %v4325_v57 = vpack.c.bf16 %v3784_v49, %v3782_v48  ;;  %303 = vmatpush.bf16.msra.mxu0 %v3086_v51  ;;  %v3675_v60 = vld [vmem:[#allocation5 + $0x20] sm:$0xf0]  ;;  %v3786_v1 = vpop.eup %3785  ;;  %v3629_v29 = vld [vmem:[%s5311_s2 + $0x34] sm:$0xf]  ;;  %v3075_v30 = vld [vmem:[%s5311_s2 + $0x3c] sm:$0xf0]  ;;  %v3050_v36 = vor.u32 %v3624_v28, %v3049_v27  ;;  %v4384_v38 = vor.u32 %v3694_v26, %v3333_v24 }
  0x32   :  { %597 = vmatpush.bf16.msra.mxu3 %v3146_v62  ;;  %v3630_v62 = vld [vmem:[%s5311_s2 + $0x38] sm:$0xf0]  ;;  %v3788_v8 = vpop.eup %3787  ;;  %v4346_v14 = vor.u32 %v3675_v60, %v3253_v59  ;;  %3789 = vtanh.f32 %v3786_v1  ;;  %v117_v32 = vld [vmem:[%s5309_s0 + $0x30] sm:$0xff]  ;;  %v3255_v37 = vld [vmem:[#allocation5 + $0x24] sm:$0xf0]  ;;  %v3078_v39 = vor.u32 %v3629_v29, %v3075_v30 }
  0x33   :  { %v3074_v4 = vor.u32 %v3630_v62, %v3073_v61  ;;  %3791 = vtanh.f32 %v3788_v8  ;;  %v3674_v31 = vld [vmem:[#allocation5 + $0x1c] sm:$0xf]  ;;  %v3321_v42 = vld [vmem:[#allocation5 + $0x98] sm:$0xf]  ;;  %v3691_v43 = vld [vmem:[#allocation5 + $0xa0] sm:$0xf0]  ;;  %v4401_v55 = vpack.c.bf16 %v3788_v8, %v3786_v1 }
  0x34   :  { %365 = vmatmul.bf16.vlgmr.msra.gmra.mxu2 %v4245_v3  ;;  %331 = vmatpush.bf16.msra.mxu1 %v3102_v9  ;;  %v118_v33 = vld [vmem:[%s5309_s0 + $0x38] sm:$0xff]  ;;  %v4386_v41 = vor.u32 %v3674_v31, %v3255_v37  ;;  %v3671_v44 = vld [vmem:[#allocation5 + $0x4] sm:$0xf]  ;;  %v3063_v46 = vld [vmem:[%s5311_s2 + $0x24] sm:$0xf0]  ;;  %3793 = vtanh.f32 %v117_v32  ;;  %v4399_v52 = vor.u32 %v3691_v43, %v3321_v42  ;;  %v5324_v37 = vmov 0  }
  0x35   :  { %868 = vmatpush.bf16.msrb.mxu2 %v4241_v63  ;;  %598 = vmatmul.bf16.vlgmr.msra.gmra.mxu3 %v4247_v6  ;;  %v3626_v45 = vld [vmem:[%s5311_s2 + $0x1c] sm:$0xf]  ;;  %v3243_v47 = vld [vmem:[#allocation5 + $0xc] sm:$0xf0]  ;;  %3795 = vtanh.f32 %v118_v33  ;;  %v3309_v59 = vld [vmem:[#allocation5 + $0x80] sm:$0xf] }
  0x36   :  { %881 = vmatpush.bf16.msrb.mxu3 %v4243_v2  ;;  %304 = vmatpush.bf16.msra.mxu0 %v3074_v4  ;;  %v4395_v49 = vor.u32 %v3671_v44, %v3243_v47  ;;  %v3066_v53 = vor.u32 %v3626_v45, %v3063_v46  ;;  %v3688_v60 = vld [vmem:[#allocation5 + $0x88] sm:$0xf0]  ;;  %v3623_v0 = vld [vmem:[%s5311_s2 + $0x4] sm:$0xf]  ;;  %v3051_v1 = vld [vmem:[%s5311_s2 + $0xc] sm:$0xf0] }
  0x37   :  { %v4409_v62 = vor.u32 %v3688_v60, %v3309_v59  ;;  %v3054_v5 = vor.u32 %v3623_v0, %v3051_v1  ;;  %v3297_v8 = vld [vmem:[#allocation5 + $0x68] sm:$0xf]  ;;  %v3685_v9 = vld [vmem:[#allocation5 + $0x70] sm:$0xf0]  ;;  %v3285_v13 = vld [vmem:[#allocation5 + $0x50] sm:$0xf] }
  0x38   :  { %332 = vmatpush.bf16.msra.mxu1 %v3090_v25  ;;  %v3790_v48 = vpop.eup %3789  ;;  %v4421_v12 = vor.u32 %v3685_v9, %v3297_v8  ;;  %v3682_v16 = vld [vmem:[#allocation5 + $0x58] sm:$0xf0]  ;;  %v3273_v18 = vld [vmem:[#allocation5 + $0x38] sm:$0xf]  ;;  %v3261_v26 = vld [vmem:[#allocation5 + $0x20] sm:$0xf] }
  0x39   :  { %869 = vmatpush.bf16.msrb.mxu2 %v4250_v7  ;;  %v3792_v51 = vpop.eup %3791  ;;  %v4426_v17 = vor.u32 %v3682_v16, %v3285_v13  ;;  %v3676_v27 = vld [vmem:[#allocation5 + $0x28] sm:$0xf0]  ;;  %v3249_v29 = vld [vmem:[#allocation5 + $0x8] sm:$0xf]  ;;  %v3673_v30 = vld [vmem:[#allocation5 + $0x10] sm:$0xf0] }
  0x3a   :  { %882 = vmatpush.bf16.msrb.mxu3 %v4253_v10  ;;  %305 = vmatpush.bf16.msra.mxu0 %v3062_v20  ;;  %v4403_v61 = vpack.c.bf16 %v3792_v51, %v3790_v48  ;;  %v3794_v4 = vpop.eup %3793  ;;  %v3679_v20 = vld [vmem:[#allocation5 + $0x40] sm:$0xf0]  ;;  %v4437_v28 = vor.u32 %v3676_v27, %v3261_v26  ;;  %v3668_v31 = vld [vmem:[#allocation9 + $0xac] sm:$0xf]  ;;  %v3231_v32 = vld [vmem:[#allocation9 + $0xb4] sm:$0xf0] }
  0x3b   :  { %v3796_v11 = vpop.eup %3795  ;;  %3797 = vtanh.f32 %v3794_v4  ;;  %v4430_v24 = vor.u32 %v3679_v20, %v3273_v18  ;;  %v3234_v33 = vor.u32 %v3668_v31, %v3231_v32  ;;  %v3662_v43 = vld [vmem:[#allocation9 + $0x7c] sm:$0xf]  ;;  %v3207_v44 = vld [vmem:[#allocation9 + $0x84] sm:$0xf0]  ;;  %v3237_v46 = vld [vmem:[#allocation9 + $0xb0] sm:$0xf] }
  0x3c   :  { %333 = vmatpush.bf16.msra.mxu1 %v3078_v39  ;;  %3799 = vtanh.f32 %v3796_v11  ;;  %v130_v25 = vpack.c.bf16 %v3796_v11, %v3794_v4  ;;  %v3219_v39 = vld [vmem:[#allocation9 + $0x9c] sm:$0xf0]  ;;  %v3210_v45 = vor.u32 %v3662_v43, %v3207_v44  ;;  %v3670_v47 = vld [vmem:[#allocation9 + $0xb8] sm:$0xf0]  ;;  %v3225_v51 = vld [vmem:[#allocation9 + $0x98] sm:$0xf] }
  0x3d   :  { %870 = vmatpush.bf16.msrb.mxu2 %v4264_v19  ;;  %v3238_v48 = vor.u32 %v3670_v47, %v3237_v46  ;;  %v3195_v60 = vld [vmem:[#allocation9 + $0x6c] sm:$0xf0]  ;;  %v3213_v1 = vld [vmem:[#allocation9 + $0x80] sm:$0xf]  ;;  %v3664_v4 = vld [vmem:[#allocation9 + $0x88] sm:$0xf0] }
  0x3e   :  { %883 = vmatpush.bf16.msrb.mxu3 %v4273_v23  ;;  %306 = vmatpush.bf16.msra.mxu0 %v3050_v36  ;;  %v4442_v36 = vor.u32 %v3673_v30, %v3249_v29  ;;  %v3201_v8 = vld [vmem:[#allocation9 + $0x68] sm:$0xf]  ;;  %v3661_v9 = vld [vmem:[#allocation9 + $0x70] sm:$0xf0]  ;;  %v3656_v11 = vld [vmem:[#allocation9 + $0x4c] sm:$0xf] }
  0x3f   :  { %v4480_v13 = vld [vmem:[%s5321_s12] sm:$0x7]  ;;  %v3202_v16 = vor.u32 %v3661_v9, %v3201_v8  ;;  %v3183_v18 = vld [vmem:[#allocation9 + $0x54] sm:$0xf0]  ;;  %v3653_v31 = vld [vmem:[#allocation9 + $0x34] sm:$0xf] }
  0x40   :  { %334 = vmatpush.bf16.msra.mxu1 %v3066_v53  ;;  %v3667_v53 = vld [vmem:[#allocation9 + $0xa0] sm:$0xf0]  ;;  %v3186_v20 = vor.u32 %v3656_v11, %v3183_v18  ;;  %v3171_v32 = vld [vmem:[#allocation9 + $0x3c] sm:$0xf0]  ;;  %v3650_v43 = vld [vmem:[#allocation9 + $0x1c] sm:$0xf] }
  0x41   :  { %871 = vmatpush.bf16.msrb.mxu2 %v4297_v35  ;;  %307 = vmatmul.bf16.vlgmr.msra.gmra.mxu0 %v4245_v3  ;;  %v3798_v21 = vpop.eup %3797  ;;  %v3226_v59 = vor.u32 %v3667_v53, %v3225_v51  ;;  %v3159_v44 = vld [vmem:[#allocation9 + $0x24] sm:$0xf0] }
  0x42   :  { %884 = vmatpush.bf16.msrb.mxu3 %v4303_v40  ;;  %v3800_v22 = vpop.eup %3799  ;;  %619 = vmatpush.bf16.msrb.mxu0 %v3234_v33  ;;  %v3177_v33 = vld [vmem:[#allocation9 + $0x38] sm:$0xf]  ;;  %v3162_v47 = vor.u32 %v3650_v43, %v3159_v44 }
  0x44   :  { %370 = vmatmul.bf16.gmra.mxu2 %v4323_v56  ;;  %335 = vmatpush.bf16.msra.mxu1 %v3054_v5  ;;  %v3214_v5 = vor.u32 %v3664_v4, %v3213_v1  ;;  %v3649_v1 = vld [vmem:[#allocation9 + $0x10] sm:$0xf0]  ;;  %v163_v4 = vld [vmem:[%s5313_s4] sm:$0x7] }
  0x45   :  { %872 = vmatpush.bf16.msrb.mxu2 %v4318_v50  ;;  %603 = vmatmul.bf16.gmra.mxu3 %v4325_v57  ;;  %v4497_v8 = vperm.slane %v163_v4, 2  ;;  %v4556_v43 = vperm.slane %v163_v4, 0 }
  0x46   :  { %885 = vmatpush.bf16.msrb.mxu3 %v4321_v54 }
  0x47   :  { %336 = vmatmul.bf16.vlgmr.msra.gmra.mxu1 %v4245_v3  ;;  %v4432_v3 = vpack.c.bf16 %v3800_v22, %v3798_v21  ;;  %v4483_v21 = vperm.slane %v4480_v13, 0  ;;  %v3189_v22 = vld [vmem:[#allocation9 + $0x50] sm:$0xf] }
  0x48   :  { %648 = vmatpush.bf16.msrb.mxu1 %v3238_v48  ;;  %v3652_v48 = vld [vmem:[#allocation9 + $0x28] sm:$0xf0] }
  0x49   :  { %873 = vmatpush.bf16.msrb.mxu2 %v4328_v58  ;;  %5332 = vst [vmem:[#allocation15_spill] sm:$0xff] %v4483_v21 }
  0x4a   :  { %886 = vmatpush.bf16.msrb.mxu3 %v4348_v15 }
  0x4c   :  { %649 = vmatpush.bf16.msrb.mxu1 %v3226_v59  ;;  %v3147_v59 = vld [vmem:[#allocation9 + $0xc] sm:$0xf0] }
  0x4d   :  { %874 = vmatpush.bf16.msrb.mxu2 %v4346_v14 }
  0x4e   :  { %887 = vmatpush.bf16.msrb.mxu3 %v4386_v41 }
  0x50   :  { %650 = vmatpush.bf16.msrb.mxu1 %v3214_v5 }
  0x51   :  { %875 = vmatpush.bf16.msrb.mxu2 %v4382_v34  ;;  %312 = vmatmul.bf16.gmra.mxu0 %v4323_v56 }
  0x52   :  { %888 = vmatpush.bf16.msrb.mxu3 %v4395_v49 }
  0x54   :  { %375 = vmatmul.bf16.gmra.mxu2 %v4401_v55  ;;  %651 = vmatpush.bf16.msrb.mxu1 %v3202_v16 }
  0x55   :  { %894 = vmatpush.bf16.msra.mxu2 %v4384_v38  ;;  %608 = vmatmul.bf16.gmra.mxu3 %v4403_v61 }
  0x56   :  { %961 = vmatpush.bf16.msra.mxu3 %v4241_v63 }
  0x57   :  { %341 = vmatmul.bf16.gmra.mxu1 %v4323_v56  ;;  %v3665_v56 = vld [vmem:[#allocation9 + $0x94] sm:$0xf] }
  0x58   :  { %v3222_v42 = vor.u32 %v3665_v56, %v3219_v39  ;;  %v3174_v56 = vor.u32 %v3653_v31, %v3171_v32  ;;  %v3655_v39 = vld [vmem:[#allocation9 + $0x40] sm:$0xf0] }
  0x59   :  { %895 = vmatpush.bf16.msra.mxu2 %v4399_v52 }
  0x5a   :  { %962 = vmatpush.bf16.msra.mxu3 %v4250_v7  ;;  %620 = vmatpush.bf16.msrb.mxu0 %v3222_v42  ;;  %v3178_v42 = vor.u32 %v3655_v39, %v3177_v33 }
  0x5d   :  { %896 = vmatpush.bf16.msra.mxu2 %v4409_v62 }
  0x5e   :  { %963 = vmatpush.bf16.msra.mxu3 %v4264_v19  ;;  %621 = vmatpush.bf16.msrb.mxu0 %v3210_v45  ;;  %v3165_v45 = vld [vmem:[#allocation9 + $0x20] sm:$0xf] }
  0x5f   :  { %v3166_v53 = vor.u32 %v3652_v48, %v3165_v45  ;;  %v4561_v45 = vperm.slane %v163_v4, 1 }
  0x61   :  { %897 = vmatpush.bf16.msra.mxu2 %v4421_v12  ;;  %317 = vmatmul.bf16.gmra.mxu0 %v4401_v55 }
  0x62   :  { %964 = vmatpush.bf16.msra.mxu3 %v4297_v35 }
  0x64   :  { %380 = vmatmul.bf16.gmra.mxu2 %v130_v25 }
  0x65   :  { %898 = vmatpush.bf16.msra.mxu2 %v4426_v17  ;;  %613 = vmatmul.bf16.gmra.mxu3 %v4432_v3 }
  0x66   :  { %965 = vmatpush.bf16.msra.mxu3 %v4318_v50 }
  0x67   :  { %346 = vmatmul.bf16.gmra.mxu1 %v4401_v55  ;;  %v3659_v55 = vld [vmem:[#allocation9 + $0x64] sm:$0xf] }
  0x68   :  { %v3198_v0 = vor.u32 %v3659_v55, %v3195_v60  ;;  %v3647_v55 = vld [vmem:[#allocation9 + $0x4] sm:$0xf]  ;;  %v3153_v60 = vld [vmem:[#allocation9 + $0x8] sm:$0xf] }
  0x69   :  { %899 = vmatpush.bf16.msra.mxu2 %v4430_v24  ;;  %v3154_v5 = vor.u32 %v3649_v1, %v3153_v60 }
  0x6a   :  { %966 = vmatpush.bf16.msra.mxu3 %v4328_v58  ;;  %622 = vmatpush.bf16.msrb.mxu0 %v3198_v0  ;;  %v3150_v0 = vor.u32 %v3647_v55, %v3147_v59 }
  0x6d   :  { %900 = vmatpush.bf16.msra.mxu2 %v4437_v28 }
  0x6e   :  { %967 = vmatpush.bf16.msra.mxu3 %v4346_v14  ;;  %623 = vmatpush.bf16.msrb.mxu0 %v3186_v20 }
  0x71   :  { %901 = vmatpush.bf16.msra.mxu2 %v4442_v36  ;;  %322 = vmatmul.bf16.gmra.mxu0 %v130_v25 }
  0x72   :  { %968 = vmatpush.bf16.msra.mxu3 %v4382_v34  ;;  %624 = vmatpush.bf16.msrb.mxu0 %v3174_v56 }
  0x74   :  { %876 = vmatmul.bf16.vlgmr.msrb.gmra.mxu2 %v5324_v37 }
  0x75   :  { %889 = vmatmul.bf16.vlgmr.msrb.gmra.mxu3 %v5324_v37  ;;  %1055 = vmatpush.bf16.msrb.mxu2 %v4241_v63 }
  0x76   :  { %1068 = vmatpush.bf16.msrb.mxu3 %v4243_v2  ;;  %625 = vmatpush.bf16.msrb.mxu0 %v3162_v47 }
  0x77   :  { %351 = vmatmul.bf16.gmra.mxu1 %v130_v25  ;;  %v3658_v25 = vld [vmem:[#allocation9 + $0x58] sm:$0xf0] }
  0x78   :  { %v3190_v27 = vor.u32 %v3658_v25, %v3189_v22 }
  0x79   :  { %1056 = vmatpush.bf16.msrb.mxu2 %v4250_v7 }
  0x7a   :  { %1069 = vmatpush.bf16.msrb.mxu3 %v4253_v10  ;;  %652 = vmatpush.bf16.msrb.mxu1 %v3190_v27 }
  0x7b   :  { %626 = vmatpush.bf16.msrb.mxu0 %v3150_v0 }
  0x7d   :  { %1057 = vmatpush.bf16.msrb.mxu2 %v4264_v19 }
  0x7e   :  { %1070 = vmatpush.bf16.msrb.mxu3 %v4273_v23  ;;  %653 = vmatpush.bf16.msrb.mxu1 %v3178_v42 }
  0x7f   :  { %974 = vmatpush.bf16.msra.mxu0 %v4243_v2 }
  0x81   :  { %1058 = vmatpush.bf16.msrb.mxu2 %v4297_v35  ;;  %627 = vmatmul.bf16.vlgmr.msrb.gmra.mxu0 %v4247_v6 }
  0x82   :  { %1071 = vmatpush.bf16.msrb.mxu3 %v4303_v40  ;;  %654 = vmatpush.bf16.msrb.mxu1 %v3166_v53 }
  0x83   :  { %975 = vmatpush.bf16.msra.mxu0 %v4253_v10 }
  0x84   :  { %902 = vmatmul.bf16.vlgmr.msra.gmra.mxu2 %v5324_v37 }
  0x85   :  { %1059 = vmatpush.bf16.msrb.mxu2 %v4318_v50 }
  0x86   :  { %1072 = vmatpush.bf16.msrb.mxu3 %v4321_v54  ;;  %655 = vmatpush.bf16.msrb.mxu1 %v3154_v5 }
  0x87   :  { %976 = vmatpush.bf16.msra.mxu0 %v4273_v23 }
  0x89   :  { %1060 = vmatpush.bf16.msrb.mxu2 %v4328_v58  ;;  %656 = vmatmul.bf16.vlgmr.msrb.gmra.mxu1 %v4247_v6 }
  0x8a   :  { %1073 = vmatpush.bf16.msrb.mxu3 %v4348_v15  ;;  %987 = vmatpush.bf16.msra.mxu1 %v4384_v38 }
  0x8b   :  { %977 = vmatpush.bf16.msra.mxu0 %v4303_v40 }
  0x8d   :  { %1061 = vmatpush.bf16.msrb.mxu2 %v4346_v14 }
  0x8e   :  { %1074 = vmatpush.bf16.msrb.mxu3 %v4386_v41  ;;  %988 = vmatpush.bf16.msra.mxu1 %v4399_v52 }
  0x8f   :  { %978 = vmatpush.bf16.msra.mxu0 %v4321_v54 }
  0x91   :  { %1062 = vmatpush.bf16.msrb.mxu2 %v4382_v34  ;;  %632 = vmatmul.bf16.gmra.mxu0 %v4325_v57 }
  0x92   :  { %1075 = vmatpush.bf16.msrb.mxu3 %v4395_v49  ;;  %989 = vmatpush.bf16.msra.mxu1 %v4409_v62 }
  0x93   :  { %979 = vmatpush.bf16.msra.mxu0 %v4348_v15 }
  0x95   :  { %1162 = vmatpush.bf16.msra.mxu2 %v4243_v2 }
  0x96   :  { %990 = vmatpush.bf16.msra.mxu1 %v4421_v12 }
  0x97   :  { %980 = vmatpush.bf16.msra.mxu0 %v4386_v41 }
  0x99   :  { %1163 = vmatpush.bf16.msra.mxu2 %v4253_v10  ;;  %661 = vmatmul.bf16.gmra.mxu1 %v4325_v57 }
  0x9a   :  { %991 = vmatpush.bf16.msra.mxu1 %v4426_v17 }
  0x9b   :  { %981 = vmatpush.bf16.msra.mxu0 %v4395_v49 }
  0x9d   :  { %1164 = vmatpush.bf16.msra.mxu2 %v4273_v23 }
  0x9e   :  { %992 = vmatpush.bf16.msra.mxu1 %v4430_v24 }
  0x9f   :  { %1081 = vmatpush.bf16.msrb.mxu0 %v4384_v38 }
  0xa1   :  { %1165 = vmatpush.bf16.msra.mxu2 %v4303_v40  ;;  %637 = vmatmul.bf16.gmra.mxu0 %v4403_v61 }
  0xa2   :  { %993 = vmatpush.bf16.msra.mxu1 %v4437_v28 }
  0xa3   :  { %1082 = vmatpush.bf16.msrb.mxu0 %v4399_v52 }
  0xa5   :  { %1166 = vmatpush.bf16.msra.mxu2 %v4321_v54 }
  0xa6   :  { %994 = vmatpush.bf16.msra.mxu1 %v4442_v36 }
  0xa7   :  { %1083 = vmatpush.bf16.msrb.mxu0 %v4409_v62 }
  0xa9   :  { %1167 = vmatpush.bf16.msra.mxu2 %v4348_v15  ;;  %666 = vmatmul.bf16.gmra.mxu1 %v4403_v61 }
  0xaa   :  { %1149 = vmatpush.bf16.msrb.mxu1 %v4241_v63 }
  0xab   :  { %1084 = vmatpush.bf16.msrb.mxu0 %v4421_v12 }
  0xad   :  { %1168 = vmatpush.bf16.msra.mxu2 %v4386_v41 }
  0xae   :  { %1150 = vmatpush.bf16.msrb.mxu1 %v4250_v7 }
  0xaf   :  { %1085 = vmatpush.bf16.msrb.mxu0 %v4426_v17 }
  0xb1   :  { %1169 = vmatpush.bf16.msra.mxu2 %v4395_v49  ;;  %642 = vmatmul.bf16.gmra.mxu0 %v4432_v3 }
  0xb2   :  { %1151 = vmatpush.bf16.msrb.mxu1 %v4264_v19 }
  0xb3   :  { %1086 = vmatpush.bf16.msrb.mxu0 %v4430_v24 }
  0xb6   :  { %1152 = vmatpush.bf16.msrb.mxu1 %v4297_v35 }
  0xb7   :  { %v4485_v26 = vpop.f32.mrf.mxu2  ;;  %1087 = vmatpush.bf16.msrb.mxu0 %v4437_v28 }
  0xb8   :  { %v599_v29 = vpop.f32.mrf.mxu3 }
  0xb9   :  { %v4488_v30 = vadd.f32 %v599_v29, %v4483_v21  ;;  %671 = vmatmul.bf16.gmra.mxu1 %v4432_v3 }
  0xba   :  { %1153 = vmatpush.bf16.msrb.mxu1 %v4318_v50 }
  0xbb   :  { %5333 = vst [vmem:[#allocation16_spill] sm:$0xff] %v4488_v30  ;;  %1088 = vmatpush.bf16.msrb.mxu0 %v4442_v36 }
  0xbe   :  { %v308_v48 = vpop.f32.mrf.mxu0  ;;  %1154 = vmatpush.bf16.msrb.mxu1 %v4328_v58 }
  0xbf   :  { %v4490_v46 = vpop.f32.mrf.mxu2  ;;  %v309_v61 = vadd.f32 %v308_v48, %v4556_v43 }
  0xc0   :  { %v4492_v51 = vpop.f32.mrf.mxu3 }
  0xc1   :  { %5334 = vst [vmem:[#allocation17_spill] sm:$0xff] %v4492_v51 }
  0xc2   :  { %1155 = vmatpush.bf16.msrb.mxu1 %v4346_v14 }
  0xc4   :  { %v337_v47 = vpop.f32.mrf.mxu1 }
  0xc5   :  { %v338_v53 = vadd.f32 %v337_v47, %v4561_v45 }
  0xc6   :  { %1156 = vmatpush.bf16.msrb.mxu1 %v4382_v34 }
  0xc7   :  { %v371_v9 = vpop.f32.mrf.mxu2 }
  0xc8   :  { %v4502_v11 = vadd.f32 %v371_v9, %v4497_v8  ;;  %v604_v16 = vpop.f32.mrf.mxu3 }
  0xc9   :  { %v4506_v18 = vadd.f32 %v604_v16, %v4483_v21  ;;  %v4575_v16 = vpop.f32.mrf.mxu0 }
  0xcb   :  { %5335 = vst [vmem:[#allocation18_spill] sm:$0xff] %v4506_v18 }
  0xcf   :  { %v4512_v20 = vpop.f32.mrf.mxu2 }
  0xd0   :  { %v4515_v22 = vpop.f32.mrf.mxu3 }
  0xd1   :  { %5336 = vst [vmem:[#allocation19_spill] sm:$0xff] %v4515_v22  ;;  %v4579_v48 = vpop.f32.mrf.mxu0 }
  0xd7   :  { %v376_v25 = vpop.f32.mrf.mxu2 }
  0xd8   :  { %v4522_v6 = vadd.f32 %v376_v25, %v4497_v8  ;;  %v609_v27 = vpop.f32.mrf.mxu3 }
  0xd9   :  { %v4526_v29 = vadd.f32 %v609_v27, %v4483_v21  ;;  %v4577_v27 = vpop.f32.mrf.mxu1 }
  0xdb   :  { %5337 = vst [vmem:[#allocation20_spill] sm:$0xff] %v4526_v29  ;;  %v4589_v29 = vpop.f32.mrf.mxu0 }
  0xdf   :  { %v4532_v31 = vpop.f32.mrf.mxu2 }
  0xe0   :  { %v4535_v32 = vpop.f32.mrf.mxu3 }
  0xe1   :  { %5338 = vst [vmem:[#allocation21_spill] sm:$0xff] %v4535_v32 }
  0xe7   :  { %v381_v57 = vpop.f32.mrf.mxu2 }
  0xe8   :  { %v4543_v33 = vadd.f32 %v381_v57, %v4497_v8  ;;  %v614_v56 = vpop.f32.mrf.mxu3 }
  0xe9   :  { %v4548_v39 = vadd.f32 %v614_v56, %v4483_v21 }
  0xea   :  { %5339 = vst [vmem:[#allocation22_spill] sm:$0xff] %v4543_v33 }
  0xeb   :  { %5340 = vst [vmem:[#allocation23_spill] sm:$0xff] %v4548_v39 }
  0xef   :  { %v4553_v42 = vpop.f32.mrf.mxu2 }
  0xf0   :  { %5341 = vst [vmem:[#allocation24_spill] sm:$0xff] %v4553_v42  ;;  %v4558_v44 = vpop.f32.mrf.mxu3 }
  0xf1   :  { %5342 = vst [vmem:[#allocation25_spill] sm:$0xff] %v4558_v44 }
  0xf7   :  { %v877_v55 = vpop.f32.mrf.mxu2 }
  0xf8   :  { %v907_v59 = vadd.f32 %v877_v55, %v309_v61  ;;  %v890_v60 = vpop.f32.mrf.mxu3  ;;  %v4581_v61 = vpop.f32.mrf.mxu1 }
  0xf9   :  { %v927_v0 = vadd.f32 %v890_v60, %v338_v53 }
  0xfa   :  { %v3335_v1 = vmul.f32 -1.442695, %v907_v59 }
  0xfb   :  { %v3336_v4 = vmul.f32 -1.442695, %v927_v0  ;;  %v4586_v0 = vld [vmem:[%s5314_s5] ss:$0 sm:$0xff] }
  0xfc   :  { %3801 = vpow2.f32 %v3335_v1 }
  0xfd   :  { %3803 = vpow2.f32 %v3336_v4 }
  0xff   :  { %v879_v5 = vpop.f32.mrf.mxu2 }
 0x100   :  { %v892_v9 = vpop.f32.mrf.mxu3  ;;  %v4591_v18 = vpop.f32.mrf.mxu1 }
 0x102   :  { %v3802_v25 = vpop.eup %3801 }
 0x103   :  { %v3804_v3 = vpop.eup %3803  ;;  %v911_v57 = vadd.f32 1.0, %v3802_v25 }
 0x104   :  { %v931_v56 = vadd.f32 1.0, %v3804_v3 }
 0x105   :  { %3805 = vrcp.f32 %v911_v57  ;;  %v923_v5 = vand.u32 2147483648, %v911_v57  ;;  %v921_v3 = vand.u32 2147483647, %v911_v57  ;;  %vm917_vm1 = vweird.f32 %v911_v57 }
 0x106   :  { %3807 = vrcp.f32 %v931_v56  ;;  %vm937_vm4 = vweird.f32 %v931_v56 }
 0x107   :  { %v903_v47 = vpop.f32.mrf.mxu2  ;;  %v924_v39 = vor.u32 1.1754944e-38, %v923_v5  ;;  %vm922_vm3 = vcmp.eq.f32.partialorder %v921_v3, 8.507059e+37 }
 0x108   :  { %v947_v44 = vadd.f32 %v4586_v0, %v903_v47  ;;  %v4597_v3 = vpop.f32.mrf.mxu1 }
 0x10b   :  { %v3806_v53 = vpop.eup %3805 }
 0x10c   :  { %v3808_v55 = vpop.eup %3807  ;;  %v913_v59 = vmul.f32 %v3806_v53, %v911_v57  ;;  %vm918_vm0 = vweird.f32 %v3806_v53  ;;  %v941_v57 = vand.u32 2147483647, %v931_v56 }
 0x10d   :  { %v933_v60 = vmul.f32 %v3808_v55, %v931_v56  ;;  %vm919_vm2 = vmor %vm917_vm1, %vm918_vm0  ;;  %vm938_vm5 = vweird.f32 %v3808_v55 }
 0x10e   :  { %v914_v1 = vsub.f32 1.0, %v913_v59  ;;  %vm939_vm6 = vmor %vm937_vm4, %vm938_vm5  ;;  %vm942_vm7 = vcmp.eq.f32.partialorder %v941_v57, 8.507059e+37 }
 0x10f   :  { %v934_v4 = vsub.f32 1.0, %v933_v60  ;;  %v905_v9 = vpop.f32.mrf.mxu2 }
 0x110   :  { %v915_v25 = vmul.f32 %v3806_v53, %v914_v1  ;;  %v367_v1 = vadd.f32 %v4485_v26, %v4497_v8 }
 0x111   :  { %v935_v37 = vmul.f32 %v3808_v55, %v934_v4  ;;  %v943_v4 = vand.u32 2147483648, %v931_v56  ;;  %v4605_v56 = vpop.f32.mrf.mxu1 }
 0x112   :  { %v916_v32 = vadd.f32 %v3806_v53, %v915_v25 }
 0x113   :  { %v936_v59 = vadd.f32 %v3808_v55, %v935_v37  ;;  %v944_v5 = vor.u32 1.1754944e-38, %v943_v4  ;;  %v4640_v4 = vperm.slane %v4480_v13, 2 }
 0x114   :  { %v920_v22 = vsel %vm919_vm2, %v3806_v53, %v916_v32  ;;  %v4595_v53 = vpop.f32.mrf.mxu0 }
 0x115   :  { %v925_v60 = vsel %vm922_vm3, %v924_v39, %v920_v22  ;;  %v940_v25 = vsel %vm939_vm6, %v3808_v55, %v936_v59  ;;  %5346 = vst [vmem:[#allocation29_spill] sm:$0xff] %v4640_v4 }
 0x116   :  { %v948_v9 = vmul.f32 %v947_v44, %v925_v60  ;;  %v945_v32 = vsel %vm942_vm7, %v944_v5, %v940_v25 }
 0x117   :  { %v951_v37 = vsub.f32 1.0, %v945_v32  ;;  %v953_v39 = vmul.f32 0.0, %v945_v32 }
 0x118   :  { %v949_v47 = vadd.f32 %v948_v9, %v367_v1  ;;  %v4637_v1 = vperm.slane %v4480_v13, 1 }
 0x119   :  { %v4618_v55 = vpop.f32.mrf.mxu1 }
 0x11a   :  { %3809 = vtanh.f32 %v949_v47  ;;  %5345 = vst [vmem:[#allocation28_spill] sm:$0xff] %v4637_v1 }
 0x11c   :  { %v4603_v44 = vpop.f32.mrf.mxu0 }
 0x120   :  { %v3810_v51 = vpop.eup %3809 }
 0x121   :  { %v952_v22 = vmul.f32 %v3810_v51, %v951_v37  ;;  %v4628_v60 = vpop.f32.mrf.mxu1 }
 0x122   :  { %5344 = vst [vmem:[#allocation27_spill] sm:$0xff] %v4628_v60 }
 0x123   :  { %v4599_v21 = vadd.f32 %v953_v39, %v952_v22 }
 0x124   :  { %v4614_v51 = vpop.f32.mrf.mxu0 }
 0x125   :  { %v960_v26 = vpack.c.bf16 %v4599_v21, %v4599_v21 }
 0x127   :  { %969 = vmatmul.bf16.vlgmr.msra.gmra.mxu3 %v960_v26  ;;  %982 = vmatmul.bf16.vlgmr.msra.gmra.mxu0 %v960_v26 }
 0x128   :  { %995 = vmatmul.bf16.vlgmr.msra.gmra.mxu1 %v960_v26  ;;  %1175 = vmatpush.bf16.msra.mxu3 %v4384_v38 }
 0x129   :  { %1243 = vmatpush.bf16.msra.mxu0 %v4241_v63  ;;  %1256 = vmatpush.bf16.msra.mxu1 %v4243_v2  ;;  %v657_v47 = vpop.f32.mrf.mxu1 }
 0x12a   :  { %v4649_v25 = vadd.f32 %v657_v47, %v4640_v4 }
 0x12c   :  { %1176 = vmatpush.bf16.msra.mxu3 %v4399_v52  ;;  %v4626_v59 = vpop.f32.mrf.mxu0  ;;  %5348 = vst [vmem:[#allocation31_spill] sm:$0xff] %v4649_v25 }
 0x12d   :  { %1244 = vmatpush.bf16.msra.mxu0 %v4250_v7  ;;  %1257 = vmatpush.bf16.msra.mxu1 %v4253_v10  ;;  %5343 = vst [vmem:[#allocation26_spill] sm:$0xff] %v4626_v59 }
 0x130   :  { %1177 = vmatpush.bf16.msra.mxu3 %v4409_v62 }
 0x131   :  { %1245 = vmatpush.bf16.msra.mxu0 %v4264_v19  ;;  %1258 = vmatpush.bf16.msra.mxu1 %v4273_v23  ;;  %v4653_v32 = vpop.f32.mrf.mxu1 }
 0x132   :  { %5350 = vst [vmem:[#allocation33_spill] sm:$0xff] %v4653_v32 }
 0x134   :  { %1178 = vmatpush.bf16.msra.mxu3 %v4421_v12  ;;  %v628_v9 = vpop.f32.mrf.mxu0 }
 0x135   :  { %1246 = vmatpush.bf16.msra.mxu0 %v4297_v35  ;;  %1259 = vmatpush.bf16.msra.mxu1 %v4303_v40  ;;  %v4646_v57 = vadd.f32 %v628_v9, %v4637_v1 }
 0x137   :  { %5347 = vst [vmem:[#allocation30_spill] sm:$0xff] %v4646_v57 }
 0x138   :  { %1179 = vmatpush.bf16.msra.mxu3 %v4426_v17 }
 0x139   :  { %1247 = vmatpush.bf16.msra.mxu0 %v4318_v50  ;;  %1260 = vmatpush.bf16.msra.mxu1 %v4321_v54  ;;  %v662_v22 = vpop.f32.mrf.mxu1 }
 0x13a   :  { %v4659_v39 = vadd.f32 %v662_v22, %v4640_v4 }
 0x13c   :  { %1180 = vmatpush.bf16.msra.mxu3 %v4430_v24  ;;  %v4651_v5 = vpop.f32.mrf.mxu0  ;;  %5352 = vst [vmem:[#allocation35_spill] sm:$0xff] %v4659_v39 }
 0x13d   :  { %1248 = vmatpush.bf16.msra.mxu0 %v4328_v58  ;;  %1261 = vmatpush.bf16.msra.mxu1 %v4348_v15  ;;  %5349 = vst [vmem:[#allocation32_spill] sm:$0xff] %v4651_v5 }
 0x140   :  { %1181 = vmatpush.bf16.msra.mxu3 %v4437_v28 }
 0x141   :  { %1249 = vmatpush.bf16.msra.mxu0 %v4346_v14  ;;  %1262 = vmatpush.bf16.msra.mxu1 %v4386_v41  ;;  %v4663_v9 = vpop.f32.mrf.mxu1 }
 0x142   :  { %5354 = vst [vmem:[#allocation37_spill] sm:$0xff] %v4663_v9 }
 0x144   :  { %1182 = vmatpush.bf16.msra.mxu3 %v4442_v36  ;;  %v633_v13 = vpop.f32.mrf.mxu0 }
 0x145   :  { %1250 = vmatpush.bf16.msra.mxu0 %v4382_v34  ;;  %1263 = vmatpush.bf16.msra.mxu1 %v4395_v49  ;;  %v4656_v37 = vadd.f32 %v633_v13, %v4637_v1 }
 0x147   :  { %5351 = vst [vmem:[#allocation34_spill] sm:$0xff] %v4656_v37 }
 0x149   :  { %v667_v30 = vpop.f32.mrf.mxu1 }
 0x14a   :  { %v4669_v5 = vadd.f32 %v667_v30, %v4640_v4  ;;  %v340_v30 = vadd.f32 %v4577_v27, %v4561_v45 }
 0x14c   :  { %v4661_v26 = vpop.f32.mrf.mxu0  ;;  %5356 = vst [vmem:[#allocation39_spill] sm:$0xff] %v4669_v5 }
 0x14d   :  { %5353 = vst [vmem:[#allocation36_spill] sm:$0xff] %v4661_v26 }
 0x151   :  { %v4673_v13 = vpop.f32.mrf.mxu1 }
 0x152   :  { %5358 = vst [vmem:[#allocation41_spill] sm:$0xff] %v4673_v13  ;;  %v311_v13 = vadd.f32 %v4575_v16, %v4556_v43 }
 0x154   :  { %v638_v57 = vpop.f32.mrf.mxu0 }
 0x155   :  { %v4666_v47 = vadd.f32 %v638_v57, %v4637_v1 }
 0x157   :  { %5355 = vst [vmem:[#allocation38_spill] sm:$0xff] %v4666_v47 }
 0x159   :  { %v672_v39 = vpop.f32.mrf.mxu1 }
 0x15a   :  { %v4679_v26 = vadd.f32 %v672_v39, %v4640_v4 }
 0x15c   :  { %v4671_v32 = vpop.f32.mrf.mxu0  ;;  %5360 = vst [vmem:[#allocation43_spill] sm:$0xff] %v4679_v26 }
 0x15d   :  { %5357 = vst [vmem:[#allocation40_spill] sm:$0xff] %v4671_v32 }
 0x161   :  { %v4683_v57 = vpop.f32.mrf.mxu1 }
 0x162   :  { %5362 = vst [vmem:[#allocation45_spill] sm:$0xff] %v4683_v57 }
 0x164   :  { %v643_v37 = vpop.f32.mrf.mxu0 }
 0x165   :  { %v4676_v22 = vadd.f32 %v643_v37, %v4637_v1 }
 0x167   :  { %5359 = vst [vmem:[#allocation42_spill] sm:$0xff] %v4676_v22 }
 0x16c   :  { %v4681_v9 = vpop.f32.mrf.mxu0 }
 0x16d   :  { %5361 = vst [vmem:[#allocation44_spill] sm:$0xff] %v4681_v9 }
 0x1a4   :  { %v983_v47 = vpop.f32.mrf.mxu0 }
 0x1a5   :  { %v1020_v5 = vadd.f32 %v983_v47, %v340_v30  ;;  %v996_v32 = vpop.f32.mrf.mxu1 }
 0x1a7   :  { %v3338_v25 = vmul.f32 -1.442695, %v1020_v5 }
 0x1a9   :  { %3811 = vpow2.f32 %v3338_v25 }
 0x1aa   :  { %v970_v37 = vpop.f32.mrf.mxu3 }
 0x1ab   :  { %v1000_v22 = vadd.f32 %v970_v37, %v311_v13 }
 0x1ac   :  { %v985_v1 = vpop.f32.mrf.mxu0 }
 0x1ad   :  { %v3337_v39 = vmul.f32 -1.442695, %v1000_v22  ;;  %v998_v26 = vpop.f32.mrf.mxu1  ;;  %v1040_v22 = vadd.f32 %v4586_v0, %v996_v32 }
 0x1af   :  { %v3812_v4 = vpop.eup %3811  ;;  %3813 = vpow2.f32 %v3337_v39  ;;  %v369_v39 = vadd.f32 %v4490_v46, %v4497_v8 }
 0x1b0   :  { %v1024_v9 = vadd.f32 1.0, %v3812_v4 }
 0x1b2   :  { %v972_v57 = vpop.f32.mrf.mxu3  ;;  %3815 = vrcp.f32 %v1024_v9  ;;  %vm1030_vm13 = vweird.f32 %v1024_v9 }
 0x1b5   :  { %v3814_v42 = vpop.eup %3813 }
 0x1b6   :  { %v1004_v27 = vadd.f32 1.0, %v3814_v42 }
 0x1b8   :  { %3817 = vrcp.f32 %v1004_v27  ;;  %v3816_v47 = vpop.eup %3815  ;;  %v1016_v25 = vand.u32 2147483648, %v1004_v27  ;;  %v1014_v1 = vand.u32 2147483647, %v1004_v27  ;;  %vm1010_vm9 = vweird.f32 %v1004_v27 }
 0x1b9   :  { %v1026_v30 = vmul.f32 %v3816_v47, %v1024_v9  ;;  %vm1031_vm12 = vweird.f32 %v3816_v47 }
 0x1ba   :  { %v1017_v4 = vor.u32 1.1754944e-38, %v1016_v25  ;;  %vm1015_vm11 = vcmp.eq.f32.partialorder %v1014_v1, 8.507059e+37  ;;  %vm1032_vm14 = vmor %vm1030_vm13, %vm1031_vm12 }
 0x1bb   :  { %v1027_v59 = vsub.f32 1.0, %v1026_v30 }
 0x1bd   :  { %v1028_v13 = vmul.f32 %v3816_v47, %v1027_v59 }
 0x1be   :  { %v3818_v5 = vpop.eup %3817 }
 0x1bf   :  { %v1006_v60 = vmul.f32 %v3818_v5, %v1004_v27  ;;  %vm1011_vm8 = vweird.f32 %v3818_v5  ;;  %v1029_v42 = vadd.f32 %v3816_v47, %v1028_v13 }
 0x1c0   :  { %vm1012_vm10 = vmor %vm1010_vm9, %vm1011_vm8 }
 0x1c1   :  { %v1007_v16 = vsub.f32 1.0, %v1006_v60  ;;  %v1036_v60 = vand.u32 2147483648, %v1024_v9 }
 0x1c3   :  { %v1008_v33 = vmul.f32 %v3818_v5, %v1007_v16  ;;  %v1034_v16 = vand.u32 2147483647, %v1024_v9  ;;  %v1037_v27 = vor.u32 1.1754944e-38, %v1036_v60 }
 0x1c5   :  { %v1009_v26 = vadd.f32 %v3818_v5, %v1008_v33  ;;  %v1033_v33 = vsel %vm1032_vm14, %v3816_v47, %v1029_v42  ;;  %vm1035_vm15 = vcmp.eq.f32.partialorder %v1034_v16, 8.507059e+37  ;;  %v314_v47 = vadd.f32 %v4579_v48, %v4556_v43 }
 0x1c6   :  { %v1038_v25 = vsel %vm1035_vm15, %v1037_v27, %v1033_v33 }
 0x1c7   :  { %v1013_v57 = vsel %vm1012_vm10, %v3818_v5, %v1009_v26  ;;  %v1044_v32 = vsub.f32 1.0, %v1038_v25  ;;  %v1046_v13 = vmul.f32 %v1038_v25, %v4599_v21 }
 0x1c8   :  { %v1018_v37 = vsel %vm1015_vm11, %v1017_v4, %v1013_v57  ;;  %v343_v4 = vadd.f32 %v4581_v61, %v4561_v45 }
 0x1c9   :  { %v1041_v30 = vmul.f32 %v1040_v22, %v1018_v37 }
 0x1cb   :  { %v1042_v59 = vadd.f32 %v1041_v30, %v369_v39 }
 0x1cd   :  { %3819 = vtanh.f32 %v1042_v59 }
 0x1d3   :  { %v3820_v5 = vpop.eup %3819 }
 0x1d4   :  { %v1045_v1 = vmul.f32 %v3820_v5, %v1044_v32 }
 0x1d6   :  { %v4693_v26 = vadd.f32 %v1046_v13, %v1045_v1 }
 0x1d8   :  { %v1054_v46 = vpack.c.bf16 %v4693_v26, %v4693_v26 }
 0x1da   :  { %1063 = vmatmul.bf16.vlgmr.msrb.gmra.mxu2 %v1054_v46  ;;  %1076 = vmatmul.bf16.vlgmr.msrb.gmra.mxu3 %v1054_v46 }
 0x1db   :  { %1089 = vmatmul.bf16.vlgmr.msrb.gmra.mxu0 %v1054_v46  ;;  %1269 = vmatpush.bf16.msrb.mxu2 %v4384_v38 }
 0x1dc   :  { %1337 = vmatpush.bf16.msrb.mxu3 %v4241_v63  ;;  %1350 = vmatpush.bf16.msrb.mxu0 %v4243_v2 }
 0x1df   :  { %1270 = vmatpush.bf16.msrb.mxu2 %v4399_v52 }
 0x1e0   :  { %1338 = vmatpush.bf16.msrb.mxu3 %v4250_v7  ;;  %1351 = vmatpush.bf16.msrb.mxu0 %v4253_v10 }
 0x1e3   :  { %1271 = vmatpush.bf16.msrb.mxu2 %v4409_v62 }
 0x1e4   :  { %1339 = vmatpush.bf16.msrb.mxu3 %v4264_v19  ;;  %1352 = vmatpush.bf16.msrb.mxu0 %v4273_v23 }
 0x1e7   :  { %1272 = vmatpush.bf16.msrb.mxu2 %v4421_v12 }
 0x1e8   :  { %1340 = vmatpush.bf16.msrb.mxu3 %v4297_v35  ;;  %1353 = vmatpush.bf16.msrb.mxu0 %v4303_v40 }
 0x1eb   :  { %1273 = vmatpush.bf16.msrb.mxu2 %v4426_v17 }
 0x1ec   :  { %1341 = vmatpush.bf16.msrb.mxu3 %v4318_v50  ;;  %1354 = vmatpush.bf16.msrb.mxu0 %v4321_v54 }
 0x1ef   :  { %1274 = vmatpush.bf16.msrb.mxu2 %v4430_v24 }
 0x1f0   :  { %1342 = vmatpush.bf16.msrb.mxu3 %v4328_v58  ;;  %1355 = vmatpush.bf16.msrb.mxu0 %v4348_v15 }
 0x1f3   :  { %1275 = vmatpush.bf16.msrb.mxu2 %v4437_v28 }
 0x1f4   :  { %1343 = vmatpush.bf16.msrb.mxu3 %v4346_v14  ;;  %1356 = vmatpush.bf16.msrb.mxu0 %v4386_v41 }
 0x1f7   :  { %1276 = vmatpush.bf16.msrb.mxu2 %v4442_v36 }
 0x1f8   :  { %1344 = vmatpush.bf16.msrb.mxu3 %v4382_v34  ;;  %1357 = vmatpush.bf16.msrb.mxu0 %v4395_v49 }
 0x258   :  { %v1090_v9 = vpop.f32.mrf.mxu0 }
 0x25d   :  { %v1064_v22 = vpop.f32.mrf.mxu2  ;;  %v1077_v57 = vpop.f32.mrf.mxu3 }
 0x25e   :  { %v1094_v42 = vadd.f32 %v1064_v22, %v314_v47  ;;  %v1114_v37 = vadd.f32 %v1077_v57, %v343_v4 }
 0x260   :  { %v3339_v39 = vmul.f32 -1.442695, %v1094_v42  ;;  %v3340_v60 = vmul.f32 -1.442695, %v1114_v37  ;;  %v1092_v30 = vpop.f32.mrf.mxu0 }
 0x262   :  { %3821 = vpow2.f32 %v3339_v39  ;;  %v1134_v39 = vadd.f32 %v4586_v0, %v1090_v9 }
 0x263   :  { %3823 = vpow2.f32 %v3340_v60 }
 0x265   :  { %v1066_v16 = vpop.f32.mrf.mxu2  ;;  %v1079_v59 = vpop.f32.mrf.mxu3 }
 0x268   :  { %v3822_v33 = vpop.eup %3821 }
 0x269   :  { %v3824_v27 = vpop.eup %3823  ;;  %v1098_v25 = vadd.f32 1.0, %v3822_v33 }
 0x26a   :  { %v1118_v32 = vadd.f32 1.0, %v3824_v27 }
 0x26b   :  { %3825 = vrcp.f32 %v1098_v25  ;;  %v1110_v46 = vand.u32 2147483648, %v1098_v25  ;;  %v1108_v22 = vand.u32 2147483647, %v1098_v25  ;;  %vm1104_vm1 = vweird.f32 %v1098_v25 }
 0x26c   :  { %3827 = vrcp.f32 %v1118_v32  ;;  %v1130_v33 = vand.u32 2147483648, %v1118_v32  ;;  %vm1124_vm5 = vweird.f32 %v1118_v32  ;;  %v1128_v27 = vand.u32 2147483647, %v1118_v32 }
 0x26d   :  { %v1111_v37 = vor.u32 1.1754944e-38, %v1110_v46  ;;  %vm1109_vm3 = vcmp.eq.f32.partialorder %v1108_v22, 8.507059e+37 }
 0x26e   :  { %vm1129_vm7 = vcmp.eq.f32.partialorder %v1128_v27, 8.507059e+37 }
 0x271   :  { %v3826_v48 = vpop.eup %3825 }
 0x272   :  { %v3828_v5 = vpop.eup %3827  ;;  %v1100_v61 = vmul.f32 %v3826_v48, %v1098_v25  ;;  %vm1105_vm0 = vweird.f32 %v3826_v48 }
 0x273   :  { %v1120_v1 = vmul.f32 %v3828_v5, %v1118_v32  ;;  %vm1106_vm2 = vmor %vm1104_vm1, %vm1105_vm0  ;;  %vm1125_vm4 = vweird.f32 %v3828_v5 }
 0x274   :  { %v1101_v13 = vsub.f32 1.0, %v1100_v61  ;;  %vm1126_vm6 = vmor %vm1124_vm5, %vm1125_vm4 }
 0x275   :  { %v1121_v47 = vsub.f32 1.0, %v1120_v1 }
 0x276   :  { %v1102_v4 = vmul.f32 %v3826_v48, %v1101_v13  ;;  %v1131_v13 = vor.u32 1.1754944e-38, %v1130_v33 }
 0x277   :  { %v1122_v57 = vmul.f32 %v3828_v5, %v1121_v47 }
 0x278   :  { %v1103_v42 = vadd.f32 %v3826_v48, %v1102_v4 }
 0x279   :  { %v1123_v16 = vadd.f32 %v3828_v5, %v1122_v57 }
 0x27a   :  { %v1107_v60 = vsel %vm1106_vm2, %v3826_v48, %v1103_v42  ;;  %v345_v42 = vadd.f32 %v4591_v18, %v4561_v45 }
 0x27b   :  { %v1112_v30 = vsel %vm1109_vm3, %v1111_v37, %v1107_v60  ;;  %v1127_v1 = vsel %vm1126_vm6, %v3828_v5, %v1123_v16 }
 0x27c   :  { %v1135_v59 = vmul.f32 %v1134_v39, %v1112_v30  ;;  %v1132_v25 = vsel %vm1129_vm7, %v1131_v13, %v1127_v1 }
 0x27d   :  { %v1138_v46 = vsub.f32 1.0, %v1132_v25  ;;  %v1140_v48 = vmul.f32 %v1132_v25, %v4693_v26 }
 0x27e   :  { %v1136_v61 = vadd.f32 %v1135_v59, %v4502_v11  ;;  %v316_v11 = vadd.f32 %v4589_v29, %v4556_v43 }
 0x280   :  { %3829 = vtanh.f32 %v1136_v61 }
 0x286   :  { %v3830_v47 = vpop.eup %3829 }
 0x287   :  { %v1139_v9 = vmul.f32 %v3830_v47, %v1138_v46 }
 0x289   :  { %v4728_v4 = vadd.f32 %v1140_v48, %v1139_v9 }
 0x28b   :  { %v1148_v22 = vpack.c.bf16 %v4728_v4, %v4728_v4 }
 0x28d   :  { %1157 = vmatmul.bf16.vlgmr.msrb.gmra.mxu1 %v1148_v22  ;;  %1170 = vmatmul.bf16.vlgmr.msra.gmra.mxu2 %v1148_v22 }
 0x28e   :  { %1183 = vmatmul.bf16.vlgmr.msra.gmra.mxu3 %v1148_v22  ;;  %1363 = vmatpush.bf16.msrb.mxu1 %v4384_v38 }
 0x28f   :  { %1431 = vmatpush.bf16.msra.mxu2 %v4241_v63  ;;  %1444 = vmatpush.bf16.msra.mxu3 %v4243_v2 }
 0x292   :  { %1364 = vmatpush.bf16.msrb.mxu1 %v4399_v52 }
 0x293   :  { %1432 = vmatpush.bf16.msra.mxu2 %v4250_v7  ;;  %1445 = vmatpush.bf16.msra.mxu3 %v4253_v10 }
 0x296   :  { %1365 = vmatpush.bf16.msrb.mxu1 %v4409_v62 }
 0x297   :  { %1433 = vmatpush.bf16.msra.mxu2 %v4264_v19  ;;  %1446 = vmatpush.bf16.msra.mxu3 %v4273_v23 }
 0x29a   :  { %1366 = vmatpush.bf16.msrb.mxu1 %v4421_v12 }
 0x29b   :  { %1434 = vmatpush.bf16.msra.mxu2 %v4297_v35  ;;  %1447 = vmatpush.bf16.msra.mxu3 %v4303_v40 }
 0x29e   :  { %1367 = vmatpush.bf16.msrb.mxu1 %v4426_v17 }
 0x29f   :  { %1435 = vmatpush.bf16.msra.mxu2 %v4318_v50  ;;  %1448 = vmatpush.bf16.msra.mxu3 %v4321_v54 }
 0x2a2   :  { %1368 = vmatpush.bf16.msrb.mxu1 %v4430_v24 }
 0x2a3   :  { %1436 = vmatpush.bf16.msra.mxu2 %v4328_v58  ;;  %1449 = vmatpush.bf16.msra.mxu3 %v4348_v15 }
 0x2a6   :  { %1369 = vmatpush.bf16.msrb.mxu1 %v4437_v28 }
 0x2a7   :  { %1437 = vmatpush.bf16.msra.mxu2 %v4346_v14  ;;  %1450 = vmatpush.bf16.msra.mxu3 %v4386_v41 }
 0x2aa   :  { %1370 = vmatpush.bf16.msrb.mxu1 %v4442_v36 }
 0x2ab   :  { %1438 = vmatpush.bf16.msra.mxu2 %v4382_v34  ;;  %1451 = vmatpush.bf16.msra.mxu3 %v4395_v49 }
 0x30a   :  { %v1158_v32 = vpop.f32.mrf.mxu1 }
 0x30b   :  { %v1188_v5 = vadd.f32 %v1158_v32, %v316_v11 }
 0x30d   :  { %v3341_v57 = vmul.f32 -1.442695, %v1188_v5 }
 0x30f   :  { %3831 = vpow2.f32 %v3341_v57 }
 0x310   :  { %v1171_v37 = vpop.f32.mrf.mxu2 }
 0x311   :  { %v1208_v39 = vadd.f32 %v1171_v37, %v345_v42  ;;  %v1184_v60 = vpop.f32.mrf.mxu3  ;;  %v374_v37 = vadd.f32 %v4512_v20, %v4497_v8 }
 0x312   :  { %v1160_v30 = vpop.f32.mrf.mxu1  ;;  %v1228_v42 = vadd.f32 %v4586_v0, %v1184_v60 }
 0x313   :  { %v3342_v16 = vmul.f32 -1.442695, %v1208_v39 }
 0x315   :  { %v3832_v59 = vpop.eup %3831  ;;  %3833 = vpow2.f32 %v3342_v16 }
 0x316   :  { %v1192_v33 = vadd.f32 1.0, %v3832_v59 }
 0x318   :  { %3835 = vrcp.f32 %v1192_v33  ;;  %v1173_v27 = vpop.f32.mrf.mxu2  ;;  %v1204_v47 = vand.u32 2147483648, %v1192_v33  ;;  %v1202_v9 = vand.u32 2147483647, %v1192_v33  ;;  %vm1198_vm9 = vweird.f32 %v1192_v33 }
 0x319   :  { %v1186_v61 = vpop.f32.mrf.mxu3 }
 0x31a   :  { %v1205_v32 = vor.u32 1.1754944e-38, %v1204_v47  ;;  %vm1203_vm11 = vcmp.eq.f32.partialorder %v1202_v9, 8.507059e+37 }
 0x31b   :  { %v3834_v1 = vpop.eup %3833 }
 0x31c   :  { %v1212_v29 = vadd.f32 1.0, %v3834_v1 }
 0x31e   :  { %v3836_v13 = vpop.eup %3835  ;;  %3837 = vrcp.f32 %v1212_v29  ;;  %v1224_v16 = vand.u32 2147483648, %v1212_v29  ;;  %v1222_v27 = vand.u32 2147483647, %v1212_v29  ;;  %vm1218_vm13 = vweird.f32 %v1212_v29 }
 0x31f   :  { %v1194_v25 = vmul.f32 %v3836_v13, %v1192_v33  ;;  %vm1199_vm8 = vweird.f32 %v3836_v13 }
 0x320   :  { %vm1200_vm10 = vmor %vm1198_vm9, %vm1199_vm8  ;;  %v1225_v33 = vor.u32 1.1754944e-38, %v1224_v16  ;;  %vm1223_vm15 = vcmp.eq.f32.partialorder %v1222_v27, 8.507059e+37 }
 0x321   :  { %v1195_v46 = vsub.f32 1.0, %v1194_v25 }
 0x323   :  { %v1196_v18 = vmul.f32 %v3836_v13, %v1195_v46 }
 0x324   :  { %v3838_v48 = vpop.eup %3837 }
 0x325   :  { %v1214_v22 = vmul.f32 %v3838_v48, %v1212_v29  ;;  %v1197_v11 = vadd.f32 %v3836_v13, %v1196_v18  ;;  %vm1219_vm12 = vweird.f32 %v3838_v48 }
 0x326   :  { %vm1220_vm14 = vmor %vm1218_vm13, %vm1219_vm12 }
 0x327   :  { %v1215_v5 = vsub.f32 1.0, %v1214_v22  ;;  %v1201_v57 = vsel %vm1200_vm10, %v3836_v13, %v1197_v11 }
 0x328   :  { %v1206_v39 = vsel %vm1203_vm11, %v1205_v32, %v1201_v57 }
 0x329   :  { %v1216_v30 = vmul.f32 %v3838_v48, %v1215_v5  ;;  %v1229_v59 = vmul.f32 %v1228_v42, %v1206_v39 }
 0x32b   :  { %v1217_v61 = vadd.f32 %v3838_v48, %v1216_v30  ;;  %v1230_v1 = vadd.f32 %v1229_v59, %v374_v37 }
 0x32d   :  { %v1221_v25 = vsel %vm1220_vm14, %v3838_v48, %v1217_v61  ;;  %3839 = vtanh.f32 %v1230_v1 }
 0x32e   :  { %v1226_v13 = vsel %vm1223_vm15, %v1225_v33, %v1221_v25 }
 0x32f   :  { %v1232_v46 = vsub.f32 1.0, %v1226_v13  ;;  %v1234_v20 = vmul.f32 %v1226_v13, %v4728_v4 }
 0x333   :  { %v3840_v60 = vpop.eup %3839 }
 0x334   :  { %v1233_v47 = vmul.f32 %v3840_v60, %v1232_v46 }
 0x336   :  { %v4764_v18 = vadd.f32 %v1234_v20, %v1233_v47 }
 0x338   :  { %v1242_v9 = vpack.c.bf16 %v4764_v18, %v4764_v18 }
 0x33a   :  { %1251 = vmatmul.bf16.vlgmr.msra.gmra.mxu0 %v1242_v9  ;;  %1264 = vmatmul.bf16.vlgmr.msra.gmra.mxu1 %v1242_v9 }
 0x33b   :  { %1277 = vmatmul.bf16.vlgmr.msrb.gmra.mxu2 %v1242_v9  ;;  %1457 = vmatpush.bf16.msra.mxu0 %v4384_v38 }
 0x33c   :  { %1525 = vmatpush.bf16.msra.mxu1 %v4241_v63  ;;  %1538 = vmatpush.bf16.msrb.mxu2 %v4243_v2  ;;  %v319_v63 = vadd.f32 %v4595_v53, %v4556_v43  ;;  %v348_v2 = vadd.f32 %v4597_v3, %v4561_v45 }
 0x33f   :  { %1458 = vmatpush.bf16.msra.mxu0 %v4399_v52 }
 0x340   :  { %1526 = vmatpush.bf16.msra.mxu1 %v4250_v7  ;;  %1539 = vmatpush.bf16.msrb.mxu2 %v4253_v10 }
 0x343   :  { %1459 = vmatpush.bf16.msra.mxu0 %v4409_v62 }
 0x344   :  { %1527 = vmatpush.bf16.msra.mxu1 %v4264_v19  ;;  %1540 = vmatpush.bf16.msrb.mxu2 %v4273_v23 }
 0x347   :  { %1460 = vmatpush.bf16.msra.mxu0 %v4421_v12 }
 0x348   :  { %1528 = vmatpush.bf16.msra.mxu1 %v4297_v35  ;;  %1541 = vmatpush.bf16.msrb.mxu2 %v4303_v40 }
 0x34b   :  { %1461 = vmatpush.bf16.msra.mxu0 %v4426_v17 }
 0x34c   :  { %1529 = vmatpush.bf16.msra.mxu1 %v4318_v50  ;;  %1542 = vmatpush.bf16.msrb.mxu2 %v4321_v54 }
 0x34f   :  { %1462 = vmatpush.bf16.msra.mxu0 %v4430_v24 }
 0x350   :  { %1530 = vmatpush.bf16.msra.mxu1 %v4328_v58  ;;  %1543 = vmatpush.bf16.msrb.mxu2 %v4348_v15 }
 0x353   :  { %1463 = vmatpush.bf16.msra.mxu0 %v4437_v28 }
 0x354   :  { %1531 = vmatpush.bf16.msra.mxu1 %v4346_v14  ;;  %1544 = vmatpush.bf16.msrb.mxu2 %v4386_v41 }
 0x357   :  { %1464 = vmatpush.bf16.msra.mxu0 %v4442_v36 }
 0x358   :  { %1532 = vmatpush.bf16.msra.mxu1 %v4382_v34  ;;  %1545 = vmatpush.bf16.msrb.mxu2 %v4395_v49 }
 0x3b7   :  { %v1252_v7 = vpop.f32.mrf.mxu0  ;;  %v1265_v10 = vpop.f32.mrf.mxu1 }
 0x3b8   :  { %v1282_v19 = vadd.f32 %v1252_v7, %v319_v63  ;;  %v1302_v23 = vadd.f32 %v1265_v10, %v348_v2 }
 0x3ba   :  { %v3343_v35 = vmul.f32 -1.442695, %v1282_v19  ;;  %v3344_v40 = vmul.f32 -1.442695, %v1302_v23 }
 0x3bc   :  { %3841 = vpow2.f32 %v3343_v35 }
 0x3bd   :  { %3843 = vpow2.f32 %v3344_v40 }
 0x3be   :  { %v1278_v50 = vpop.f32.mrf.mxu2 }
 0x3bf   :  { %v1254_v54 = vpop.f32.mrf.mxu0  ;;  %v1267_v58 = vpop.f32.mrf.mxu1  ;;  %v1322_v16 = vadd.f32 %v4586_v0, %v1278_v50 }
 0x3c2   :  { %v3842_v14 = vpop.eup %3841 }
 0x3c3   :  { %v3844_v15 = vpop.eup %3843  ;;  %v1286_v34 = vadd.f32 1.0, %v3842_v14 }
 0x3c4   :  { %v1306_v41 = vadd.f32 1.0, %v3844_v15 }
 0x3c5   :  { %3845 = vrcp.f32 %v1286_v34  ;;  %v1298_v32 = vand.u32 2147483648, %v1286_v34  ;;  %v1296_v57 = vand.u32 2147483647, %v1286_v34  ;;  %vm1292_vm1 = vweird.f32 %v1286_v34 }
 0x3c6   :  { %3847 = vrcp.f32 %v1306_v41  ;;  %v1280_v49 = vpop.f32.mrf.mxu2  ;;  %v1318_v61 = vand.u32 2147483648, %v1306_v41  ;;  %vm1312_vm5 = vweird.f32 %v1306_v41  ;;  %v1316_v33 = vand.u32 2147483647, %v1306_v41 }
 0x3c7   :  { %v1299_v39 = vor.u32 1.1754944e-38, %v1298_v32  ;;  %vm1297_vm3 = vcmp.eq.f32.partialorder %v1296_v57, 8.507059e+37  ;;  %v379_v57 = vadd.f32 %v4532_v31, %v4497_v8 }
 0x3c8   :  { %v1319_v46 = vor.u32 1.1754944e-38, %v1318_v61  ;;  %vm1317_vm7 = vcmp.eq.f32.partialorder %v1316_v33, 8.507059e+37 }
 0x3cb   :  { %v3846_v53 = vpop.eup %3845 }
 0x3cc   :  { %v3848_v3 = vpop.eup %3847  ;;  %v1288_v29 = vmul.f32 %v3846_v53, %v1286_v34  ;;  %vm1293_vm0 = vweird.f32 %v3846_v53 }
 0x3cd   :  { %v1308_v48 = vmul.f32 %v3848_v3, %v1306_v41  ;;  %vm1294_vm2 = vmor %vm1292_vm1, %vm1293_vm0  ;;  %vm1313_vm4 = vweird.f32 %v3848_v3 }
 0x3ce   :  { %v1289_v22 = vsub.f32 1.0, %v1288_v29  ;;  %vm1314_vm6 = vmor %vm1312_vm5, %vm1313_vm4 }
 0x3cf   :  { %v1309_v11 = vsub.f32 1.0, %v1308_v48 }
 0x3d0   :  { %v1290_v5 = vmul.f32 %v3846_v53, %v1289_v22 }
 0x3d1   :  { %v1310_v42 = vmul.f32 %v3848_v3, %v1309_v11 }
 0x3d2   :  { %v1291_v37 = vadd.f32 %v3846_v53, %v1290_v5 }
 0x3d3   :  { %v1311_v59 = vadd.f32 %v3848_v3, %v1310_v42 }
 0x3d4   :  { %v1295_v30 = vsel %vm1294_vm2, %v3846_v53, %v1291_v37 }
 0x3d5   :  { %v1300_v27 = vsel %vm1297_vm3, %v1299_v39, %v1295_v30  ;;  %v1315_v13 = vsel %vm1314_vm6, %v3848_v3, %v1311_v59 }
 0x3d6   :  { %v1323_v1 = vmul.f32 %v1322_v16, %v1300_v27  ;;  %v1320_v60 = vsel %vm1317_vm7, %v1319_v46, %v1315_v13  ;;  %v3702_v46 = vld [vmem:[%s5315_s6 + $0x38] sm:$0xff] }
 0x3d7   :  { %v1326_v47 = vsub.f32 1.0, %v1320_v60  ;;  %v1328_v63 = vmul.f32 %v1320_v60, %v4764_v18  ;;  %v324_v60 = vadd.f32 %v4614_v51, %v4556_v43 }
 0x3d8   :  { %v1324_v25 = vadd.f32 %v1323_v1, %v4522_v6  ;;  %v350_v6 = vadd.f32 %v4605_v56, %v4561_v45 }
 0x3da   :  { %3849 = vtanh.f32 %v1324_v25 }
 0x3e0   :  { %v3850_v20 = vpop.eup %3849 }
 0x3e1   :  { %v1327_v9 = vmul.f32 %v3850_v20, %v1326_v47  ;;  %v353_v47 = vadd.f32 %v4618_v55, %v4561_v45  ;;  %v3709_v55 = vld [vmem:[%s5316_s7 + $0x30] sm:$0xff] }
 0x3e3   :  { %v4799_v2 = vadd.f32 %v1328_v63, %v1327_v9  ;;  %v3710_v63 = vld [vmem:[%s5316_s7 + $0x38] sm:$0xff] }
 0x3e5   :  { %v1336_v7 = vpack.c.bf16 %v4799_v2, %v4799_v2 }
 0x3e7   :  { %1345 = vmatmul.bf16.vlgmr.msrb.gmra.mxu3 %v1336_v7  ;;  %1358 = vmatmul.bf16.vlgmr.msrb.gmra.mxu0 %v1336_v7 }
 0x3e8   :  { %1371 = vmatmul.bf16.vlgmr.msrb.gmra.mxu1 %v1336_v7  ;;  %1551 = vmatpush.bf16.msrb.mxu3 %v4384_v38 }
 0x3e9   :  { %1684 = vmatpush.bf16.msrb.mxu0 %v3702_v46  ;;  %1773 = vmatpush.bf16.msrb.mxu1 %v3710_v63 }
 0x3ec   :  { %1552 = vmatpush.bf16.msrb.mxu3 %v4399_v52  ;;  %v321_v52 = vadd.f32 %v4603_v44, %v4556_v43 }
 0x3ed   :  { %1774 = vmatpush.bf16.msrb.mxu1 %v3709_v55  ;;  %v3501_v55 = vld [vmem:[#allocation7 + $0xa8] sm:$0xf] }
 0x3f0   :  { %1553 = vmatpush.bf16.msrb.mxu3 %v4409_v62 }
 0x3f4   :  { %1554 = vmatpush.bf16.msrb.mxu3 %v4421_v12 }
 0x3f8   :  { %1555 = vmatpush.bf16.msrb.mxu3 %v4426_v17 }
 0x3fc   :  { %1556 = vmatpush.bf16.msrb.mxu3 %v4430_v24 }
 0x400   :  { %1557 = vmatpush.bf16.msrb.mxu3 %v4437_v28 }
 0x404   :  { %1558 = vmatpush.bf16.msrb.mxu3 %v4442_v36 }
 0x464   :  { %v1359_v10 = vpop.f32.mrf.mxu0 }
 0x465   :  { %v1396_v19 = vadd.f32 %v1359_v10, %v350_v6  ;;  %v1372_v38 = vpop.f32.mrf.mxu1  ;;  %v3701_v10 = vld [vmem:[%s5315_s6 + $0x30] sm:$0xff] }
 0x466   :  { %v1416_v22 = vadd.f32 %v4586_v0, %v1372_v38  ;;  %1685 = vmatpush.bf16.msrb.mxu0 %v3701_v10 }
 0x467   :  { %v3346_v23 = vmul.f32 -1.442695, %v1396_v19 }
 0x469   :  { %3851 = vpow2.f32 %v3346_v23  ;;  %v3700_v23 = vld [vmem:[%s5315_s6 + $0x28] sm:$0xff] }
 0x46a   :  { %v1346_v62 = vpop.f32.mrf.mxu3  ;;  %1686 = vmatpush.bf16.msrb.mxu0 %v3700_v23  ;;  %v3733_v23 = vld [vmem:[#allocation7 + $0xb0] sm:$0xf0] }
 0x46b   :  { %v1376_v12 = vadd.f32 %v1346_v62, %v321_v52  ;;  %v3708_v52 = vld [vmem:[%s5316_s7 + $0x28] sm:$0xff] }
 0x46c   :  { %v1361_v17 = vpop.f32.mrf.mxu0  ;;  %1775 = vmatpush.bf16.msrb.mxu1 %v3708_v52  ;;  %v3732_v52 = vld [vmem:[#allocation7 + $0xac] sm:$0xf] }
 0x46d   :  { %v3345_v35 = vmul.f32 -1.442695, %v1376_v12  ;;  %v1374_v24 = vpop.f32.mrf.mxu1  ;;  %v3699_v17 = vld [vmem:[%s5315_s6 + $0x20] sm:$0xff] }
 0x46e   :  { %1687 = vmatpush.bf16.msrb.mxu0 %v3699_v17  ;;  %v3509_v17 = vld [vmem:[#allocation7 + $0xb0] sm:$0xf] }
 0x46f   :  { %v3852_v40 = vpop.eup %3851  ;;  %3853 = vpow2.f32 %v3345_v35  ;;  %v3707_v35 = vld [vmem:[%s5316_s7 + $0x20] sm:$0xff] }
 0x470   :  { %v1400_v28 = vadd.f32 1.0, %v3852_v40  ;;  %1776 = vmatpush.bf16.msrb.mxu1 %v3707_v35  ;;  %v3734_v35 = vld [vmem:[#allocation7 + $0xb8] sm:$0xf0] }
 0x472   :  { %v1348_v36 = vpop.f32.mrf.mxu3  ;;  %3855 = vrcp.f32 %v1400_v28  ;;  %v1412_v42 = vand.u32 2147483648, %v1400_v28  ;;  %vm1406_vm13 = vweird.f32 %v1400_v28  ;;  %v1410_v39 = vand.u32 2147483647, %v1400_v28 }
 0x473   :  { %v3698_v36 = vld [vmem:[%s5315_s6 + $0x18] sm:$0xff] }
 0x474   :  { %v1413_v59 = vor.u32 1.1754944e-38, %v1412_v42  ;;  %vm1411_vm15 = vcmp.eq.f32.partialorder %v1410_v39, 8.507059e+37  ;;  %1688 = vmatpush.bf16.msrb.mxu0 %v3698_v36  ;;  %v3497_v36 = vld [vmem:[#allocation7 + $0x98] sm:$0xf] }
 0x475   :  { %v3854_v50 = vpop.eup %3853 }
 0x476   :  { %v1380_v56 = vadd.f32 1.0, %v3854_v50 }
 0x478   :  { %3857 = vrcp.f32 %v1380_v56  ;;  %v3856_v54 = vpop.eup %3855  ;;  %v1392_v41 = vand.u32 2147483648, %v1380_v56  ;;  %v1390_v53 = vand.u32 2147483647, %v1380_v56  ;;  %vm1386_vm9 = vweird.f32 %v1380_v56 }
 0x479   :  { %v1402_v58 = vmul.f32 %v3856_v54, %v1400_v28  ;;  %vm1407_vm12 = vweird.f32 %v3856_v54 }
 0x47a   :  { %v1393_v48 = vor.u32 1.1754944e-38, %v1392_v41  ;;  %vm1391_vm11 = vcmp.eq.f32.partialorder %v1390_v53, 8.507059e+37  ;;  %vm1408_vm14 = vmor %vm1406_vm13, %vm1407_vm12 }
 0x47b   :  { %v1403_v34 = vsub.f32 1.0, %v1402_v58  ;;  %v3705_v58 = vld [vmem:[%s5316_s7 + $0x10] sm:$0xff] }
 0x47d   :  { %v1404_v3 = vmul.f32 %v3856_v54, %v1403_v34 }
 0x47e   :  { %v3858_v14 = vpop.eup %3857 }
 0x47f   :  { %v1382_v15 = vmul.f32 %v3858_v14, %v1380_v56  ;;  %vm1387_vm8 = vweird.f32 %v3858_v14  ;;  %v1405_v32 = vadd.f32 %v3856_v54, %v1404_v3  ;;  %v3706_v56 = vld [vmem:[%s5316_s7 + $0x18] sm:$0xff] }
 0x480   :  { %vm1388_vm10 = vmor %vm1386_vm9, %vm1387_vm8  ;;  %1777 = vmatpush.bf16.msrb.mxu1 %v3706_v56  ;;  %v3477_v56 = vld [vmem:[#allocation7 + $0x78] sm:$0xf] }
 0x481   :  { %v1383_v44 = vsub.f32 1.0, %v1382_v15  ;;  %v1409_v16 = vsel %vm1408_vm14, %v3856_v54, %v1405_v32  ;;  %v3697_v54 = vld [vmem:[%s5315_s6 + $0x10] sm:$0xff]  ;;  %v3696_v15 = vld [vmem:[%s5315_s6 + $0x8] sm:$0xff] }
 0x482   :  { %v1414_v27 = vsel %vm1411_vm15, %v1413_v59, %v1409_v16  ;;  %1689 = vmatpush.bf16.msrb.mxu0 %v3697_v54  ;;  %v3727_v54 = vld [vmem:[#allocation7 + $0x80] sm:$0xf0] }
 0x483   :  { %v1384_v49 = vmul.f32 %v3858_v14, %v1383_v44  ;;  %v1420_v0 = vsub.f32 1.0, %v1414_v27  ;;  %v1422_v33 = vmul.f32 %v1414_v27, %v4799_v2 }
 0x484   :  { %1778 = vmatpush.bf16.msrb.mxu1 %v3705_v58  ;;  %v3726_v58 = vld [vmem:[#allocation7 + $0x7c] sm:$0xf] }
 0x485   :  { %v1385_v29 = vadd.f32 %v3858_v14, %v1384_v49  ;;  %v3704_v49 = vld [vmem:[%s5316_s7 + $0x8] sm:$0xff] }
 0x486   :  { %1690 = vmatpush.bf16.msrb.mxu0 %v3696_v15  ;;  %v3479_v15 = vld [vmem:[#allocation7 + $0x84] sm:$0xf0] }
 0x487   :  { %v1389_v11 = vsel %vm1388_vm10, %v3858_v14, %v1385_v29 }
 0x488   :  { %v1394_v5 = vsel %vm1391_vm11, %v1393_v48, %v1389_v11  ;;  %v3695_v48 = vld [vmem:[%s5315_s6] sm:$0xff]  ;;  %1779 = vmatpush.bf16.msrb.mxu1 %v3704_v49 }
 0x489   :  { %v1417_v37 = vmul.f32 %v1416_v22, %v1394_v5  ;;  %v1614_v22 = vld [vmem:[%s5310_s1] sm:$0xff] }
 0x48a   :  { %1691 = vmatpush.bf16.msrb.mxu0 %v3695_v48  ;;  %v3723_v48 = vld [vmem:[#allocation7 + $0x64] sm:$0xf] }
 0x48b   :  { %v1418_v30 = vadd.f32 %v1417_v37, %v379_v57  ;;  %v3703_v57 = vld [vmem:[%s5316_s7] sm:$0xff]  ;;  %v1615_v37 = vpack.c.bf16 %v1614_v22, %v1614_v22 }
 0x48c   :  { %1780 = vmatpush.bf16.msrb.mxu1 %v3703_v57 }
 0x48d   :  { %3859 = vtanh.f32 %v1418_v30  ;;  %v4883_v30 = vld [vmem:[%s5314_s5] ss:$0 sm:$0xff] }
 0x493   :  { %v3860_v61 = vpop.eup %3859 }
 0x494   :  { %v1421_v1 = vmul.f32 %v3860_v61, %v1420_v0 }
 0x496   :  { %v4819_v25 = vadd.f32 %v1422_v33, %v1421_v1 }
 0x498   :  { %v1430_v31 = vpack.c.bf16 %v4819_v25, %v4819_v25 }
 0x49a   :  { %1439 = vmatmul.bf16.vlgmr.msra.gmra.mxu2 %v1430_v31  ;;  %1452 = vmatmul.bf16.vlgmr.msra.gmra.mxu3 %v1430_v31 }
 0x49b   :  { %1465 = vmatmul.bf16.vlgmr.msra.gmra.mxu0 %v1430_v31  ;;  %v5363_v31 = vld [vmem:[#allocation22_spill] sm:$0xff] }
 0x4ab   :  { %1692 = vmatmul.bf16.vlgmr.msrb.gmra.mxu0 %v1615_v37  ;;  %v3453_v37 = vld [vmem:[#allocation7 + $0x48] sm:$0xf] }
 0x518   :  { %v4823_v13 = vpop.f32.mrf.mxu0 }
 0x519   :  { %v1510_v16 = vadd.f32 %v4883_v30, %v4823_v13 }
 0x51d   :  { %v1440_v20 = vpop.f32.mrf.mxu2  ;;  %v1453_v9 = vpop.f32.mrf.mxu3 }
 0x51e   :  { %v1470_v7 = vadd.f32 %v1440_v20, %v324_v60  ;;  %v1490_v6 = vadd.f32 %v1453_v9, %v353_v47 }
 0x520   :  { %v3347_v19 = vmul.f32 -1.442695, %v1470_v7  ;;  %v3348_v38 = vmul.f32 -1.442695, %v1490_v6  ;;  %v1468_v51 = vpop.f32.mrf.mxu0 }
 0x521   :  { %v1707_v51 = vpack.c.bf16 %v4819_v25, %v4799_v2  ;;  %v3731_v2 = vld [vmem:[#allocation7 + $0xa0] sm:$0xf0] }
 0x522   :  { %3861 = vpow2.f32 %v3347_v19  ;;  %v1705_v19 = vpack.c.bf16 %v4693_v26, %v4599_v21  ;;  %v3489_v21 = vld [vmem:[#allocation7 + $0x90] sm:$0xf]  ;;  %v3730_v26 = vld [vmem:[#allocation7 + $0x98] sm:$0xf0] }
 0x523   :  { %3863 = vpow2.f32 %v3348_v38  ;;  %v1706_v38 = vpack.c.bf16 %v4764_v18, %v4728_v4  ;;  %v3729_v4 = vld [vmem:[#allocation7 + $0x94] sm:$0xf]  ;;  %v3490_v18 = vor.u32 %v3730_v26, %v3489_v21  ;;  %v3712_v21 = vld [vmem:[#allocation7 + $0x8] sm:$0xf0]  ;;  %v3711_v26 = vld [vmem:[#allocation7 + $0x4] sm:$0xf] }
 0x525   :  { %v1442_v62 = vpop.f32.mrf.mxu2  ;;  %v1455_v12 = vpop.f32.mrf.mxu3 }
 0x526   :  { %v3502_v62 = vor.u32 %v3733_v23, %v3501_v55  ;;  %v3503_v12 = vld [vmem:[#allocation7 + $0xb4] sm:$0xf0]  ;;  %v3431_v23 = vld [vmem:[#allocation7 + $0x24] sm:$0xf0] }
 0x528   :  { %v3862_v24 = vpop.eup %3861  ;;  %1982 = vmatpush.bf16.msra.mxu2 %v3502_v62  ;;  %v3716_v62 = vld [vmem:[#allocation7 + $0x28] sm:$0xf0] }
 0x529   :  { %v3864_v40 = vpop.eup %3863  ;;  %v1474_v28 = vadd.f32 1.0, %v3862_v24  ;;  %v3506_v24 = vor.u32 %v3732_v52, %v3503_v12  ;;  %v3437_v52 = vld [vmem:[#allocation7 + $0x20] sm:$0xf] }
 0x52a   :  { %v1494_v50 = vadd.f32 1.0, %v3864_v40  ;;  %v3510_v40 = vor.u32 %v3734_v35, %v3509_v17  ;;  %v3438_v17 = vor.u32 %v3716_v62, %v3437_v52  ;;  %v5364_v35 = vld [vmem:[#allocation26_spill] sm:$0xff] }
 0x52b   :  { %3865 = vrcp.f32 %v1474_v28  ;;  %v1486_v3 = vand.u32 2147483648, %v1474_v28  ;;  %v1484_v32 = vand.u32 2147483647, %v1474_v28  ;;  %vm1480_vm1 = vweird.f32 %v1474_v28  ;;  %2011 = vmatpush.bf16.msra.mxu3 %v3506_v24 }
 0x52c   :  { %3867 = vrcp.f32 %v1494_v50  ;;  %v1506_v1 = vand.u32 2147483648, %v1494_v50  ;;  %vm1500_vm5 = vweird.f32 %v1494_v50  ;;  %v1504_v33 = vand.u32 2147483647, %v1494_v50  ;;  %2040 = vmatpush.bf16.msra.mxu0 %v3510_v40  ;;  %1983 = vmatpush.bf16.msra.mxu2 %v3490_v18  ;;  %v3417_v40 = vld [vmem:[#allocation7] sm:$0xf] }
 0x52d   :  { %v1487_v39 = vor.u32 1.1754944e-38, %v1486_v3  ;;  %vm1485_vm3 = vcmp.eq.f32.partialorder %v1484_v32, 8.507059e+37  ;;  %v3465_v3 = vld [vmem:[#allocation7 + $0x60] sm:$0xf]  ;;  %v3473_v32 = vld [vmem:[#allocation7 + $0x68] sm:$0xf]  ;;  %v326_v24 = vadd.f32 %v5364_v35, %v4556_v43  ;;  %v3418_v18 = vor.u32 %v3712_v21, %v3417_v40 }
 0x52e   :  { %v1507_v47 = vor.u32 1.1754944e-38, %v1506_v1  ;;  %vm1505_vm7 = vcmp.eq.f32.partialorder %v1504_v33, 8.507059e+37  ;;  %v3757_v35 = vld [vmem:[#allocation10 + $0xb0] sm:$0xf0]  ;;  %v3756_v21 = vld [vmem:[#allocation10 + $0xac] sm:$0xf] }
 0x531   :  { %v3866_v14 = vpop.eup %3865 }
 0x532   :  { %v3868_v34 = vpop.eup %3867  ;;  %v1476_v44 = vmul.f32 %v3866_v14, %v1474_v28  ;;  %vm1481_vm0 = vweird.f32 %v3866_v14  ;;  %v3491_v28 = vld [vmem:[#allocation7 + $0x9c] sm:$0xf0] }
 0x533   :  { %v1496_v41 = vmul.f32 %v3868_v34, %v1494_v50  ;;  %vm1482_vm2 = vmor %vm1480_vm1, %vm1481_vm0  ;;  %vm1501_vm4 = vweird.f32 %v3868_v34  ;;  %v3498_v50 = vor.u32 %v3731_v2, %v3497_v36  ;;  %v3425_v36 = vld [vmem:[#allocation7 + $0x8] sm:$0xf]  ;;  %v3713_v2 = vld [vmem:[#allocation7 + $0x10] sm:$0xf0] }
 0x534   :  { %v1477_v53 = vsub.f32 1.0, %v1476_v44  ;;  %vm1502_vm6 = vmor %vm1500_vm5, %vm1501_vm4  ;;  %v3728_v44 = vld [vmem:[#allocation7 + $0x88] sm:$0xf0] }
 0x535   :  { %v1497_v29 = vsub.f32 1.0, %v1496_v41  ;;  %2041 = vmatpush.bf16.msra.mxu0 %v3498_v50  ;;  %v3482_v41 = vor.u32 %v3726_v58, %v3479_v15  ;;  %v5365_v58 = vld [vmem:[#allocation27_spill] sm:$0xff] }
 0x536   :  { %v1478_v11 = vmul.f32 %v3866_v14, %v1477_v53  ;;  %v4899_v53 = vpop.f32.mrf.mxu0  ;;  %v355_v43 = vadd.f32 %v5365_v58, %v4561_v45 }
 0x537   :  { %v1498_v5 = vmul.f32 %v3868_v34, %v1497_v29  ;;  %v3724_v29 = vld [vmem:[#allocation7 + $0x68] sm:$0xf0] }
 0x538   :  { %v1479_v42 = vadd.f32 %v3866_v14, %v1478_v11  ;;  %v3466_v22 = vor.u32 %v3724_v29, %v3465_v3  ;;  %v3467_v11 = vld [vmem:[#allocation7 + $0x6c] sm:$0xf0] }
 0x539   :  { %v1499_v0 = vadd.f32 %v3868_v34, %v1498_v5  ;;  %v3725_v5 = vld [vmem:[#allocation7 + $0x70] sm:$0xf0]  ;;  %v3470_v57 = vor.u32 %v3723_v48, %v3467_v11  ;;  %v3767_v48 = vld [vmem:[%s5317_s8] ss:$0 sm:$0xff] }
 0x53a   :  { %v1483_v59 = vsel %vm1482_vm2, %v3866_v14, %v1479_v42  ;;  %v3478_v14 = vor.u32 %v3727_v54, %v3477_v56  ;;  %v3474_v42 = vor.u32 %v3725_v5, %v3473_v32  ;;  %v3426_v56 = vor.u32 %v3713_v2, %v3425_v36  ;;  %v3753_v36 = vld [vmem:[#allocation10 + $0x94] sm:$0xf]  ;;  %v3587_v2 = vld [vmem:[#allocation10 + $0x9c] sm:$0xf0] }
 0x53b   :  { %v1488_v27 = vsel %vm1485_vm3, %v1487_v39, %v1483_v59  ;;  %v1503_v60 = vsel %vm1502_vm6, %v3868_v34, %v1499_v0  ;;  %v3485_v34 = vld [vmem:[#allocation7 + $0x80] sm:$0xf]  ;;  %v3721_v39 = vld [vmem:[#allocation7 + $0x50] sm:$0xf0]  ;;  %v3461_v0 = vld [vmem:[#allocation7 + $0x50] sm:$0xf]  ;;  %v4909_v45 = vadd.f32 %v3767_v48, %v4899_v53 }
 0x53c   :  { %v1511_v61 = vmul.f32 %v1510_v16, %v1488_v27  ;;  %v1508_v20 = vsel %vm1505_vm7, %v1507_v47, %v1503_v60  ;;  %v3486_v49 = vor.u32 %v3728_v44, %v3485_v34  ;;  %1984 = vmatpush.bf16.msra.mxu2 %v3478_v14  ;;  %v3720_v16 = vld [vmem:[#allocation7 + $0x4c] sm:$0xf]  ;;  %v3454_v59 = vor.u32 %v3721_v39, %v3453_v37  ;;  %v3455_v27 = vld [vmem:[#allocation7 + $0x54] sm:$0xf0]  ;;  %v3717_v60 = vld [vmem:[#allocation7 + $0x34] sm:$0xf] }
 0x53d   :  { %v1514_v13 = vsub.f32 1.0, %v1508_v20  ;;  %v1516_v7 = vmul.f32 %v1508_v20, %v4819_v25  ;;  %v3494_v25 = vor.u32 %v3729_v4, %v3491_v28  ;;  %v3458_v1 = vor.u32 %v3720_v16, %v3455_v27  ;;  %v3419_v28 = vld [vmem:[#allocation7 + $0xc] sm:$0xf0] }
 0x53e   :  { %v1512_v46 = vadd.f32 %v1511_v61, %v5363_v31  ;;  %2042 = vmatpush.bf16.msra.mxu0 %v3486_v49  ;;  %v3722_v61 = vld [vmem:[#allocation7 + $0x58] sm:$0xf0]  ;;  %v3441_v31 = vld [vmem:[#allocation7 + $0x30] sm:$0xf]  ;;  %v1695_v47 = vpop.f32.mrf.mxu0  ;;  %v3422_v50 = vor.u32 %v3711_v26, %v3419_v28  ;;  %v3599_v26 = vld [vmem:[#allocation10 + $0xb4] sm:$0xf0] }
 0x53f   :  { %2012 = vmatpush.bf16.msra.mxu3 %v3494_v25  ;;  %v3462_v33 = vor.u32 %v3722_v61, %v3461_v0  ;;  %v3754_v28 = vld [vmem:[#allocation10 + $0x98] sm:$0xf0] }
 0x540   :  { %3869 = vtanh.f32 %v1512_v46  ;;  %1985 = vmatpush.bf16.msra.mxu2 %v3466_v22  ;;  %v3718_v46 = vld [vmem:[#allocation7 + $0x38] sm:$0xf0] }
 0x541   :  { %v3442_v20 = vor.u32 %v3718_v46, %v3441_v31 }
 0x542   :  { %2043 = vmatpush.bf16.msra.mxu0 %v3474_v42 }
 0x543   :  { %2013 = vmatpush.bf16.msra.mxu3 %v3482_v41 }
 0x544   :  { %1986 = vmatpush.bf16.msra.mxu2 %v3454_v59 }
 0x546   :  { %v3870_v9 = vpop.eup %3869  ;;  %2044 = vmatpush.bf16.msra.mxu0 %v3462_v33 }
 0x547   :  { %v1515_v63 = vmul.f32 %v3870_v9, %v1514_v13  ;;  %2014 = vmatpush.bf16.msra.mxu3 %v3470_v57  ;;  %v3443_v13 = vld [vmem:[#allocation7 + $0x3c] sm:$0xf0]  ;;  %v3449_v9 = vld [vmem:[#allocation7 + $0x38] sm:$0xf] }
 0x548   :  { %1987 = vmatpush.bf16.msra.mxu2 %v3442_v20  ;;  %v5366_v20 = vld [vmem:[#allocation24_spill] sm:$0xff] }
 0x549   :  { %v4889_v6 = vadd.f32 %v1516_v7, %v1515_v63  ;;  %v3719_v63 = vld [vmem:[#allocation7 + $0x40] sm:$0xf0]  ;;  %v3446_v7 = vor.u32 %v3717_v60, %v3443_v13  ;;  %v384_v13 = vadd.f32 %v5366_v20, %v4497_v8 }
 0x54a   :  { %v3755_v20 = vld [vmem:[#allocation10 + $0xa0] sm:$0xf0] }
 0x54b   :  { %v1524_v10 = vpack.c.bf16 %v4889_v6, %v4889_v6  ;;  %2015 = vmatpush.bf16.msra.mxu3 %v3458_v1 }
 0x54d   :  { %1533 = vmatmul.bf16.vlgmr.msra.gmra.mxu1 %v1524_v10  ;;  %1546 = vmatmul.bf16.vlgmr.msrb.gmra.mxu2 %v1524_v10 }
 0x54e   :  { %1559 = vmatmul.bf16.vlgmr.msrb.gmra.mxu3 %v1524_v10  ;;  %v3450_v10 = vor.u32 %v3719_v63, %v3449_v9 }
 0x54f   :  { %2016 = vmatpush.bf16.msra.mxu3 %v3446_v7 }
 0x550   :  { %2045 = vmatpush.bf16.msra.mxu0 %v3450_v10 }
 0x554   :  { %2046 = vmatpush.bf16.msra.mxu0 %v3438_v17  ;;  %v3597_v17 = vld [vmem:[#allocation10 + $0xa8] sm:$0xf] }
 0x555   :  { %v4917_v40 = vor.u32 %v3757_v35, %v3597_v17  ;;  %v3569_v35 = vld [vmem:[#allocation10 + $0x68] sm:$0xf] }
 0x557   :  { %2309 = vmatpush.bf16.msra.mxu1 %v4917_v40 }
 0x558   :  { %2047 = vmatpush.bf16.msra.mxu0 %v3426_v56 }
 0x55c   :  { %2401 = vmatpush.bf16.msrb.mxu0 %v4917_v40 }
 0x55d   :  { %1781 = vmatmul.bf16.vlgmr.msrb.gmra.mxu1 %v1705_v19  ;;  %v3429_v19 = vld [vmem:[#allocation7 + $0x18] sm:$0xf] }
 0x56d   :  { %1786 = vmatmul.bf16.gmra.mxu1 %v1706_v38  ;;  %v3715_v38 = vld [vmem:[#allocation7 + $0x20] sm:$0xf0] }
 0x56e   :  { %v3430_v55 = vor.u32 %v3715_v38, %v3429_v19 }
 0x570   :  { %1988 = vmatpush.bf16.msra.mxu2 %v3430_v55 }
 0x574   :  { %1989 = vmatpush.bf16.msra.mxu2 %v3418_v18  ;;  %v4919_v18 = vor.u32 %v3756_v21, %v3599_v26  ;;  %v3525_v21 = vld [vmem:[#allocation10 + $0x18] sm:$0xf] }
 0x578   :  { %2322 = vmatpush.bf16.msrb.mxu2 %v4919_v18 }
 0x57d   :  { %1791 = vmatmul.bf16.gmra.mxu1 %v1707_v51  ;;  %v3714_v51 = vld [vmem:[#allocation7 + $0x1c] sm:$0xf] }
 0x57e   :  { %v3434_v12 = vor.u32 %v3714_v51, %v3431_v23 }
 0x580   :  { %2017 = vmatpush.bf16.msra.mxu3 %v3434_v12 }
 0x584   :  { %2018 = vmatpush.bf16.msra.mxu3 %v3422_v50 }
 0x5ca   :  { %v1534_v4 = vpop.f32.mrf.mxu1 }
 0x5cb   :  { %v1564_v25 = vadd.f32 %v1534_v4, %v326_v24  ;;  %v3585_v4 = vld [vmem:[#allocation10 + $0x90] sm:$0xf] }
 0x5cc   :  { %v4922_v56 = vor.u32 %v3754_v28, %v3585_v4  ;;  %v3739_v4 = vld [vmem:[#allocation10 + $0x20] sm:$0xf0] }
 0x5cd   :  { %v3349_v54 = vmul.f32 -1.442695, %v1564_v25 }
 0x5ce   :  { %2310 = vmatpush.bf16.msra.mxu1 %v4922_v56  ;;  %2402 = vmatpush.bf16.msrb.mxu0 %v4922_v56 }
 0x5cf   :  { %3871 = vpow2.f32 %v3349_v54 }
 0x5d0   :  { %v1547_v14 = vpop.f32.mrf.mxu2 }
 0x5d1   :  { %v1584_v15 = vadd.f32 %v1547_v14, %v355_v43  ;;  %v1560_v34 = vpop.f32.mrf.mxu3  ;;  %v4927_v43 = vor.u32 %v3753_v36, %v3587_v2  ;;  %v4975_v36 = vor.u32 %v3739_v4, %v3525_v21  ;;  %v5367_v2 = vld [vmem:[#allocation31_spill] sm:$0xff] }
 0x5d2   :  { %v1536_v44 = vpop.f32.mrf.mxu1  ;;  %v1604_v47 = vadd.f32 %v4883_v30, %v1560_v34  ;;  %v5383_v4 = vld [vmem:[#allocation35_spill] sm:$0xff] }
 0x5d3   :  { %v3350_v41 = vmul.f32 -1.442695, %v1584_v15  ;;  %2323 = vmatpush.bf16.msrb.mxu2 %v4927_v43 }
 0x5d5   :  { %v3872_v49 = vpop.eup %3871  ;;  %3873 = vpow2.f32 %v3350_v41 }
 0x5d6   :  { %v1568_v3 = vadd.f32 1.0, %v3872_v49 }
 0x5d8   :  { %3875 = vrcp.f32 %v1568_v3  ;;  %v1549_v29 = vpop.f32.mrf.mxu2  ;;  %v1580_v16 = vand.u32 2147483648, %v1568_v3  ;;  %v1578_v0 = vand.u32 2147483647, %v1568_v3  ;;  %vm1574_vm9 = vweird.f32 %v1568_v3 }
 0x5d9   :  { %v1562_v22 = vpop.f32.mrf.mxu3 }
 0x5da   :  { %v1782_v11 = vpop.f32.mrf.mxu1  ;;  %v1581_v53 = vor.u32 1.1754944e-38, %v1580_v16  ;;  %vm1579_vm11 = vcmp.eq.f32.partialorder %v1578_v0, 8.507059e+37  ;;  %v3575_v16 = vld [vmem:[#allocation10 + $0x84] sm:$0xf0]  ;;  %v3758_v0 = vld [vmem:[#allocation10 + $0xb8] sm:$0xf0] }
 0x5db   :  { %v3874_v32 = vpop.eup %3873  ;;  %v1802_v37 = vadd.f32 %v1782_v11, %v4909_v45 }
 0x5dc   :  { %v1588_v5 = vadd.f32 1.0, %v3874_v32 }
 0x5de   :  { %v3876_v57 = vpop.eup %3875  ;;  %3877 = vrcp.f32 %v1588_v5  ;;  %v1600_v10 = vand.u32 2147483648, %v1588_v5  ;;  %v1598_v51 = vand.u32 2147483647, %v1588_v5  ;;  %vm1594_vm13 = vweird.f32 %v1588_v5 }
 0x5df   :  { %v1570_v42 = vmul.f32 %v3876_v57, %v1568_v3  ;;  %vm1575_vm8 = vweird.f32 %v3876_v57  ;;  %3879 = vtanh.f32 %v1802_v37  ;;  %v3750_v37 = vld [vmem:[#allocation10 + $0x7c] sm:$0xf] }
 0x5e0   :  { %vm1576_vm10 = vmor %vm1574_vm9, %vm1575_vm8  ;;  %v1601_v30 = vor.u32 1.1754944e-38, %v1600_v10  ;;  %vm1599_vm15 = vcmp.eq.f32.partialorder %v1598_v51, 8.507059e+37  ;;  %v3581_v51 = vld [vmem:[#allocation10 + $0x80] sm:$0xf] }
 0x5e1   :  { %v1571_v39 = vsub.f32 1.0, %v1570_v42  ;;  %v3751_v42 = vld [vmem:[#allocation10 + $0x80] sm:$0xf0] }
 0x5e2   :  { %v1784_v59 = vpop.f32.mrf.mxu1 }
 0x5e3   :  { %v1572_v27 = vmul.f32 %v3876_v57, %v1571_v39  ;;  %v1803_v61 = vadd.f32 %v1784_v59, %v4909_v45  ;;  %v4938_v59 = vor.u32 %v3750_v37, %v3575_v16  ;;  %v5376_v16 = vmov 0  }
 0x5e4   :  { %v3878_v1 = vpop.eup %3877 }
 0x5e5   :  { %v1590_v33 = vmul.f32 %v3878_v1, %v1588_v5  ;;  %v1573_v31 = vadd.f32 %v3876_v57, %v1572_v27  ;;  %3881 = vtanh.f32 %v1803_v61  ;;  %vm1595_vm12 = vweird.f32 %v3878_v1  ;;  %v3880_v19 = vpop.eup %3879  ;;  %2324 = vmatpush.bf16.msrb.mxu2 %v4938_v59  ;;  %v3605_v27 = vld [vmem:[#allocation10 + $0xb0] sm:$0xf] }
 0x5e6   :  { %vm1596_vm14 = vmor %vm1594_vm13, %vm1595_vm12  ;;  %v4943_v61 = vor.u32 %v3758_v0, %v3605_v27  ;;  %v3735_v27 = vld [vmem:[#allocation10 + $0x4] sm:$0xf]  ;;  %v3515_v0 = vld [vmem:[#allocation10 + $0xc] sm:$0xf0] }
 0x5e7   :  { %v1591_v46 = vsub.f32 1.0, %v1590_v33  ;;  %v1577_v60 = vsel %vm1576_vm10, %v3876_v57, %v1573_v31  ;;  %v3748_v33 = vld [vmem:[#allocation10 + $0x68] sm:$0xf0]  ;;  %v3747_v31 = vld [vmem:[#allocation10 + $0x64] sm:$0xf] }
 0x5e8   :  { %v1582_v9 = vsel %vm1579_vm11, %v1581_v53, %v1577_v60  ;;  %2335 = vmatpush.bf16.msrb.mxu3 %v4943_v61 }
 0x5e9   :  { %v1605_v63 = vmul.f32 %v1604_v47, %v1582_v9  ;;  %v1592_v7 = vmul.f32 %v3878_v1, %v1591_v46  ;;  %v3563_v46 = vld [vmem:[#allocation10 + $0x6c] sm:$0xf0]  ;;  %v3593_v47 = vld [vmem:[#allocation10 + $0x98] sm:$0xf]  ;;  %v3549_v9 = vld [vmem:[#allocation10 + $0x48] sm:$0xf] }
 0x5ea   :  { %v1787_v38 = vpop.f32.mrf.mxu1  ;;  %v4948_v60 = vor.u32 %v3747_v31, %v3563_v46  ;;  %v5377_v31 = vld [vmem:[#allocation15_spill] sm:$0xff]  ;;  %v5378_v46 = vld [vmem:[#allocation17_spill] sm:$0xff] }
 0x5eb   :  { %v3882_v55 = vpop.eup %3881  ;;  %v1606_v23 = vadd.f32 %v1605_v63, %v384_v13  ;;  %v1593_v52 = vadd.f32 %v3878_v1, %v1592_v7  ;;  %v1804_v24 = vadd.f32 %v1787_v38, %v4909_v45  ;;  %v4953_v13 = vor.u32 %v3755_v20, %v3593_v47  ;;  %v3745_v63 = vld [vmem:[#allocation10 + $0x50] sm:$0xf0]  ;;  %v3744_v7 = vld [vmem:[#allocation10 + $0x4c] sm:$0xf] }
 0x5ec   :  { %v1818_v62 = vpack.c.bf16 %v3882_v55, %v3880_v19  ;;  %2325 = vmatpush.bf16.msrb.mxu2 %v4948_v60  ;;  %v4956_v10 = vor.u32 %v3745_v63, %v3549_v9  ;;  %v3551_v19 = vld [vmem:[#allocation10 + $0x54] sm:$0xf0]  ;;  %v3752_v55 = vld [vmem:[#allocation10 + $0x88] sm:$0xf0]  ;;  %v602_v47 = vadd.f32 %v5378_v46, %v5377_v31  ;;  %v5390_v46 = vld [vmem:[#allocation19_spill] sm:$0xff] }
 0x5ed   :  { %3883 = vtanh.f32 %v1606_v23  ;;  %v1597_v12 = vsel %vm1596_vm14, %v3878_v1, %v1593_v52  ;;  %v3561_v1 = vld [vmem:[#allocation10 + $0x60] sm:$0xf]  ;;  %2336 = vmatpush.bf16.msrb.mxu3 %v4953_v13  ;;  %v4958_v38 = vor.u32 %v3744_v7, %v3551_v19  ;;  %v4963_v23 = vor.u32 %v3752_v55, %v3581_v51  ;;  %v3537_v52 = vld [vmem:[#allocation10 + $0x30] sm:$0xf]  ;;  %v5379_v20 = vld [vmem:[#allocation28_spill] sm:$0xff] }
 0x5ee   :  { %1990 = vmatmul.bf16.vlgmr.msra.gmra.mxu2 %v1818_v62  ;;  %2019 = vmatmul.bf16.vlgmr.msra.gmra.mxu3 %v1818_v62  ;;  %v1602_v8 = vsel %vm1599_vm15, %v1601_v30, %v1597_v12  ;;  %3885 = vtanh.f32 %v1804_v24  ;;  %v4946_v53 = vor.u32 %v3748_v33, %v3561_v1  ;;  %v3741_v12 = vld [vmem:[#allocation10 + $0x34] sm:$0xf]  ;;  %v5006_v1 = vor.u32 %v3735_v27, %v3515_v0  ;;  %v5380_v9 = vld [vmem:[#allocation32_spill] sm:$0xff] }
 0x5ef   :  { %2048 = vmatmul.bf16.vlgmr.msra.gmra.mxu0 %v1818_v62  ;;  %v1608_v50 = vsub.f32 1.0, %v1602_v8  ;;  %v1610_v15 = vmul.f32 %v1602_v8, %v4889_v6  ;;  %v3742_v62 = vld [vmem:[#allocation10 + $0x38] sm:$0xf0]  ;;  %v3539_v8 = vld [vmem:[#allocation10 + $0x3c] sm:$0xf0]  ;;  %v631_v63 = vadd.f32 %v5380_v9, %v5379_v20  ;;  %v5391_v9 = vld [vmem:[#allocation36_spill] sm:$0xff] }
 0x5f0   :  { %2326 = vmatpush.bf16.msrb.mxu2 %v4958_v38  ;;  %v4966_v30 = vor.u32 %v3742_v62, %v3537_v52  ;;  %v4968_v17 = vor.u32 %v3741_v12, %v3539_v8  ;;  %v3749_v24 = vld [vmem:[#allocation10 + $0x70] sm:$0xf0]  ;;  %v3545_v52 = vld [vmem:[#allocation10 + $0x38] sm:$0xf]  ;;  %v3743_v62 = vld [vmem:[#allocation10 + $0x40] sm:$0xf0] }
 0x5f1   :  { %2337 = vmatpush.bf16.msrb.mxu3 %v4963_v23  ;;  %v4973_v26 = vor.u32 %v3749_v24, %v3569_v35  ;;  %v5020_v12 = vor.u32 %v3743_v62, %v3545_v52  ;;  %v3533_v8 = vld [vmem:[#allocation10 + $0x20] sm:$0xf]  ;;  %v3740_v35 = vld [vmem:[#allocation10 + $0x28] sm:$0xf0] }
 0x5f2   :  { %v1789_v25 = vpop.f32.mrf.mxu1 }
 0x5f3   :  { %v3884_v54 = vpop.eup %3883  ;;  %v1805_v58 = vadd.f32 %v1789_v25, %v4909_v45 }
 0x5f4   :  { %v1609_v14 = vmul.f32 %v3884_v54, %v1608_v50  ;;  %v3886_v41 = vpop.eup %3885  ;;  %2327 = vmatpush.bf16.msrb.mxu2 %v4968_v17  ;;  %v3738_v50 = vld [vmem:[#allocation10 + $0x1c] sm:$0xf]  ;;  %v3527_v54 = vld [vmem:[#allocation10 + $0x24] sm:$0xf0] }
 0x5f5   :  { %3887 = vtanh.f32 %v1805_v58  ;;  %2338 = vmatpush.bf16.msrb.mxu3 %v4973_v26  ;;  %v3513_v58 = vld [vmem:[#allocation10] sm:$0xf] }
 0x5f6   :  { %v1611_v34 = vadd.f32 %v1610_v15, %v1609_v14  ;;  %v4982_v14 = vor.u32 %v3738_v50, %v3527_v54  ;;  %v3736_v15 = vld [vmem:[#allocation10 + $0x8] sm:$0xf0]  ;;  %v3521_v50 = vld [vmem:[#allocation10 + $0x8] sm:$0xf]  ;;  %v3737_v54 = vld [vmem:[#allocation10 + $0x10] sm:$0xf0] }
 0x5f8   :  { %v1708_v44 = vpack.c.bf16 %v1611_v34, %v4889_v6  ;;  %v3573_v6 = vld [vmem:[#allocation10 + $0x78] sm:$0xf]  ;;  %v4985_v34 = vor.u32 %v3736_v15, %v3513_v58  ;;  %2328 = vmatpush.bf16.msrb.mxu2 %v4982_v14 }
 0x5f9   :  { %v4936_v39 = vor.u32 %v3751_v42, %v3573_v6 }
 0x5fa   :  { %v1792_v49 = vpop.f32.mrf.mxu1  ;;  %1796 = vmatmul.bf16.gmra.mxu1 %v1708_v44 }
 0x5fb   :  { %v3888_v3 = vpop.eup %3887  ;;  %v1806_v48 = vadd.f32 %v1792_v49, %v4909_v45  ;;  %2311 = vmatpush.bf16.msra.mxu1 %v4936_v39  ;;  %2403 = vmatpush.bf16.msrb.mxu0 %v4936_v39  ;;  %v5369_v49 = vld [vmem:[#allocation16_spill] sm:$0xff] }
 0x5fc   :  { %v1819_v29 = vpack.c.bf16 %v3888_v3, %v3886_v41  ;;  %2329 = vmatpush.bf16.msrb.mxu2 %v5006_v1 }
 0x5fd   :  { %3889 = vtanh.f32 %v1806_v48 }
 0x5fe   :  { %1995 = vmatmul.bf16.gmra.mxu2 %v1819_v29  ;;  %2024 = vmatmul.bf16.gmra.mxu3 %v1819_v29 }
 0x5ff   :  { %2053 = vmatmul.bf16.gmra.mxu0 %v1819_v29  ;;  %2312 = vmatpush.bf16.msra.mxu1 %v4946_v53  ;;  %v5371_v29 = vld [vmem:[#allocation30_spill] sm:$0xff] }
 0x600   :  { %2404 = vmatpush.bf16.msrb.mxu0 %v4946_v53  ;;  %2427 = vmatpush.bf16.msra.mxu2 %v4943_v61 }
 0x602   :  { %v1794_v22 = vpop.f32.mrf.mxu1 }
 0x603   :  { %v1807_v11 = vadd.f32 %v1794_v22, %v4909_v45  ;;  %v3890_v32 = vpop.eup %3889  ;;  %2313 = vmatpush.bf16.msra.mxu1 %v4956_v10  ;;  %v3557_v22 = vld [vmem:[#allocation10 + $0x50] sm:$0xf] }
 0x604   :  { %2405 = vmatpush.bf16.msrb.mxu0 %v4956_v10  ;;  %2428 = vmatpush.bf16.msra.mxu2 %v4953_v13 }
 0x605   :  { %3891 = vtanh.f32 %v1807_v11  ;;  %v3746_v11 = vld [vmem:[#allocation10 + $0x58] sm:$0xf0] }
 0x606   :  { %v4998_v6 = vor.u32 %v3746_v11, %v3557_v22  ;;  %v5387_v11 = vld [vmem:[#allocation34_spill] sm:$0xff] }
 0x607   :  { %2314 = vmatpush.bf16.msra.mxu1 %v4966_v30 }
 0x608   :  { %2406 = vmatpush.bf16.msrb.mxu0 %v4966_v30  ;;  %2339 = vmatpush.bf16.msrb.mxu3 %v4998_v6 }
 0x609   :  { %2429 = vmatpush.bf16.msra.mxu2 %v4963_v23 }
 0x60b   :  { %v3892_v5 = vpop.eup %3891  ;;  %2315 = vmatpush.bf16.msra.mxu1 %v4975_v36 }
 0x60c   :  { %v1820_v57 = vpack.c.bf16 %v3892_v5, %v3890_v32  ;;  %2407 = vmatpush.bf16.msrb.mxu0 %v4975_v36  ;;  %v5373_v32 = vld [vmem:[#allocation29_spill] sm:$0xff]  ;;  %2340 = vmatpush.bf16.msrb.mxu3 %v5020_v12 }
 0x60d   :  { %v5374_v5 = vld [vmem:[#allocation33_spill] sm:$0xff]  ;;  %2430 = vmatpush.bf16.msra.mxu2 %v4973_v26 }
 0x60e   :  { %2000 = vmatmul.bf16.gmra.mxu2 %v1820_v57  ;;  %2029 = vmatmul.bf16.gmra.mxu3 %v1820_v57 }
 0x60f   :  { %2058 = vmatmul.bf16.gmra.mxu0 %v1820_v57  ;;  %2316 = vmatpush.bf16.msra.mxu1 %v4985_v34  ;;  %v660_v57 = vadd.f32 %v5374_v5, %v5373_v32 }
 0x610   :  { %2408 = vmatpush.bf16.msrb.mxu0 %v4985_v34 }
 0x611   :  { %2431 = vmatpush.bf16.msra.mxu2 %v4998_v6 }
 0x612   :  { %2317 = vmatmul.bf16.vlgmr.msra.gmra.mxu1 %v5376_v16 }
 0x613   :  { %2414 = vmatpush.bf16.msrb.mxu1 %v4919_v18 }
 0x614   :  { %2506 = vmatpush.bf16.msra.mxu0 %v4919_v18 }
 0x615   :  { %2432 = vmatpush.bf16.msra.mxu2 %v5020_v12 }
 0x617   :  { %2415 = vmatpush.bf16.msrb.mxu1 %v4927_v43 }
 0x618   :  { %2507 = vmatpush.bf16.msra.mxu0 %v4927_v43 }
 0x61b   :  { %2416 = vmatpush.bf16.msrb.mxu1 %v4938_v59 }
 0x61c   :  { %2508 = vmatpush.bf16.msra.mxu0 %v4938_v59 }
 0x61f   :  { %2417 = vmatpush.bf16.msrb.mxu1 %v4948_v60 }
 0x620   :  { %2509 = vmatpush.bf16.msra.mxu0 %v4948_v60 }
 0x623   :  { %2418 = vmatpush.bf16.msrb.mxu1 %v4958_v38 }
 0x624   :  { %2510 = vmatpush.bf16.msra.mxu0 %v4958_v38 }
 0x627   :  { %2419 = vmatpush.bf16.msrb.mxu1 %v4968_v17 }
 0x628   :  { %2511 = vmatpush.bf16.msra.mxu0 %v4968_v17 }
 0x62b   :  { %2420 = vmatpush.bf16.msrb.mxu1 %v4982_v14 }
 0x62c   :  { %2512 = vmatpush.bf16.msra.mxu0 %v4982_v14 }
 0x62f   :  { %2421 = vmatpush.bf16.msrb.mxu1 %v5006_v1 }
 0x630   :  { %2513 = vmatpush.bf16.msra.mxu0 %v5006_v1 }
 0x633   :  { %2519 = vmatpush.bf16.msra.mxu1 %v4943_v61 }
 0x637   :  { %2520 = vmatpush.bf16.msra.mxu1 %v4953_v13 }
 0x63b   :  { %2521 = vmatpush.bf16.msra.mxu1 %v4963_v23 }
 0x63f   :  { %2522 = vmatpush.bf16.msra.mxu1 %v4973_v26 }
 0x643   :  { %2523 = vmatpush.bf16.msra.mxu1 %v4998_v6 }
 0x647   :  { %2524 = vmatpush.bf16.msra.mxu1 %v5020_v12 }
 0x66c   :  { %v2049_v28 = vpop.f32.mrf.mxu0 }
 0x66d   :  { %v4978_v25 = vadd.f32 %v2049_v28, %v5367_v2  ;;  %v5029_v2 = vor.u32 %v3740_v35, %v3533_v8 }
 0x66f   :  { %5368 = vst [vmem:[#allocation22_spill] sm:$0xff] %v4978_v25  ;;  %2341 = vmatpush.bf16.msrb.mxu3 %v5029_v2  ;;  %2433 = vmatpush.bf16.msra.mxu2 %v5029_v2 }
 0x670   :  { %2525 = vmatpush.bf16.msra.mxu1 %v5029_v2 }
 0x671   :  { %v1991_v44 = vpop.f32.mrf.mxu2  ;;  %v2020_v41 = vpop.f32.mrf.mxu3 }
 0x672   :  { %v4989_v3 = vadd.f32 %v1991_v44, %v5369_v49  ;;  %v4992_v48 = vadd.f32 %v2020_v41, %v5371_v29  ;;  %v5036_v49 = vor.u32 %v3737_v54, %v3521_v50  ;;  %v5385_v29 = vld [vmem:[#allocation18_spill] sm:$0xff]  ;;  %v5393_v54 = vld [vmem:[#allocation20_spill] sm:$0xff] }
 0x674   :  { %5370 = vst [vmem:[#allocation26_spill] sm:$0xff] %v4989_v3  ;;  %v2051_v42 = vpop.f32.mrf.mxu0  ;;  %2342 = vmatpush.bf16.msrb.mxu3 %v5036_v49  ;;  %2434 = vmatpush.bf16.msra.mxu2 %v5036_v49 }
 0x675   :  { %5372 = vst [vmem:[#allocation27_spill] sm:$0xff] %v4992_v48  ;;  %v5002_v37 = vadd.f32 %v2051_v42, %v660_v57  ;;  %v5389_v57 = vld [vmem:[#allocation37_spill] sm:$0xff]  ;;  %2526 = vmatpush.bf16.msra.mxu1 %v5036_v49 }
 0x676   :  { %v665_v42 = vadd.f32 %v5389_v57, %v5373_v32 }
 0x677   :  { %5375 = vst [vmem:[#allocation24_spill] sm:$0xff] %v5002_v37  ;;  %v1797_v33 = vpop.f32.mrf.mxu1 }
 0x678   :  { %v1808_v21 = vadd.f32 %v1797_v33, %v4909_v45  ;;  %2493 = vmatpush.bf16.msra.mxu3 %v4917_v40 }
 0x679   :  { %v1993_v7 = vpop.f32.mrf.mxu2  ;;  %v2022_v19 = vpop.f32.mrf.mxu3 }
 0x67a   :  { %v5016_v51 = vadd.f32 %v1993_v7, %v602_v47  ;;  %v5018_v55 = vadd.f32 %v2022_v19, %v631_v63  ;;  %3893 = vtanh.f32 %v1808_v21  ;;  %v607_v47 = vadd.f32 %v5390_v46, %v5377_v31 }
 0x67b   :  { %v636_v63 = vadd.f32 %v5391_v9, %v5379_v20 }
 0x67c   :  { %5381 = vst [vmem:[#allocation31_spill] sm:$0xff] %v5016_v51  ;;  %v2054_v24 = vpop.f32.mrf.mxu0  ;;  %2494 = vmatpush.bf16.msra.mxu3 %v4922_v56 }
 0x67d   :  { %5382 = vst [vmem:[#allocation16_spill] sm:$0xff] %v5018_v55  ;;  %v5026_v28 = vadd.f32 %v2054_v24, %v5383_v4  ;;  %v5392_v24 = vld [vmem:[#allocation39_spill] sm:$0xff] }
 0x67f   :  { %5384 = vst [vmem:[#allocation30_spill] sm:$0xff] %v5026_v28  ;;  %v1799_v58 = vpop.f32.mrf.mxu1 }
 0x680   :  { %v1809_v15 = vadd.f32 %v1799_v58, %v4909_v45  ;;  %v3894_v0 = vpop.eup %3893  ;;  %2495 = vmatpush.bf16.msra.mxu3 %v4936_v39 }
 0x681   :  { %v1996_v44 = vpop.f32.mrf.mxu2  ;;  %v2025_v41 = vpop.f32.mrf.mxu3 }
 0x682   :  { %3895 = vtanh.f32 %v1809_v15  ;;  %v5040_v22 = vadd.f32 %v1996_v44, %v5385_v29  ;;  %v5043_v5 = vadd.f32 %v2025_v41, %v5387_v11  ;;  %v5394_v15 = vld [vmem:[#allocation38_spill] sm:$0xff] }
 0x684   :  { %5386 = vst [vmem:[#allocation29_spill] sm:$0xff] %v5040_v22  ;;  %v2056_v45 = vpop.f32.mrf.mxu0  ;;  %2496 = vmatpush.bf16.msra.mxu3 %v4946_v53 }
 0x685   :  { %5388 = vst [vmem:[#allocation33_spill] sm:$0xff] %v5043_v5  ;;  %v5049_v27 = vadd.f32 %v2056_v45, %v665_v42  ;;  %v5395_v45 = vld [vmem:[#allocation43_spill] sm:$0xff] }
 0x688   :  { %v3896_v33 = vpop.eup %3895  ;;  %2497 = vmatpush.bf16.msra.mxu3 %v4956_v10 }
 0x689   :  { %v1998_v7 = vpop.f32.mrf.mxu2  ;;  %v2027_v19 = vpop.f32.mrf.mxu3  ;;  %v1821_v52 = vpack.c.bf16 %v3896_v33, %v3894_v0 }
 0x68a   :  { %v5061_v62 = vadd.f32 %v1998_v7, %v607_v47  ;;  %v5063_v8 = vadd.f32 %v2027_v19, %v636_v63  ;;  %v5396_v47 = vld [vmem:[#allocation23_spill] sm:$0xff]  ;;  %v5397_v63 = vld [vmem:[#allocation42_spill] sm:$0xff]  ;;  %v5398_v19 = vld [vmem:[#allocation25_spill] sm:$0xff] }
 0x68b   :  { %2005 = vmatmul.bf16.gmra.mxu2 %v1821_v52  ;;  %2034 = vmatmul.bf16.gmra.mxu3 %v1821_v52 }
 0x68c   :  { %v2059_v35 = vpop.f32.mrf.mxu0  ;;  %2063 = vmatmul.bf16.gmra.mxu0 %v1821_v52  ;;  %2498 = vmatpush.bf16.msra.mxu3 %v4966_v30  ;;  %v617_v52 = vadd.f32 %v5398_v19, %v5377_v31 }
 0x68d   :  { %v5068_v21 = vadd.f32 %v2059_v35, %v5392_v24 }
 0x690   :  { %2499 = vmatpush.bf16.msra.mxu3 %v4975_v36 }
 0x691   :  { %v2001_v4 = vpop.f32.mrf.mxu2  ;;  %v2030_v50 = vpop.f32.mrf.mxu3 }
 0x692   :  { %v5077_v58 = vadd.f32 %v2001_v4, %v5393_v54  ;;  %v5080_v44 = vadd.f32 %v2030_v50, %v5394_v15  ;;  %v5399_v54 = vld [vmem:[#allocation44_spill] sm:$0xff] }
 0x693   :  { %v646_v15 = vadd.f32 %v5399_v54, %v5379_v20 }
 0x694   :  { %2500 = vmatpush.bf16.msra.mxu3 %v4985_v34  ;;  %v5114_v29 = vpop.f32.mrf.mxu0 }
 0x699   :  { %v5116_v11 = vpop.f32.mrf.mxu2  ;;  %v5118_v57 = vpop.f32.mrf.mxu3 }
 0x69b   :  { %2330 = vmatmul.bf16.vlgmr.msrb.gmra.mxu2 %v5376_v16  ;;  %2343 = vmatmul.bf16.vlgmr.msrb.gmra.mxu3 %v5376_v16  ;;  %v2318_v16 = vpop.f32.mrf.mxu1 }
 0x69c   :  { %2585 = vmatpush.bf16.msrb.mxu2 %v4917_v40  ;;  %2598 = vmatpush.bf16.msrb.mxu3 %v4919_v18 }
 0x6a0   :  { %2586 = vmatpush.bf16.msrb.mxu2 %v4922_v56  ;;  %2599 = vmatpush.bf16.msrb.mxu3 %v4927_v43 }
 0x6a3   :  { %v2320_v41 = vpop.f32.mrf.mxu1 }
 0x6a4   :  { %2587 = vmatpush.bf16.msrb.mxu2 %v4936_v39  ;;  %2600 = vmatpush.bf16.msrb.mxu3 %v4938_v59 }
 0x6a8   :  { %2588 = vmatpush.bf16.msrb.mxu2 %v4946_v53  ;;  %2601 = vmatpush.bf16.msrb.mxu3 %v4948_v60 }
 0x6ac   :  { %2589 = vmatpush.bf16.msrb.mxu2 %v4956_v10  ;;  %2602 = vmatpush.bf16.msrb.mxu3 %v4958_v38 }
 0x6b0   :  { %2590 = vmatpush.bf16.msrb.mxu2 %v4966_v30  ;;  %2603 = vmatpush.bf16.msrb.mxu3 %v4968_v17 }
 0x6b4   :  { %2591 = vmatpush.bf16.msrb.mxu2 %v4975_v36  ;;  %2604 = vmatpush.bf16.msrb.mxu3 %v4982_v14 }
 0x6b8   :  { %2592 = vmatpush.bf16.msrb.mxu2 %v4985_v34  ;;  %2605 = vmatpush.bf16.msrb.mxu3 %v5006_v1 }
 0x709   :  { %v2064_v42 = vpop.f32.mrf.mxu0 }
 0x70a   :  { %v5121_v0 = vadd.f32 %v2064_v42, %v5395_v45 }
 0x70e   :  { %v2006_v33 = vpop.f32.mrf.mxu2  ;;  %v2035_v46 = vpop.f32.mrf.mxu3 }
 0x70f   :  { %v5124_v9 = vadd.f32 %v2006_v33, %v5396_v47  ;;  %v5127_v7 = vadd.f32 %v2035_v46, %v5397_v63 }
 0x716   :  { %v2008_v35 = vpop.f32.mrf.mxu2  ;;  %v2037_v24 = vpop.f32.mrf.mxu3 }
 0x717   :  { %v2114_v4 = vadd.f32 %v2008_v35, %v617_v52  ;;  %v2115_v42 = vadd.f32 %v2037_v24, %v646_v15  ;;  %v5136_v35 = vld [vmem:[%s5322_s13] ss:$0 sm:$0xff] }
 0x719   :  { %v2348_v50 = vadd.f32 %v2318_v16, %v2114_v4 }
 0x71b   :  { %v3607_v41 = vmul.f32 -1.442695, %v2348_v50 }
 0x71d   :  { %3897 = vpow2.f32 %v3607_v41 }
 0x71e   :  { %v2331_v45 = vpop.f32.mrf.mxu2  ;;  %v2344_v25 = vpop.f32.mrf.mxu3 }
 0x71f   :  { %v2368_v33 = vadd.f32 %v2331_v45, %v2115_v42  ;;  %v5400_v45 = vld [vmem:[#allocation45_spill] sm:$0xff] }
 0x721   :  { %v3608_v47 = vmul.f32 -1.442695, %v2368_v33  ;;  %v675_v33 = vadd.f32 %v5400_v45, %v5373_v32 }
 0x723   :  { %v3898_v48 = vpop.eup %3897  ;;  %3899 = vpow2.f32 %v3608_v47 }
 0x724   :  { %v2352_v46 = vadd.f32 1.0, %v3898_v48  ;;  %v2066_v48 = vpop.f32.mrf.mxu0 }
 0x726   :  { %3901 = vrcp.f32 %v2352_v46  ;;  %v2333_v63 = vpop.f32.mrf.mxu2  ;;  %v2346_v19 = vpop.f32.mrf.mxu3  ;;  %v2364_v4 = vand.u32 2147483648, %v2352_v46  ;;  %v2362_v54 = vand.u32 2147483647, %v2352_v46  ;;  %vm2358_vm1 = vweird.f32 %v2352_v46 }
 0x728   :  { %v2365_v47 = vor.u32 1.1754944e-38, %v2364_v4  ;;  %vm2363_vm3 = vcmp.eq.f32.partialorder %v2362_v54, 8.507059e+37 }
 0x729   :  { %v3900_v3 = vpop.eup %3899 }
 0x72a   :  { %v2372_v37 = vadd.f32 1.0, %v3900_v3  ;;  %v2388_v3 = vadd.f32 %v5136_v35, %v2344_v25 }
 0x72c   :  { %v3902_v52 = vpop.eup %3901  ;;  %3903 = vrcp.f32 %v2372_v37  ;;  %v2384_v55 = vand.u32 2147483648, %v2372_v37  ;;  %v2382_v5 = vand.u32 2147483647, %v2372_v37  ;;  %vm2378_vm5 = vweird.f32 %v2372_v37 }
 0x72d   :  { %v2354_v16 = vmul.f32 %v3902_v52, %v2352_v46  ;;  %vm2359_vm0 = vweird.f32 %v3902_v52 }
 0x72e   :  { %vm2360_vm2 = vmor %vm2358_vm1, %vm2359_vm0  ;;  %v2385_v25 = vor.u32 1.1754944e-38, %v2384_v55  ;;  %vm2383_vm7 = vcmp.eq.f32.partialorder %v2382_v5, 8.507059e+37 }
 0x72f   :  { %v2355_v24 = vsub.f32 1.0, %v2354_v16  ;;  %v2116_v16 = vadd.f32 %v2066_v48, %v675_v33 }
 0x731   :  { %v2356_v50 = vmul.f32 %v3902_v52, %v2355_v24 }
 0x732   :  { %v3904_v15 = vpop.eup %3903 }
 0x733   :  { %v2374_v41 = vmul.f32 %v3904_v15, %v2372_v37  ;;  %v2357_v42 = vadd.f32 %v3902_v52, %v2356_v50  ;;  %vm2379_vm4 = vweird.f32 %v3904_v15 }
 0x734   :  { %vm2380_vm6 = vmor %vm2378_vm5, %vm2379_vm4 }
 0x735   :  { %v2375_v63 = vsub.f32 1.0, %v2374_v41  ;;  %v2361_v19 = vsel %vm2360_vm2, %v3902_v52, %v2357_v42 }
 0x736   :  { %v2366_v51 = vsel %vm2363_vm3, %v2365_v47, %v2361_v19 }
 0x737   :  { %v2376_v24 = vmul.f32 %v3904_v15, %v2375_v63  ;;  %v2389_v28 = vmul.f32 %v2388_v3, %v2366_v51 }
 0x739   :  { %v2377_v22 = vadd.f32 %v3904_v15, %v2376_v24  ;;  %v2390_v46 = vadd.f32 %v2389_v28, %v2116_v16 }
 0x73b   :  { %v2381_v50 = vsel %vm2380_vm6, %v3904_v15, %v2377_v22  ;;  %3905 = vtanh.f32 %v2390_v46 }
 0x73c   :  { %v2386_v45 = vsel %vm2383_vm7, %v2385_v25, %v2381_v50 }
 0x73d   :  { %v2392_v4 = vsub.f32 1.0, %v2386_v45  ;;  %v2394_v54 = vmul.f32 0.0, %v2386_v45 }
 0x741   :  { %v3906_v41 = vpop.eup %3905 }
 0x742   :  { %v2393_v52 = vmul.f32 %v3906_v41, %v2392_v4 }
 0x744   :  { %v5141_v48 = vadd.f32 %v2394_v54, %v2393_v52 }
 0x746   :  { %v2400_v42 = vpack.c.bf16 %v5141_v48, %v5141_v48 }
 0x748   :  { %2409 = vmatmul.bf16.vlgmr.msrb.gmra.mxu0 %v2400_v42  ;;  %2422 = vmatmul.bf16.vlgmr.msrb.gmra.mxu1 %v2400_v42 }
 0x749   :  { %2435 = vmatmul.bf16.vlgmr.msra.gmra.mxu2 %v2400_v42  ;;  %2611 = vmatpush.bf16.msrb.mxu0 %v4943_v61 }
 0x74a   :  { %2677 = vmatpush.bf16.msrb.mxu1 %v4917_v40  ;;  %2690 = vmatpush.bf16.msra.mxu2 %v4919_v18 }
 0x74d   :  { %2612 = vmatpush.bf16.msrb.mxu0 %v4953_v13 }
 0x74e   :  { %2678 = vmatpush.bf16.msrb.mxu1 %v4922_v56  ;;  %2691 = vmatpush.bf16.msra.mxu2 %v4927_v43 }
 0x751   :  { %2613 = vmatpush.bf16.msrb.mxu0 %v4963_v23 }
 0x752   :  { %2679 = vmatpush.bf16.msrb.mxu1 %v4936_v39  ;;  %2692 = vmatpush.bf16.msra.mxu2 %v4938_v59 }
 0x755   :  { %2614 = vmatpush.bf16.msrb.mxu0 %v4973_v26 }
 0x756   :  { %2680 = vmatpush.bf16.msrb.mxu1 %v4946_v53  ;;  %2693 = vmatpush.bf16.msra.mxu2 %v4948_v60 }
 0x759   :  { %2615 = vmatpush.bf16.msrb.mxu0 %v4998_v6 }
 0x75a   :  { %2681 = vmatpush.bf16.msrb.mxu1 %v4956_v10  ;;  %2694 = vmatpush.bf16.msra.mxu2 %v4958_v38 }
 0x75d   :  { %2616 = vmatpush.bf16.msrb.mxu0 %v5020_v12 }
 0x75e   :  { %2682 = vmatpush.bf16.msrb.mxu1 %v4966_v30  ;;  %2695 = vmatpush.bf16.msra.mxu2 %v4968_v17 }
 0x761   :  { %2617 = vmatpush.bf16.msrb.mxu0 %v5029_v2 }
 0x762   :  { %2683 = vmatpush.bf16.msrb.mxu1 %v4975_v36  ;;  %2696 = vmatpush.bf16.msra.mxu2 %v4982_v14 }
 0x765   :  { %2618 = vmatpush.bf16.msrb.mxu0 %v5036_v49 }
 0x766   :  { %2684 = vmatpush.bf16.msrb.mxu1 %v4985_v34  ;;  %2697 = vmatpush.bf16.msra.mxu2 %v5006_v1 }
 0x7c5   :  { %v2410_v37 = vpop.f32.mrf.mxu0  ;;  %v2423_v51 = vpop.f32.mrf.mxu1 }
 0x7c6   :  { %v2440_v55 = vadd.f32 %v2410_v37, %v5124_v9  ;;  %v2460_v28 = vadd.f32 %v2423_v51, %v5127_v7 }
 0x7c8   :  { %v3609_v22 = vmul.f32 -1.442695, %v2440_v55  ;;  %v3610_v5 = vmul.f32 -1.442695, %v2460_v28 }
 0x7ca   :  { %3907 = vpow2.f32 %v3609_v22 }
 0x7cb   :  { %3909 = vpow2.f32 %v3610_v5 }
 0x7cc   :  { %v2436_v15 = vpop.f32.mrf.mxu2 }
 0x7cd   :  { %v2412_v3 = vpop.f32.mrf.mxu0  ;;  %v2425_v33 = vpop.f32.mrf.mxu1  ;;  %v2480_v55 = vadd.f32 %v5136_v35, %v2436_v15 }
 0x7d0   :  { %v3908_v47 = vpop.eup %3907 }
 0x7d1   :  { %v3910_v63 = vpop.eup %3909  ;;  %v2444_v19 = vadd.f32 1.0, %v3908_v47 }
 0x7d2   :  { %v2464_v16 = vadd.f32 1.0, %v3910_v63 }
 0x7d3   :  { %3911 = vrcp.f32 %v2444_v19  ;;  %v2456_v4 = vand.u32 2147483648, %v2444_v19  ;;  %v2454_v52 = vand.u32 2147483647, %v2444_v19  ;;  %vm2450_vm9 = vweird.f32 %v2444_v19 }
 0x7d4   :  { %3913 = vrcp.f32 %v2464_v16  ;;  %v2438_v24 = vpop.f32.mrf.mxu2  ;;  %v2476_v5 = vand.u32 2147483648, %v2464_v16  ;;  %vm2470_vm13 = vweird.f32 %v2464_v16  ;;  %v2474_v33 = vand.u32 2147483647, %v2464_v16 }
 0x7d5   :  { %v2457_v37 = vor.u32 1.1754944e-38, %v2456_v4  ;;  %vm2455_vm11 = vcmp.eq.f32.partialorder %v2454_v52, 8.507059e+37  ;;  %v5402_v52 = vld [vmem:[#allocation21_spill] sm:$0xff] }
 0x7d6   :  { %v2477_v24 = vor.u32 1.1754944e-38, %v2476_v5  ;;  %vm2475_vm15 = vcmp.eq.f32.partialorder %v2474_v33, 8.507059e+37 }
 0x7d9   :  { %v3912_v46 = vpop.eup %3911 }
 0x7da   :  { %v3914_v25 = vpop.eup %3913  ;;  %v2446_v50 = vmul.f32 %v3912_v46, %v2444_v19  ;;  %vm2451_vm8 = vweird.f32 %v3912_v46 }
 0x7db   :  { %v2466_v9 = vmul.f32 %v3914_v25, %v2464_v16  ;;  %vm2452_vm10 = vmor %vm2450_vm9, %vm2451_vm8  ;;  %vm2471_vm12 = vweird.f32 %v3914_v25 }
 0x7dc   :  { %v2447_v45 = vsub.f32 1.0, %v2446_v50  ;;  %vm2472_vm14 = vmor %vm2470_vm13, %vm2471_vm12 }
 0x7dd   :  { %v2467_v7 = vsub.f32 1.0, %v2466_v9 }
 0x7de   :  { %v2448_v41 = vmul.f32 %v3912_v46, %v2447_v45 }
 0x7df   :  { %v2468_v54 = vmul.f32 %v3914_v25, %v2467_v7 }
 0x7e0   :  { %v2449_v42 = vadd.f32 %v3912_v46, %v2448_v41 }
 0x7e1   :  { %v2469_v28 = vadd.f32 %v3914_v25, %v2468_v54  ;;  %v612_v54 = vadd.f32 %v5402_v52, %v5377_v31 }
 0x7e2   :  { %v2453_v51 = vsel %vm2452_vm10, %v3912_v46, %v2449_v42 }
 0x7e3   :  { %v2458_v22 = vsel %vm2455_vm11, %v2457_v37, %v2453_v51  ;;  %v2473_v63 = vsel %vm2472_vm14, %v3914_v25, %v2469_v28  ;;  %v2108_v37 = vadd.f32 %v5116_v11, %v612_v54 }
 0x7e4   :  { %v2481_v3 = vmul.f32 %v2480_v55, %v2458_v22  ;;  %v2478_v19 = vsel %vm2475_vm15, %v2477_v24, %v2473_v63 }
 0x7e5   :  { %v2484_v50 = vsub.f32 1.0, %v2478_v19  ;;  %v2486_v15 = vmul.f32 %v2478_v19, %v5141_v48 }
 0x7e6   :  { %v2482_v47 = vadd.f32 %v2481_v3, %v5121_v0  ;;  %v5401_v0 = vld [vmem:[#allocation40_spill] sm:$0xff] }
 0x7e7   :  { %v641_v48 = vadd.f32 %v5401_v0, %v5379_v20 }
 0x7e8   :  { %3915 = vtanh.f32 %v2482_v47 }
 0x7e9   :  { %v2109_v16 = vadd.f32 %v5118_v57, %v641_v48 }
 0x7ee   :  { %v3916_v46 = vpop.eup %3915 }
 0x7ef   :  { %v2485_v9 = vmul.f32 %v3916_v46, %v2484_v50 }
 0x7f1   :  { %v5174_v45 = vadd.f32 %v2486_v15, %v2485_v9 }
 0x7f3   :  { %v2492_v7 = vpack.c.bf16 %v5174_v45, %v5174_v45 }
 0x7f5   :  { %2501 = vmatmul.bf16.vlgmr.msra.gmra.mxu3 %v2492_v7  ;;  %2514 = vmatmul.bf16.vlgmr.msra.gmra.mxu0 %v2492_v7 }
 0x7f6   :  { %2527 = vmatmul.bf16.vlgmr.msra.gmra.mxu1 %v2492_v7  ;;  %2703 = vmatpush.bf16.msra.mxu3 %v4943_v61 }
 0x7f7   :  { %2769 = vmatpush.bf16.msra.mxu0 %v4917_v40  ;;  %2782 = vmatpush.bf16.msra.mxu1 %v4919_v18 }
 0x7fa   :  { %2704 = vmatpush.bf16.msra.mxu3 %v4953_v13 }
 0x7fb   :  { %2770 = vmatpush.bf16.msra.mxu0 %v4922_v56  ;;  %2783 = vmatpush.bf16.msra.mxu1 %v4927_v43 }
 0x7fe   :  { %2705 = vmatpush.bf16.msra.mxu3 %v4963_v23 }
 0x7ff   :  { %2771 = vmatpush.bf16.msra.mxu0 %v4936_v39  ;;  %2784 = vmatpush.bf16.msra.mxu1 %v4938_v59 }
 0x802   :  { %2706 = vmatpush.bf16.msra.mxu3 %v4973_v26 }
 0x803   :  { %2772 = vmatpush.bf16.msra.mxu0 %v4946_v53  ;;  %2785 = vmatpush.bf16.msra.mxu1 %v4948_v60 }
 0x806   :  { %2707 = vmatpush.bf16.msra.mxu3 %v4998_v6 }
 0x807   :  { %2773 = vmatpush.bf16.msra.mxu0 %v4956_v10  ;;  %2786 = vmatpush.bf16.msra.mxu1 %v4958_v38 }
 0x80a   :  { %2708 = vmatpush.bf16.msra.mxu3 %v5020_v12 }
 0x80b   :  { %2774 = vmatpush.bf16.msra.mxu0 %v4966_v30  ;;  %2787 = vmatpush.bf16.msra.mxu1 %v4968_v17 }
 0x80e   :  { %2709 = vmatpush.bf16.msra.mxu3 %v5029_v2 }
 0x80f   :  { %2775 = vmatpush.bf16.msra.mxu0 %v4975_v36  ;;  %2788 = vmatpush.bf16.msra.mxu1 %v4982_v14 }
 0x812   :  { %2710 = vmatpush.bf16.msra.mxu3 %v5036_v49 }
 0x813   :  { %2776 = vmatpush.bf16.msra.mxu0 %v4985_v34  ;;  %2789 = vmatpush.bf16.msra.mxu1 %v5006_v1 }
 0x872   :  { %v2515_v25 = vpop.f32.mrf.mxu0 }
 0x873   :  { %v2552_v4 = vadd.f32 %v2515_v25, %v2109_v16  ;;  %v2528_v41 = vpop.f32.mrf.mxu1  ;;  %v5403_v16 = vld [vmem:[#allocation41_spill] sm:$0xff] }
 0x874   :  { %v670_v25 = vadd.f32 %v5403_v16, %v5373_v32 }
 0x875   :  { %v3612_v42 = vmul.f32 -1.442695, %v2552_v4  ;;  %v2572_v4 = vadd.f32 %v5136_v35, %v2528_v41 }
 0x877   :  { %3917 = vpow2.f32 %v3612_v42 }
 0x878   :  { %v2502_v51 = vpop.f32.mrf.mxu3 }
 0x879   :  { %v2532_v55 = vadd.f32 %v2502_v51, %v2108_v37  ;;  %v2110_v37 = vadd.f32 %v5114_v29, %v670_v25 }
 0x87a   :  { %v2517_v28 = vpop.f32.mrf.mxu0 }
 0x87b   :  { %v3611_v22 = vmul.f32 -1.442695, %v2532_v55  ;;  %v2530_v5 = vpop.f32.mrf.mxu1 }
 0x87d   :  { %v3918_v3 = vpop.eup %3917  ;;  %3919 = vpow2.f32 %v3611_v22 }
 0x87e   :  { %v2556_v20 = vadd.f32 1.0, %v3918_v3 }
 0x880   :  { %v2504_v33 = vpop.f32.mrf.mxu3  ;;  %3921 = vrcp.f32 %v2556_v20  ;;  %v2568_v51 = vand.u32 2147483648, %v2556_v20  ;;  %vm2562_vm5 = vweird.f32 %v2556_v20  ;;  %v2566_v28 = vand.u32 2147483647, %v2556_v20 }
 0x882   :  { %v2569_v3 = vor.u32 1.1754944e-38, %v2568_v51  ;;  %vm2567_vm7 = vcmp.eq.f32.partialorder %v2566_v28, 8.507059e+37 }
 0x883   :  { %v3920_v57 = vpop.eup %3919 }
 0x884   :  { %v2536_v47 = vadd.f32 1.0, %v3920_v57 }
 0x886   :  { %3923 = vrcp.f32 %v2536_v47  ;;  %v3922_v63 = vpop.eup %3921  ;;  %v2548_v46 = vand.u32 2147483648, %v2536_v47  ;;  %v2546_v15 = vand.u32 2147483647, %v2536_v47  ;;  %vm2542_vm1 = vweird.f32 %v2536_v47 }
 0x887   :  { %v2558_v24 = vmul.f32 %v3922_v63, %v2556_v20  ;;  %vm2563_vm4 = vweird.f32 %v3922_v63 }
 0x888   :  { %v2549_v48 = vor.u32 1.1754944e-38, %v2548_v46  ;;  %vm2547_vm3 = vcmp.eq.f32.partialorder %v2546_v15, 8.507059e+37  ;;  %vm2564_vm6 = vmor %vm2562_vm5, %vm2563_vm4 }
 0x889   :  { %v2559_v50 = vsub.f32 1.0, %v2558_v24 }
 0x88b   :  { %v2560_v7 = vmul.f32 %v3922_v63, %v2559_v50 }
 0x88c   :  { %v3924_v31 = vpop.eup %3923 }
 0x88d   :  { %v2538_v19 = vmul.f32 %v3924_v31, %v2536_v47  ;;  %vm2543_vm0 = vweird.f32 %v3924_v31  ;;  %v2561_v54 = vadd.f32 %v3922_v63, %v2560_v7 }
 0x88e   :  { %vm2544_vm2 = vmor %vm2542_vm1, %vm2543_vm0 }
 0x88f   :  { %v2539_v11 = vsub.f32 1.0, %v2538_v19  ;;  %v2565_v5 = vsel %vm2564_vm6, %v3922_v63, %v2561_v54 }
 0x890   :  { %v2570_v32 = vsel %vm2567_vm7, %v2569_v3, %v2565_v5 }
 0x891   :  { %v2540_v9 = vmul.f32 %v3924_v31, %v2539_v11  ;;  %v2576_v33 = vsub.f32 1.0, %v2570_v32  ;;  %v2578_v47 = vmul.f32 %v2570_v32, %v5174_v45 }
 0x893   :  { %v2541_v0 = vadd.f32 %v3924_v31, %v2540_v9 }
 0x895   :  { %v2545_v52 = vsel %vm2544_vm2, %v3924_v31, %v2541_v0 }
 0x896   :  { %v2550_v42 = vsel %vm2547_vm3, %v2549_v48, %v2545_v52 }
 0x897   :  { %v2573_v55 = vmul.f32 %v2572_v4, %v2550_v42 }
 0x899   :  { %v2574_v22 = vadd.f32 %v2573_v55, %v2110_v37 }
 0x89b   :  { %3925 = vtanh.f32 %v2574_v22 }
 0x8a1   :  { %v3926_v41 = vpop.eup %3925 }
 0x8a2   :  { %v2577_v57 = vmul.f32 %v3926_v41, %v2576_v33 }
 0x8a4   :  { %v5213_v24 = vadd.f32 %v2578_v47, %v2577_v57 }
 0x8a6   :  { %v2584_v29 = vpack.c.bf16 %v5213_v24, %v5213_v24 }
 0x8a8   :  { %2593 = vmatmul.bf16.vlgmr.msrb.gmra.mxu2 %v2584_v29  ;;  %2606 = vmatmul.bf16.vlgmr.msrb.gmra.mxu3 %v2584_v29 }
 0x8a9   :  { %2619 = vmatmul.bf16.vlgmr.msrb.gmra.mxu0 %v2584_v29  ;;  %2795 = vmatpush.bf16.msrb.mxu2 %v4943_v61 }
 0x8aa   :  { %2861 = vmatpush.bf16.msrb.mxu3 %v4917_v40  ;;  %2874 = vmatpush.bf16.msrb.mxu0 %v4919_v18 }
 0x8ad   :  { %2796 = vmatpush.bf16.msrb.mxu2 %v4953_v13 }
 0x8ae   :  { %2862 = vmatpush.bf16.msrb.mxu3 %v4922_v56  ;;  %2875 = vmatpush.bf16.msrb.mxu0 %v4927_v43 }
 0x8b1   :  { %2797 = vmatpush.bf16.msrb.mxu2 %v4963_v23 }
 0x8b2   :  { %2863 = vmatpush.bf16.msrb.mxu3 %v4936_v39  ;;  %2876 = vmatpush.bf16.msrb.mxu0 %v4938_v59 }
 0x8b5   :  { %2798 = vmatpush.bf16.msrb.mxu2 %v4973_v26 }
 0x8b6   :  { %2864 = vmatpush.bf16.msrb.mxu3 %v4946_v53  ;;  %2877 = vmatpush.bf16.msrb.mxu0 %v4948_v60 }
 0x8b9   :  { %2799 = vmatpush.bf16.msrb.mxu2 %v4998_v6 }
 0x8ba   :  { %2865 = vmatpush.bf16.msrb.mxu3 %v4956_v10  ;;  %2878 = vmatpush.bf16.msrb.mxu0 %v4958_v38 }
 0x8bd   :  { %2800 = vmatpush.bf16.msrb.mxu2 %v5020_v12 }
 0x8be   :  { %2866 = vmatpush.bf16.msrb.mxu3 %v4966_v30  ;;  %2879 = vmatpush.bf16.msrb.mxu0 %v4968_v17 }
 0x8c1   :  { %2801 = vmatpush.bf16.msrb.mxu2 %v5029_v2 }
 0x8c2   :  { %2867 = vmatpush.bf16.msrb.mxu3 %v4975_v36  ;;  %2880 = vmatpush.bf16.msrb.mxu0 %v4982_v14 }
 0x8c5   :  { %2802 = vmatpush.bf16.msrb.mxu2 %v5036_v49 }
 0x8c6   :  { %2868 = vmatpush.bf16.msrb.mxu3 %v4985_v34  ;;  %2881 = vmatpush.bf16.msrb.mxu0 %v5006_v1 }
 0x926   :  { %v2620_v45 = vpop.f32.mrf.mxu0 }
 0x927   :  { %v2664_v5 = vadd.f32 %v5136_v35, %v2620_v45 }
 0x92b   :  { %v2594_v20 = vpop.f32.mrf.mxu2  ;;  %v2607_v63 = vpop.f32.mrf.mxu3 }
 0x92c   :  { %v2624_v31 = vadd.f32 %v2594_v20, %v5077_v58  ;;  %v2644_v19 = vadd.f32 %v2607_v63, %v5080_v44 }
 0x92e   :  { %v3613_v50 = vmul.f32 -1.442695, %v2624_v31  ;;  %v3614_v11 = vmul.f32 -1.442695, %v2644_v19  ;;  %v2622_v46 = vpop.f32.mrf.mxu0 }
 0x930   :  { %3927 = vpow2.f32 %v3613_v50 }
 0x931   :  { %3929 = vpow2.f32 %v3614_v11 }
 0x933   :  { %v2596_v9 = vpop.f32.mrf.mxu2  ;;  %v2609_v15 = vpop.f32.mrf.mxu3 }
 0x936   :  { %v3928_v7 = vpop.eup %3927 }
 0x937   :  { %v3930_v0 = vpop.eup %3929  ;;  %v2628_v48 = vadd.f32 1.0, %v3928_v7 }
 0x938   :  { %v2648_v16 = vadd.f32 1.0, %v3930_v0 }
 0x939   :  { %3931 = vrcp.f32 %v2628_v48  ;;  %v2640_v42 = vand.u32 2147483648, %v2628_v48  ;;  %v2638_v51 = vand.u32 2147483647, %v2628_v48  ;;  %vm2634_vm9 = vweird.f32 %v2628_v48 }
 0x93a   :  { %3933 = vrcp.f32 %v2648_v16  ;;  %v2660_v57 = vand.u32 2147483648, %v2648_v16  ;;  %vm2654_vm13 = vweird.f32 %v2648_v16  ;;  %v2658_v47 = vand.u32 2147483647, %v2648_v16 }
 0x93b   :  { %v2641_v22 = vor.u32 1.1754944e-38, %v2640_v42  ;;  %vm2639_vm11 = vcmp.eq.f32.partialorder %v2638_v51, 8.507059e+37 }
 0x93c   :  { %v2661_v63 = vor.u32 1.1754944e-38, %v2660_v57  ;;  %vm2659_vm15 = vcmp.eq.f32.partialorder %v2658_v47, 8.507059e+37 }
 0x93f   :  { %v3932_v25 = vpop.eup %3931 }
 0x940   :  { %v3934_v4 = vpop.eup %3933  ;;  %v2630_v52 = vmul.f32 %v3932_v25, %v2628_v48  ;;  %vm2635_vm8 = vweird.f32 %v3932_v25 }
 0x941   :  { %v2650_v54 = vmul.f32 %v3934_v4, %v2648_v16  ;;  %vm2636_vm10 = vmor %vm2634_vm9, %vm2635_vm8  ;;  %vm2655_vm12 = vweird.f32 %v3934_v4 }
 0x942   :  { %v2631_v58 = vsub.f32 1.0, %v2630_v52  ;;  %vm2656_vm14 = vmor %vm2654_vm13, %vm2655_vm12 }
 0x943   :  { %v2651_v44 = vsub.f32 1.0, %v2650_v54 }
 0x944   :  { %v2632_v37 = vmul.f32 %v3932_v25, %v2631_v58 }
 0x945   :  { %v2652_v55 = vmul.f32 %v3934_v4, %v2651_v44 }
 0x946   :  { %v2633_v28 = vadd.f32 %v3932_v25, %v2632_v37 }
 0x947   :  { %v2653_v33 = vadd.f32 %v3934_v4, %v2652_v55 }
 0x948   :  { %v2637_v3 = vsel %vm2636_vm10, %v3932_v25, %v2633_v28 }
 0x949   :  { %v2642_v32 = vsel %vm2639_vm11, %v2641_v22, %v2637_v3  ;;  %v2657_v20 = vsel %vm2656_vm14, %v3934_v4, %v2653_v33 }
 0x94a   :  { %v2665_v41 = vmul.f32 %v2664_v5, %v2642_v32  ;;  %v2662_v31 = vsel %vm2659_vm15, %v2661_v63, %v2657_v20  ;;  %v5405_v63 = vld [vmem:[#allocation33_spill] sm:$0xff] }
 0x94b   :  { %v2668_v19 = vsub.f32 1.0, %v2662_v31  ;;  %v2670_v11 = vmul.f32 %v2662_v31, %v5213_v24 }
 0x94c   :  { %v2666_v29 = vadd.f32 %v2665_v41, %v5068_v21 }
 0x94e   :  { %3935 = vtanh.f32 %v2666_v29  ;;  %v5404_v29 = vld [vmem:[#allocation29_spill] sm:$0xff] }
 0x954   :  { %v3936_v50 = vpop.eup %3935 }
 0x955   :  { %v2669_v45 = vmul.f32 %v3936_v50, %v2668_v19 }
 0x957   :  { %v5246_v46 = vadd.f32 %v2670_v11, %v2669_v45 }
 0x959   :  { %v2676_v9 = vpack.c.bf16 %v5246_v46, %v5246_v46 }
 0x95b   :  { %2685 = vmatmul.bf16.vlgmr.msrb.gmra.mxu1 %v2676_v9  ;;  %2698 = vmatmul.bf16.vlgmr.msra.gmra.mxu2 %v2676_v9 }
 0x95c   :  { %2711 = vmatmul.bf16.vlgmr.msra.gmra.mxu3 %v2676_v9  ;;  %2887 = vmatpush.bf16.msrb.mxu1 %v4943_v61 }
 0x95d   :  { %2952 = vmatpush.bf16.msra.mxu2 %v4917_v40  ;;  %2965 = vmatpush.bf16.msra.mxu3 %v4919_v18 }
 0x960   :  { %2888 = vmatpush.bf16.msrb.mxu1 %v4953_v13 }
 0x961   :  { %2953 = vmatpush.bf16.msra.mxu2 %v4922_v56  ;;  %2966 = vmatpush.bf16.msra.mxu3 %v4927_v43 }
 0x964   :  { %2889 = vmatpush.bf16.msrb.mxu1 %v4963_v23 }
 0x965   :  { %2954 = vmatpush.bf16.msra.mxu2 %v4936_v39  ;;  %2967 = vmatpush.bf16.msra.mxu3 %v4938_v59 }
 0x968   :  { %2890 = vmatpush.bf16.msrb.mxu1 %v4973_v26 }
 0x969   :  { %2955 = vmatpush.bf16.msra.mxu2 %v4946_v53  ;;  %2968 = vmatpush.bf16.msra.mxu3 %v4948_v60 }
 0x96c   :  { %2891 = vmatpush.bf16.msrb.mxu1 %v4998_v6 }
 0x96d   :  { %2956 = vmatpush.bf16.msra.mxu2 %v4956_v10  ;;  %2969 = vmatpush.bf16.msra.mxu3 %v4958_v38 }
 0x970   :  { %2892 = vmatpush.bf16.msrb.mxu1 %v5020_v12 }
 0x971   :  { %2957 = vmatpush.bf16.msra.mxu2 %v4966_v30  ;;  %2970 = vmatpush.bf16.msra.mxu3 %v4968_v17 }
 0x974   :  { %2893 = vmatpush.bf16.msrb.mxu1 %v5029_v2 }
 0x975   :  { %2958 = vmatpush.bf16.msra.mxu2 %v4975_v36  ;;  %2971 = vmatpush.bf16.msra.mxu3 %v4982_v14 }
 0x978   :  { %2894 = vmatpush.bf16.msrb.mxu1 %v5036_v49 }
 0x979   :  { %2959 = vmatpush.bf16.msra.mxu2 %v4985_v34  ;;  %2972 = vmatpush.bf16.msra.mxu3 %v5006_v1 }
 0x9d8   :  { %v2686_v40 = vpop.f32.mrf.mxu1 }
 0x9d9   :  { %v2716_v18 = vadd.f32 %v2686_v40, %v5061_v62 }
 0x9db   :  { %v3615_v56 = vmul.f32 -1.442695, %v2716_v18 }
 0x9dd   :  { %3937 = vpow2.f32 %v3615_v56 }
 0x9de   :  { %v2699_v43 = vpop.f32.mrf.mxu2 }
 0x9df   :  { %v2736_v39 = vadd.f32 %v2699_v43, %v5063_v8  ;;  %v2712_v59 = vpop.f32.mrf.mxu3 }
 0x9e0   :  { %v2688_v53 = vpop.f32.mrf.mxu1  ;;  %v2756_v4 = vadd.f32 %v5136_v35, %v2712_v59 }
 0x9e1   :  { %v3616_v60 = vmul.f32 -1.442695, %v2736_v39 }
 0x9e3   :  { %v3938_v10 = vpop.eup %3937  ;;  %3939 = vpow2.f32 %v3616_v60 }
 0x9e4   :  { %v2720_v38 = vadd.f32 1.0, %v3938_v10 }
 0x9e6   :  { %3941 = vrcp.f32 %v2720_v38  ;;  %v2701_v30 = vpop.f32.mrf.mxu2  ;;  %v2732_v21 = vand.u32 2147483648, %v2720_v38  ;;  %v2730_v15 = vand.u32 2147483647, %v2720_v38  ;;  %vm2726_vm1 = vweird.f32 %v2720_v38 }
 0x9e7   :  { %v2714_v17 = vpop.f32.mrf.mxu3 }
 0x9e8   :  { %v2733_v48 = vor.u32 1.1754944e-38, %v2732_v21  ;;  %vm2731_vm3 = vcmp.eq.f32.partialorder %v2730_v15, 8.507059e+37 }
 0x9e9   :  { %v3940_v36 = vpop.eup %3939 }
 0x9ea   :  { %v2740_v14 = vadd.f32 1.0, %v3940_v36 }
 0x9ec   :  { %v3942_v34 = vpop.eup %3941  ;;  %3943 = vrcp.f32 %v2740_v14  ;;  %v2752_v58 = vand.u32 2147483648, %v2740_v14  ;;  %v2750_v44 = vand.u32 2147483647, %v2740_v14  ;;  %vm2746_vm5 = vweird.f32 %v2740_v14 }
 0x9ed   :  { %v2722_v1 = vmul.f32 %v3942_v34, %v2720_v38  ;;  %vm2727_vm0 = vweird.f32 %v3942_v34 }
 0x9ee   :  { %vm2728_vm2 = vmor %vm2726_vm1, %vm2727_vm0  ;;  %v2753_v55 = vor.u32 1.1754944e-38, %v2752_v58  ;;  %vm2751_vm7 = vcmp.eq.f32.partialorder %v2750_v44, 8.507059e+37 }
 0x9ef   :  { %v2723_v62 = vsub.f32 1.0, %v2722_v1  ;;  %v5406_v1 = vld [vmem:[#allocation30_spill] sm:$0xff] }
 0x9f1   :  { %v2724_v24 = vmul.f32 %v3942_v34, %v2723_v62 }
 0x9f2   :  { %v3944_v8 = vpop.eup %3943 }
 0x9f3   :  { %v2742_v7 = vmul.f32 %v3944_v8, %v2740_v14  ;;  %v2725_v0 = vadd.f32 %v3942_v34, %v2724_v24  ;;  %vm2747_vm4 = vweird.f32 %v3944_v8 }
 0x9f4   :  { %vm2748_vm6 = vmor %vm2746_vm5, %vm2747_vm4 }
 0x9f5   :  { %v2743_v16 = vsub.f32 1.0, %v2742_v7  ;;  %v2729_v25 = vsel %vm2728_vm2, %v3942_v34, %v2725_v0 }
 0x9f6   :  { %v2734_v52 = vsel %vm2731_vm3, %v2733_v48, %v2729_v25 }
 0x9f7   :  { %v2744_v54 = vmul.f32 %v3944_v8, %v2743_v16  ;;  %v2757_v42 = vmul.f32 %v2756_v4, %v2734_v52  ;;  %v5407_v52 = vld [vmem:[#allocation16_spill] sm:$0xff] }
 0x9f9   :  { %v2745_v37 = vadd.f32 %v3944_v8, %v2744_v54  ;;  %v2758_v51 = vadd.f32 %v2757_v42, %v5049_v27 }
 0x9fb   :  { %v2749_v28 = vsel %vm2748_vm6, %v3944_v8, %v2745_v37  ;;  %3945 = vtanh.f32 %v2758_v51  ;;  %v5408_v37 = vld [vmem:[#allocation31_spill] sm:$0xff] }
 0x9fc   :  { %v2754_v22 = vsel %vm2751_vm7, %v2753_v55, %v2749_v28 }
 0x9fd   :  { %v2760_v5 = vsub.f32 1.0, %v2754_v22  ;;  %v2762_v33 = vmul.f32 %v2754_v22, %v5246_v46 }
 0xa01   :  { %v3946_v3 = vpop.eup %3945 }
 0xa02   :  { %v2761_v32 = vmul.f32 %v3946_v3, %v2760_v5 }
 0xa04   :  { %v5279_v41 = vadd.f32 %v2762_v33, %v2761_v32 }
 0xa06   :  { %v2768_v57 = vpack.c.bf16 %v5279_v41, %v5279_v41 }
 0xa08   :  { %2777 = vmatmul.bf16.vlgmr.msra.gmra.mxu0 %v2768_v57  ;;  %2790 = vmatmul.bf16.vlgmr.msra.gmra.mxu1 %v2768_v57 }
 0xa09   :  { %2803 = vmatmul.bf16.vlgmr.msrb.gmra.mxu2 %v2768_v57  ;;  %2978 = vmatpush.bf16.msra.mxu0 %v4943_v61 }
 0xa0d   :  { %2979 = vmatpush.bf16.msra.mxu0 %v4953_v13 }
 0xa11   :  { %2980 = vmatpush.bf16.msra.mxu0 %v4963_v23 }
 0xa15   :  { %2981 = vmatpush.bf16.msra.mxu0 %v4973_v26 }
 0xa19   :  { %2982 = vmatpush.bf16.msra.mxu0 %v4998_v6 }
 0xa1d   :  { %2983 = vmatpush.bf16.msra.mxu0 %v5020_v12 }
 0xa21   :  { %2984 = vmatpush.bf16.msra.mxu0 %v5029_v2 }
 0xa25   :  { %2985 = vmatpush.bf16.msra.mxu0 %v5036_v49 }
 0xa85   :  { %v2778_v27 = vpop.f32.mrf.mxu0  ;;  %v2791_v47 = vpop.f32.mrf.mxu1 }
 0xa86   :  { %v2808_v20 = vadd.f32 %v2778_v27, %v5404_v29  ;;  %v2828_v61 = vadd.f32 %v2791_v47, %v5405_v63 }
 0xa88   :  { %v3617_v31 = vmul.f32 -1.442695, %v2808_v20  ;;  %v3618_v13 = vmul.f32 -1.442695, %v2828_v61 }
 0xa8a   :  { %3947 = vpow2.f32 %v3617_v31 }
 0xa8b   :  { %3949 = vpow2.f32 %v3618_v13 }
 0xa8c   :  { %v2804_v23 = vpop.f32.mrf.mxu2 }
 0xa8d   :  { %v2780_v26 = vpop.f32.mrf.mxu0  ;;  %v2793_v19 = vpop.f32.mrf.mxu1  ;;  %v2848_v38 = vadd.f32 %v5136_v35, %v2804_v23 }
 0xa90   :  { %v3948_v6 = vpop.eup %3947 }
 0xa91   :  { %v3950_v50 = vpop.eup %3949  ;;  %v2812_v12 = vadd.f32 1.0, %v3948_v6 }
 0xa92   :  { %v2832_v45 = vadd.f32 1.0, %v3950_v50 }
 0xa93   :  { %3951 = vrcp.f32 %v2812_v12  ;;  %v2824_v56 = vand.u32 2147483648, %v2812_v12  ;;  %v2822_v39 = vand.u32 2147483647, %v2812_v12  ;;  %vm2818_vm9 = vweird.f32 %v2812_v12 }
 0xa94   :  { %3953 = vrcp.f32 %v2832_v45  ;;  %v2806_v2 = vpop.f32.mrf.mxu2  ;;  %v2844_v36 = vand.u32 2147483648, %v2832_v45  ;;  %vm2838_vm13 = vweird.f32 %v2832_v45  ;;  %v2842_v34 = vand.u32 2147483647, %v2832_v45 }
 0xa95   :  { %v2825_v60 = vor.u32 1.1754944e-38, %v2824_v56  ;;  %vm2823_vm11 = vcmp.eq.f32.partialorder %v2822_v39, 8.507059e+37 }
 0xa96   :  { %v2845_v24 = vor.u32 1.1754944e-38, %v2844_v36  ;;  %vm2843_vm15 = vcmp.eq.f32.partialorder %v2842_v34, 8.507059e+37 }
 0xa99   :  { %v3952_v49 = vpop.eup %3951 }
 0xa9a   :  { %v3954_v11 = vpop.eup %3953  ;;  %v2814_v46 = vmul.f32 %v3952_v49, %v2812_v12  ;;  %vm2819_vm8 = vweird.f32 %v3952_v49 }
 0xa9b   :  { %v2834_v9 = vmul.f32 %v3954_v11, %v2832_v45  ;;  %vm2820_vm10 = vmor %vm2818_vm9, %vm2819_vm8  ;;  %vm2839_vm12 = vweird.f32 %v3954_v11 }
 0xa9c   :  { %v2815_v40 = vsub.f32 1.0, %v2814_v46  ;;  %vm2840_vm14 = vmor %vm2838_vm13, %vm2839_vm12  ;;  %v5409_v46 = vld [vmem:[#allocation24_spill] sm:$0xff] }
 0xa9d   :  { %v2835_v18 = vsub.f32 1.0, %v2834_v9 }
 0xa9e   :  { %v2816_v43 = vmul.f32 %v3952_v49, %v2815_v40 }
 0xa9f   :  { %v2836_v59 = vmul.f32 %v3954_v11, %v2835_v18 }
 0xaa0   :  { %v2817_v53 = vadd.f32 %v3952_v49, %v2816_v43 }
 0xaa1   :  { %v2837_v30 = vadd.f32 %v3954_v11, %v2836_v59 }
 0xaa2   :  { %v2821_v10 = vsel %vm2820_vm10, %v3952_v49, %v2817_v53 }
 0xaa3   :  { %v2826_v17 = vsel %vm2823_vm11, %v2825_v60, %v2821_v10  ;;  %v2841_v21 = vsel %vm2840_vm14, %v3954_v11, %v2837_v30 }
 0xaa4   :  { %v2849_v14 = vmul.f32 %v2848_v38, %v2826_v17  ;;  %v2846_v15 = vsel %vm2843_vm15, %v2845_v24, %v2841_v21  ;;  %v5410_v17 = vld [vmem:[#allocation26_spill] sm:$0xff] }
 0xaa5   :  { %v2852_v8 = vsub.f32 1.0, %v2846_v15  ;;  %v2854_v48 = vmul.f32 %v2846_v15, %v5279_v41 }
 0xaa6   :  { %v2850_v62 = vadd.f32 %v2849_v14, %v5406_v1  ;;  %v5411_v14 = vld [vmem:[#allocation27_spill] sm:$0xff] }
 0xaa8   :  { %3955 = vtanh.f32 %v2850_v62 }
 0xaae   :  { %v3956_v7 = vpop.eup %3955 }
 0xaaf   :  { %v2853_v0 = vmul.f32 %v3956_v7, %v2852_v8 }
 0xab1   :  { %v2855_v16 = vadd.f32 %v2854_v48, %v2853_v0 }
 0xab3   :  { %v2860_v25 = vpack.c.bf16 %v2855_v16, %v2855_v16 }
 0xab5   :  { %2869 = vmatmul.bf16.vlgmr.msrb.gmra.mxu3 %v2860_v25  ;;  %2882 = vmatmul.bf16.vlgmr.msrb.gmra.mxu0 %v2860_v25 }
 0xab6   :  { %2895 = vmatmul.bf16.vlgmr.msrb.gmra.mxu1 %v2860_v25 }
 0xb32   :  { %v2883_v4 = vpop.f32.mrf.mxu0 }
 0xb33   :  { %v2920_v54 = vadd.f32 %v2883_v4, %v5407_v52  ;;  %v2896_v58 = vpop.f32.mrf.mxu1 }
 0xb34   :  { %v2940_v6 = vadd.f32 %v5136_v35, %v2896_v58 }
 0xb35   :  { %v3620_v42 = vmul.f32 -1.442695, %v2920_v54 }
 0xb37   :  { %3957 = vpow2.f32 %v3620_v42 }
 0xb38   :  { %v2870_v44 = vpop.f32.mrf.mxu3 }
 0xb39   :  { %v2900_v51 = vadd.f32 %v2870_v44, %v5408_v37 }
 0xb3a   :  { %v2885_v55 = vpop.f32.mrf.mxu0 }
 0xb3b   :  { %v3619_v28 = vmul.f32 -1.442695, %v2900_v51  ;;  %v2898_v22 = vpop.f32.mrf.mxu1 }
 0xb3c   :  { %v3978_v22 = vld [vmem:[%s5322_s13] ss:$0 sm:$0xff] }
 0xb3d   :  { %v3958_v5 = vpop.eup %3957  ;;  %3959 = vpow2.f32 %v3619_v28 }
 0xb3e   :  { %v2924_v3 = vadd.f32 1.0, %v3958_v5 }
 0xb40   :  { %v2872_v32 = vpop.f32.mrf.mxu3  ;;  %3961 = vrcp.f32 %v2924_v3  ;;  %v2936_v2 = vand.u32 2147483648, %v2924_v3  ;;  %vm2930_vm5 = vweird.f32 %v2924_v3  ;;  %v2934_v11 = vand.u32 2147483647, %v2924_v3 }
 0xb42   :  { %v2937_v18 = vor.u32 1.1754944e-38, %v2936_v2  ;;  %vm2935_vm7 = vcmp.eq.f32.partialorder %v2934_v11, 8.507059e+37 }
 0xb43   :  { %v3960_v33 = vpop.eup %3959 }
 0xb44   :  { %v2904_v41 = vadd.f32 1.0, %v3960_v33 }
 0xb46   :  { %3963 = vrcp.f32 %v2904_v41  ;;  %v3962_v57 = vpop.eup %3961  ;;  %v2916_v61 = vand.u32 2147483648, %v2904_v41  ;;  %v2914_v13 = vand.u32 2147483647, %v2904_v41  ;;  %vm2910_vm1 = vweird.f32 %v2904_v41 }
 0xb47   :  { %v2926_v27 = vmul.f32 %v3962_v57, %v2924_v3  ;;  %vm2931_vm4 = vweird.f32 %v3962_v57 }
 0xb48   :  { %v2917_v19 = vor.u32 1.1754944e-38, %v2916_v61  ;;  %vm2915_vm3 = vcmp.eq.f32.partialorder %v2914_v13, 8.507059e+37  ;;  %vm2932_vm6 = vmor %vm2930_vm5, %vm2931_vm4 }
 0xb49   :  { %v2927_v20 = vsub.f32 1.0, %v2926_v27 }
 0xb4b   :  { %v2928_v23 = vmul.f32 %v3962_v57, %v2927_v20 }
 0xb4c   :  { %v3964_v47 = vpop.eup %3963 }
 0xb4d   :  { %v2906_v29 = vmul.f32 %v3964_v47, %v2904_v41  ;;  %vm2911_vm0 = vweird.f32 %v3964_v47  ;;  %v2929_v12 = vadd.f32 %v3962_v57, %v2928_v23 }
 0xb4e   :  { %vm2912_vm2 = vmor %vm2910_vm1, %vm2911_vm0 }
 0xb4f   :  { %v2907_v63 = vsub.f32 1.0, %v2906_v29  ;;  %v2933_v40 = vsel %vm2932_vm6, %v3962_v57, %v2929_v12 }
 0xb50   :  { %v2938_v56 = vsel %vm2935_vm7, %v2937_v18, %v2933_v40 }
 0xb51   :  { %v2908_v31 = vmul.f32 %v3964_v47, %v2907_v63  ;;  %v2944_v43 = vsub.f32 1.0, %v2938_v56  ;;  %v2946_v59 = vmul.f32 %v2938_v56, %v2855_v16 }
 0xb53   :  { %v2909_v26 = vadd.f32 %v3964_v47, %v2908_v31 }
 0xb55   :  { %v2913_v50 = vsel %vm2912_vm2, %v3964_v47, %v2909_v26  ;;  %v5412_v47 = vld [vmem:[#allocation22_spill] sm:$0xff] }
 0xb56   :  { %v2918_v45 = vsel %vm2915_vm3, %v2917_v19, %v2913_v50 }
 0xb57   :  { %v2941_v49 = vmul.f32 %v2940_v6, %v2918_v45 }
 0xb59   :  { %v2942_v9 = vadd.f32 %v2941_v49, %v5409_v46 }
 0xb5b   :  { %3965 = vtanh.f32 %v2942_v9 }
 0xb61   :  { %v3966_v39 = vpop.eup %3965 }
 0xb62   :  { %v2945_v35 = vmul.f32 %v3966_v39, %v2944_v43 }
 0xb64   :  { %v2947_v53 = vadd.f32 %v2946_v59, %v2945_v35 }
 0xb66   :  { %v2951_v60 = vpack.c.bf16 %v2947_v53, %v2947_v53 }
 0xb68   :  { %2960 = vmatmul.bf16.vlgmr.msra.gmra.mxu2 %v2951_v60  ;;  %2973 = vmatmul.bf16.vlgmr.msra.gmra.mxu3 %v2951_v60 }
 0xb69   :  { %2986 = vmatmul.bf16.vlgmr.msra.gmra.mxu0 %v2951_v60 }
 0xbe6   :  { %v2987_v10 = vpop.f32.mrf.mxu0 }
 0xbe7   :  { %v3031_v5 = vadd.f32 %v3978_v22, %v2987_v10 }
 0xbeb   :  { %v2961_v38 = vpop.f32.mrf.mxu2  ;;  %v2974_v30 = vpop.f32.mrf.mxu3 }
 0xbec   :  { %v2991_v36 = vadd.f32 %v2961_v38, %v5410_v17  ;;  %v3011_v34 = vadd.f32 %v2974_v30, %v5411_v14 }
 0xbee   :  { %v3621_v1 = vmul.f32 -1.442695, %v2991_v36  ;;  %v3622_v62 = vmul.f32 -1.442695, %v3011_v34  ;;  %v2989_v21 = vpop.f32.mrf.mxu0 }
 0xbf0   :  { %3967 = vpow2.f32 %v3621_v1 }
 0xbf1   :  { %3969 = vpow2.f32 %v3622_v62 }
 0xbf3   :  { %v2963_v24 = vpop.f32.mrf.mxu2  ;;  %v2976_v15 = vpop.f32.mrf.mxu3 }
 0xbf6   :  { %v3968_v8 = vpop.eup %3967 }
 0xbf7   :  { %v3970_v7 = vpop.eup %3969  ;;  %v2995_v0 = vadd.f32 1.0, %v3968_v8 }
 0xbf8   :  { %v3015_v48 = vadd.f32 1.0, %v3970_v7 }
 0xbf9   :  { %3971 = vrcp.f32 %v2995_v0  ;;  %v3007_v58 = vand.u32 2147483648, %v2995_v0  ;;  %v3005_v37 = vand.u32 2147483647, %v2995_v0  ;;  %vm3001_vm9 = vweird.f32 %v2995_v0 }
 0xbfa   :  { %3973 = vrcp.f32 %v3015_v48  ;;  %v3027_v57 = vand.u32 2147483648, %v3015_v48  ;;  %vm3021_vm13 = vweird.f32 %v3015_v48  ;;  %v3025_v27 = vand.u32 2147483647, %v3015_v48 }
 0xbfb   :  { %v3008_v28 = vor.u32 1.1754944e-38, %v3007_v58  ;;  %vm3006_vm11 = vcmp.eq.f32.partialorder %v3005_v37, 8.507059e+37 }
 0xbfc   :  { %v3028_v63 = vor.u32 1.1754944e-38, %v3027_v57  ;;  %vm3026_vm15 = vcmp.eq.f32.partialorder %v3025_v27, 8.507059e+37 }
 0xbff   :  { %v3972_v16 = vpop.eup %3971 }
 0xc00   :  { %v3974_v25 = vpop.eup %3973  ;;  %v2997_v4 = vmul.f32 %v3972_v16, %v2995_v0  ;;  %vm3002_vm8 = vweird.f32 %v3972_v16 }
 0xc01   :  { %v3017_v52 = vmul.f32 %v3974_v25, %v3015_v48  ;;  %vm3003_vm10 = vmor %vm3001_vm9, %vm3002_vm8  ;;  %vm3022_vm12 = vweird.f32 %v3974_v25 }
 0xc02   :  { %v2998_v54 = vsub.f32 1.0, %v2997_v4  ;;  %vm3023_vm14 = vmor %vm3021_vm13, %vm3022_vm12 }
 0xc03   :  { %v3018_v42 = vsub.f32 1.0, %v3017_v52 }
 0xc04   :  { %v2999_v44 = vmul.f32 %v3972_v16, %v2998_v54 }
 0xc05   :  { %v3019_v51 = vmul.f32 %v3974_v25, %v3018_v42 }
 0xc06   :  { %v3000_v55 = vadd.f32 %v3972_v16, %v2999_v44 }
 0xc07   :  { %v3020_v33 = vadd.f32 %v3974_v25, %v3019_v51 }
 0xc08   :  { %v3004_v3 = vsel %vm3003_vm10, %v3972_v16, %v3000_v55 }
 0xc09   :  { %v3009_v32 = vsel %vm3006_vm11, %v3008_v28, %v3004_v3  ;;  %v3024_v20 = vsel %vm3023_vm14, %v3974_v25, %v3020_v33 }
 0xc0a   :  { %v3032_v41 = vmul.f32 %v3031_v5, %v3009_v32  ;;  %v3029_v61 = vsel %vm3026_vm15, %v3028_v63, %v3024_v20 }
 0xc0b   :  { %v3035_v31 = vsub.f32 1.0, %v3029_v61  ;;  %v3037_v26 = vmul.f32 %v3029_v61, %v2947_v53 }
 0xc0c   :  { %v3033_v29 = vadd.f32 %v3032_v41, %v5412_v47 }
 0xc0e   :  { %3975 = vtanh.f32 %v3033_v29 }
 0xc14   :  { %v3976_v13 = vpop.eup %3975 }
 0xc15   :  { %v3036_v23 = vmul.f32 %v3976_v13, %v3035_v31 }
 0xc17   :  { %v3038_v19 = vadd.f32 %v3037_v26, %v3036_v23 }
 0xc19   :  { %3039 = vst [vmem:[%s5323_s14] sm:$0xff] %v3038_v19 }
 0xc1a   :  { %3044 = vsyncpa [#allocation6], 1 }
 0xc1b   :  { %3045 = vsyncpa [#allocation8], 1 }
 0xc1c   :  { %3046 = vsyncpa [#allocation11], 1 }

</bundles_post_ra>
